<compile_context>
chip_gen: v7x
topology: tpu7x:2x2x1
jax: 0.10.0
libtpu: 0.0.40
codegen_flags: <defaults>
</compile_context>

<pallas_src>
import functools

import jax
import jax.numpy as jnp
from jax.experimental import pallas as pl
from jax.experimental.pallas import tpu as pltpu


def head_kernel(feats_ref, w1_ref, b1_ref, w2_ref, b2_ref, out_ref, acc_ref,
                *, hw, tile_hw):
    # feats_ref: [block_b, C, tile_hw]  (NCHW, spatial flattened on the lane axis)
    # w1_ref: [C, 32]  b1_ref: [1, 32]  w2_ref: [1, 32]  b2_ref: [1, 1]
    # out_ref: [block_b, 1]   acc_ref (VMEM scratch): [block_b, C] running max
    k = pl.program_id(1)

    @pl.when(k == 0)
    def _():
        acc_ref[...] = jnp.full(acc_ref.shape, -jnp.inf, acc_ref.dtype)

    f = feats_ref[...].astype(jnp.float32)
    if hw % tile_hw != 0:
        # Last spatial tile is padded by Pallas: mask pad positions to -inf
        # so they cannot corrupt the max.
        pos = k * tile_hw + jax.lax.broadcasted_iota(jnp.int32, f.shape, 2)
        f = jnp.where(pos < hw, f, -jnp.inf)

    # AdaptiveMaxPool2d(1): running max over spatial tiles.
    acc_ref[...] = jnp.maximum(acc_ref[...], jnp.max(f, axis=-1))

    @pl.when(k == pl.num_programs(1) - 1)
    def _():
        pooled = acc_ref[...]                                        # [block_b, C]
        # Conv2d(512, 32, 1): channel matmul on the MXU, + bias, ReLU.
        h = jnp.dot(pooled, w1_ref[...],
                    preferred_element_type=jnp.float32) + b1_ref[...]  # [block_b, 32]
        h = jnp.maximum(h, 0.0)
        # Conv2d(32, 1, 1): VPU row-dot (avoid a 1-useful-lane MXU pass), + bias.
        y = jnp.sum(h * w2_ref[...], axis=-1, keepdims=True) + b2_ref[...]  # [block_b, 1]
        out_ref[...] = jax.nn.sigmoid(y).astype(out_ref.dtype)


def tumor_classifier_head(feats_nchw, params):
    """Classifier head on feats[-1] ([B, 512, H, W]) -> [B, 1] (eval-mode semantics)."""
    B, C, H, W = feats_nchw.shape
    HW = H * W

    # No transpose: keep native NCHW order, just flatten spatial (view-like reshape).
    feats = feats_nchw.reshape(B, C, HW)

    # Weight reshapes for the 1x1 convs (tiny, done once in plain JAX).
    w1 = jnp.transpose(params["w1"].reshape(32, C)).astype(jnp.float32)   # [C, 32]
    b1 = params["b1"].reshape(1, 32).astype(jnp.float32)
    w2 = params["w2"].reshape(1, 32).astype(jnp.float32)                  # row for VPU dot
    b2 = params["b2"].reshape(1, 1).astype(jnp.float32)

    # Batch tiling: a "parallel" axis of 8-row batch blocks when B is a multiple of 8
    # (sublane-aligned output blocks, megacore sharding on v7x); otherwise one block.
    # TODO(synk): batches that are not multiples of 8 run as a single batch block.
    block_b = 8 if (B % 8 == 0 and B > 8) else B
    num_b = B // block_b

    # Spatial tiling: keep each feats block <= ~2 MiB (double-buffered by Pallas),
    # tile size a multiple of 128 lanes, or the full HW extent if it is small.
    bytes_per_pos = block_b * C * feats.dtype.itemsize
    tile_hw = max(128, ((2 * 1024 * 1024) // bytes_per_pos) // 128 * 128)
    if tile_hw >= HW:
        tile_hw = HW
    num_k = pl.cdiv(HW, tile_hw)

    kernel = functools.partial(head_kernel, hw=HW, tile_hw=tile_hw)

    feats_bytes = feats.size * feats.dtype.itemsize
    cost = pl.CostEstimate(
        flops=int(B * C * HW + 2 * B * C * 32 + 2 * B * 32),
        transcendentals=int(B),
        bytes_accessed=int(feats_bytes + w1.size * 4 + b1.size * 4
                           + w2.size * 4 + b2.size * 4 + B * 4),
    )

    out = pl.pallas_call(
        kernel,
        out_shape=jax.ShapeDtypeStruct((B, 1), jnp.float32),
        grid_spec=pltpu.PrefetchScalarGridSpec(
            num_scalar_prefetch=0,
            grid=(num_b, num_k),
            in_specs=[
                pl.BlockSpec((block_b, C, tile_hw), lambda b, k: (b, 0, k)),
                pl.BlockSpec((C, 32), lambda b, k: (0, 0)),
                pl.BlockSpec((1, 32), lambda b, k: (0, 0)),
                pl.BlockSpec((1, 32), lambda b, k: (0, 0)),
                pl.BlockSpec((1, 1), lambda b, k: (0, 0)),
            ],
            out_specs=pl.BlockSpec((block_b, 1), lambda b, k: (b, 0)),
            scratch_shapes=[pltpu.VMEM((block_b, C), jnp.float32)],
        ),
        compiler_params=pltpu.CompilerParams(
            dimension_semantics=("parallel", "arbitrary"),
            vmem_limit_bytes=32 * 1024 * 1024,
        ),
        cost_estimate=cost,
    )(feats, w1, b1, w2, b2)
    return out


def tumor_classifier_forward(feats_nchw, params):
    """Mirrors TumorClassifier.forward: returns ([r], _)."""
    r = tumor_classifier_head(feats_nchw, params)  # [B, 1] == squeeze(1).squeeze(1) of [B,1,1,1]
    mid_outputs = None  # TODO(synk): '_' comes from the unavailable resnet18 backbone.
    return ([r], mid_outputs)


def init_params(key):
    """Deterministic parameter init matching Conv2d(512,32,1) and Conv2d(32,1,1)."""
    k1, k2, k3, k4 = jax.random.split(key, 4)
    return {
        "w1": jax.random.normal(k1, (32, 512, 1, 1), jnp.float32) * 0.02,
        "b1": jax.random.normal(k2, (32,), jnp.float32) * 0.02,
        "w2": jax.random.normal(k3, (1, 32, 1, 1), jnp.float32) * 0.02,
        "b2": jax.random.normal(k4, (1,), jnp.float32) * 0.02,
    }


if __name__ == "__main__":
    key = jax.random.PRNGKey(0)
    k_feat, k_param = jax.random.split(key)

    # Small, shape-consistent example: feats[-1] of the resnet18 backbone
    # (512 channels, 8x8 spatial map), batch=2.
    B, C, H, W = 2, 512, 8, 8
    feats_last = jax.random.normal(k_feat, (B, C, H, W), jnp.float32)
    params = init_params(k_param)

    (r_list, mid) = tumor_classifier_forward(feats_last, params)
    r = jax.block_until_ready(r_list[0])

    # Reference check in plain JAX (same eval-mode semantics).
    pooled_ref = jnp.max(feats_last.reshape(B, C, H * W), axis=-1)
    h_ref = jnp.maximum(pooled_ref @ params["w1"].reshape(32, C).T
                        + params["b1"][None, :], 0.0)
    y_ref = jax.nn.sigmoid(h_ref @ params["w2"].reshape(1, 32).T + params["b2"][None, :])

    assert r.shape == (B, 1), r.shape
    assert jnp.all(jnp.isfinite(r)) and jnp.all((r >= 0.0) & (r <= 1.0))
    assert jnp.allclose(r, y_ref, atol=1e-5, rtol=1e-5), (r, y_ref)
    print("KERNEL_OK")
</pallas_src>

<mosaic_0001>
module attributes {stable_mosaic.version = 11 : i64} {
  func.func @head_kernel(%arg0: i32, %arg1: i32, %arg2: memref<2x512x64xf32, #tpu.memory_space<vmem>>, %arg3: memref<512x32xf32, #tpu.memory_space<vmem>>, %arg4: memref<1x32xf32, #tpu.memory_space<vmem>>, %arg5: memref<1x32xf32, #tpu.memory_space<vmem>>, %arg6: memref<1x1xf32, #tpu.memory_space<vmem>>, %arg7: memref<2x1xf32, #tpu.memory_space<vmem>>, %arg8: memref<2x512xf32, #tpu.memory_space<vmem>>) attributes {dimension_semantics = [#tpu.dimension_semantics<parallel>, #tpu.dimension_semantics<arbitrary>], iteration_bounds = array<i64: 1, 1>, scalar_prefetch = 0 : i64, scratch_operands = 1 : i64, tpu.core_type = #tpu.core_type<tc>, window_params = [{transform_indices = @transform_0, window_bounds = array<i64: 2, 512, 64>}, {pipeline_mode = #tpu.pipeline_mode<synchronous>, transform_indices = @transform_1, window_bounds = array<i64: 512, 32>}, {pipeline_mode = #tpu.pipeline_mode<synchronous>, transform_indices = @transform_2, window_bounds = array<i64: 1, 32>}, {pipeline_mode = #tpu.pipeline_mode<synchronous>, transform_indices = @transform_3, window_bounds = array<i64: 1, 32>}, {pipeline_mode = #tpu.pipeline_mode<synchronous>, transform_indices = @transform_4, window_bounds = array<i64: 1, 1>}, {transform_indices = @transform_5, window_bounds = array<i64: 2, 1>}]} {
    %c0_i32 = arith.constant 0 : i32
    %0 = arith.cmpi eq, %arg1, %c0_i32 : i32
    %1 = arith.extui %0 : i1 to i32
    %c0_i32_0 = arith.constant 0 : i32
    %2 = arith.cmpi ne, %1, %c0_i32_0 : i32
    scf.if %2 {
      %cst_9 = arith.constant 0xFF800000 : f32
      %11 = vector.broadcast %cst_9 : f32 to vector<2x512xf32>
      %c0_10 = arith.constant 0 : index
      %c0_11 = arith.constant 0 : index
      %12 = vector.load %arg8[%c0_10, %c0_11] : memref<2x512xf32, #tpu.memory_space<vmem>>, vector<2x512xf32>
      tpu.vector_store %arg8[%c0_10, %c0_11], %11 {strides = array<i32>} : memref<2x512xf32, #tpu.memory_space<vmem>>, vector<2x512xf32>,
    } else {
    }
    %c0 = arith.constant 0 : index
    %c0_1 = arith.constant 0 : index
    %c0_2 = arith.constant 0 : index
    %3 = vector.load %arg2[%c0, %c0_1, %c0_2] : memref<2x512x64xf32, #tpu.memory_space<vmem>>, vector<2x512x64xf32>
    %c0_3 = arith.constant 0 : index
    %c0_4 = arith.constant 0 : index
    %4 = vector.load %arg8[%c0_3, %c0_4] : memref<2x512xf32, #tpu.memory_space<vmem>>, vector<2x512xf32>
    %cst = arith.constant dense<0xFF800000> : vector<2x512xf32>
    %5 = vector.multi_reduction <maximumf>, %3, %cst [2] : vector<2x512x64xf32> to vector<2x512xf32>
    %6 = arith.maximumf %4, %5 : vector<2x512xf32>
    %c0_5 = arith.constant 0 : index
    %c0_6 = arith.constant 0 : index
    %7 = vector.load %arg8[%c0_5, %c0_6] : memref<2x512xf32, #tpu.memory_space<vmem>>, vector<2x512xf32>
    tpu.vector_store %arg8[%c0_5, %c0_6], %6 {strides = array<i32>} : memref<2x512xf32, #tpu.memory_space<vmem>>, vector<2x512xf32>,
    %c0_i32_7 = arith.constant 0 : i32
    %8 = arith.cmpi eq, %arg1, %c0_i32_7 : i32
    %9 = arith.extui %8 : i1 to i32
    %c0_i32_8 = arith.constant 0 : i32
    %10 = arith.cmpi ne, %9, %c0_i32_8 : i32
    scf.if %10 {
      %c0_9 = arith.constant 0 : index
      %c0_10 = arith.constant 0 : index
      %11 = vector.load %arg8[%c0_9, %c0_10] : memref<2x512xf32, #tpu.memory_space<vmem>>, vector<2x512xf32>
      %c0_11 = arith.constant 0 : index
      %c0_12 = arith.constant 0 : index
      %12 = vector.load %arg3[%c0_11, %c0_12] : memref<512x32xf32, #tpu.memory_space<vmem>>, vector<512x32xf32>
      %cst_13 = arith.constant dense<0.000000e+00> : vector<2x32xf32>
      %13 = tpu.matmul %11, %12, %cst_13 {dimension_numbers = #tpu.dot_dimension_numbers<[1], [0], [0], [1], [0, 0, 1, 1], [], []>} : vector<2x512xf32>, vector<512x32xf32>, vector<2x32xf32> -> vector<2x32xf32>
      %c0_14 = arith.constant 0 : index
      %c0_15 = arith.constant 0 : index
      %14 = vector.load %arg4[%c0_14, %c0_15] : memref<1x32xf32, #tpu.memory_space<vmem>>, vector<1x32xf32>
      %15 = vector.broadcast %14 : vector<1x32xf32> to vector<2x32xf32>
      %16 = arith.addf %13, %15 : vector<2x32xf32>
      %cst_16 = arith.constant 0.000000e+00 : f32
      %17 = vector.broadcast %cst_16 : f32 to vector<2x32xf32>
      %18 = arith.maximumf %16, %17 : vector<2x32xf32>
      %c0_17 = arith.constant 0 : index
      %c0_18 = arith.constant 0 : index
      %19 = vector.load %arg5[%c0_17, %c0_18] : memref<1x32xf32, #tpu.memory_space<vmem>>, vector<1x32xf32>
      %20 = vector.broadcast %19 : vector<1x32xf32> to vector<2x32xf32>
      %21 = arith.mulf %18, %20 : vector<2x32xf32>
      %cst_19 = arith.constant dense<0.000000e+00> : vector<2xf32>
      %22 = vector.multi_reduction <add>, %21, %cst_19 [1] : vector<2x32xf32> to vector<2xf32>
      %23 = vector.shape_cast %22 : vector<2xf32> to vector<2x1xf32>
      %c0_20 = arith.constant 0 : index
      %c0_21 = arith.constant 0 : index
      %24 = vector.load %arg6[%c0_20, %c0_21] : memref<1x1xf32, #tpu.memory_space<vmem>>, vector<1x1xf32>
      %25 = vector.broadcast %24 : vector<1x1xf32> to vector<2x1xf32>
      %26 = arith.addf %23, %25 : vector<2x1xf32>
      %27 = arith.negf %26 : vector<2x1xf32>
      %28 = math.exp %27 : vector<2x1xf32>
      %cst_22 = arith.constant 1.000000e+00 : f32
      %29 = vector.broadcast %cst_22 : f32 to vector<2x1xf32>
      %30 = arith.addf %29, %28 : vector<2x1xf32>
      %31 = arith.divf %29, %30 : vector<2x1xf32>
      %c0_23 = arith.constant 0 : index
      %c0_24 = arith.constant 0 : index
      %32 = vector.load %arg7[%c0_23, %c0_24] : memref<2x1xf32, #tpu.memory_space<vmem>>, vector<2x1xf32>
      tpu.vector_store %arg7[%c0_23, %c0_24], %31 {strides = array<i32>} : memref<2x1xf32, #tpu.memory_space<vmem>>, vector<2x1xf32>,
    } else {
    }
    return
  }
  func.func @transform_0(%arg0: i32, %arg1: i32) -> (i32, i32, i32) {
    %c0_i32 = arith.constant 0 : i32
    %c0_i32_0 = arith.constant 0 : i32
    return %arg0, %c0_i32, %arg1 : i32, i32, i32
  }
  func.func @transform_1(%arg0: i32, %arg1: i32) -> (i32, i32) {
    %c0_i32 = arith.constant 0 : i32
    %c0_i32_0 = arith.constant 0 : i32
    %c0_i32_1 = arith.constant 0 : i32
    return %c0_i32, %c0_i32_0 : i32, i32
  }
  func.func @transform_2(%arg0: i32, %arg1: i32) -> (i32, i32) {
    %c0_i32 = arith.constant 0 : i32
    %c0_i32_0 = arith.constant 0 : i32
    %c0_i32_1 = arith.constant 0 : i32
    return %c0_i32, %c0_i32_0 : i32, i32
  }
  func.func @transform_3(%arg0: i32, %arg1: i32) -> (i32, i32) {
    %c0_i32 = arith.constant 0 : i32
    %c0_i32_0 = arith.constant 0 : i32
    %c0_i32_1 = arith.constant 0 : i32
    return %c0_i32, %c0_i32_0 : i32, i32
  }
  func.func @transform_4(%arg0: i32, %arg1: i32) -> (i32, i32) {
    %c0_i32 = arith.constant 0 : i32
    %c0_i32_0 = arith.constant 0 : i32
    %c0_i32_1 = arith.constant 0 : i32
    return %c0_i32, %c0_i32_0 : i32, i32
  }
  func.func @transform_5(%arg0: i32, %arg1: i32) -> (i32, i32) {
    %c0_i32 = arith.constant 0 : i32
    %c0_i32_0 = arith.constant 0 : i32
    return %arg0, %c0_i32 : i32, i32
  }
}

</mosaic_0001>

<bundles_post_ra>
// kernel: tpu_custom_call.1
= control target key start
LH: loop header
LB: loop body
LE: loop exit
PB: predicated region body
PF: predicated region fallthrough
CT: control target
= control target key end

     0   :  { %vm156_vm0 = vcmask 523264   ;;  %vm6824_vm1 = vcmask 130112   ;;  %vm6831_vm2 = vcmask 195712   ;;  %vm6838_vm3 = vcmask 261312   ;;  %s11329_s0 = inlined_call_operand.vmem [shape: f32[2,512,64], index: 0, kind: input, shape index: {}]   ;;  %s11330_s1 = inlined_call_operand.vmem [shape: f32[512,32], index: 1, kind: input, shape index: {}]   ;;  %s11331_s4 = inlined_call_operand.<no memory space> [shape: f32[1,1], index: 4, kind: input, shape index: {}]   ;;  %s11332_s2 = inlined_call_operand.vmem [shape: f32[1,32], index: 2, kind: input, shape index: {}]   ;;  %s11333_s3 = inlined_call_operand.vmem [shape: f32[1,32], index: 3, kind: input, shape index: {}]   ;;  %s11334_s5 = inlined_call_operand.vmem [shape: f32[2,1], index: 5, kind: output, shape index: {}]  }
   0x1   :  { %v29_v0 = vld [vmem:[%s11329_s0 + $0x10] sm:$0xff]  ;;  %v27_v1 = vld [vmem:[%s11329_s0] sm:$0xff]  ;;  %v30_v2 = vld [vmem:[%s11329_s0 + $0x18] sm:$0xff]  ;;  %vm6845_vm4 = vcmask 326912   ;;  %vm6852_vm5 = vcmask 392512   ;;  %vm6859_vm6 = vcmask 458112  }
   0x2   :  { %v163_v3 = vsel %vm156_vm0, %v29_v0, -inf  ;;  %v157_v4 = vsel %vm156_vm0, %v27_v1, -inf  ;;  %v28_v5 = vld [vmem:[%s11329_s0 + $0x8] sm:$0xff]  ;;  %v166_v6 = vsel %vm156_vm0, %v30_v2, -inf  ;;  %v31_v9 = vld [vmem:[%s11329_s0 + $0x20] sm:$0xff]  ;;  %v34_v12 = vld [vmem:[%s11329_s0 + $0x38] sm:$0xff] }
   0x3   :  { %164 = vmax.xlane.f32.xlu1 %v163_v3  ;;  %158 = vmax.xlane.f32.xlu0 %v157_v4  ;;  %v160_v7 = vsel %vm156_vm0, %v28_v5, -inf  ;;  %v32_v8 = vld [vmem:[%s11329_s0 + $0x28] sm:$0xff]  ;;  %v169_v11 = vsel %vm156_vm0, %v31_v9, -inf  ;;  %v33_v13 = vld [vmem:[%s11329_s0 + $0x30] sm:$0xff]  ;;  %v178_v14 = vsel %vm156_vm0, %v34_v12, -inf  ;;  %v35_v17 = vld [vmem:[%s11329_s0 + $0x40] sm:$0xff] }
   0x4   :  { %v172_v10 = vsel %vm156_vm0, %v32_v8, -inf  ;;  %v175_v15 = vsel %vm156_vm0, %v33_v13, -inf  ;;  %v36_v16 = vld [vmem:[%s11329_s0 + $0x48] sm:$0xff]  ;;  %v181_v19 = vsel %vm156_vm0, %v35_v17, -inf  ;;  %v38_v20 = vld [vmem:[%s11329_s0 + $0x58] sm:$0xff]  ;;  %v37_v21 = vld [vmem:[%s11329_s0 + $0x50] sm:$0xff] }
   0x5   :  { %v184_v18 = vsel %vm156_vm0, %v36_v16, -inf  ;;  %v190_v22 = vsel %vm156_vm0, %v38_v20, -inf  ;;  %v187_v23 = vsel %vm156_vm0, %v37_v21, -inf  ;;  %v40_v24 = vld [vmem:[%s11329_s0 + $0x68] sm:$0xff]  ;;  %v39_v25 = vld [vmem:[%s11329_s0 + $0x60] sm:$0xff]  ;;  %v42_v28 = vld [vmem:[%s11329_s0 + $0x78] sm:$0xff] }
   0x6   :  { %v196_v26 = vsel %vm156_vm0, %v40_v24, -inf  ;;  %v193_v27 = vsel %vm156_vm0, %v39_v25, -inf  ;;  %v41_v29 = vld [vmem:[%s11329_s0 + $0x70] sm:$0xff]  ;;  %v202_v30 = vsel %vm156_vm0, %v42_v28, -inf  ;;  %v44_v32 = vld [vmem:[%s11329_s0 + $0x88] sm:$0xff]  ;;  %v43_v33 = vld [vmem:[%s11329_s0 + $0x80] sm:$0xff] }
   0x7   :  { %167 = vmax.xlane.f32.xlu1 %v166_v6  ;;  %161 = vmax.xlane.f32.xlu0 %v160_v7  ;;  %v199_v31 = vsel %vm156_vm0, %v41_v29, -inf  ;;  %v208_v34 = vsel %vm156_vm0, %v44_v32, -inf  ;;  %v205_v35 = vsel %vm156_vm0, %v43_v33, -inf  ;;  %v46_v36 = vld [vmem:[%s11329_s0 + $0x98] sm:$0xff]  ;;  %v45_v37 = vld [vmem:[%s11329_s0 + $0x90] sm:$0xff]  ;;  %v48_v40 = vld [vmem:[%s11329_s0 + $0xa8] sm:$0xff] }
   0x8   :  { %v214_v38 = vsel %vm156_vm0, %v46_v36, -inf  ;;  %v211_v39 = vsel %vm156_vm0, %v45_v37, -inf  ;;  %v47_v41 = vld [vmem:[%s11329_s0 + $0xa0] sm:$0xff]  ;;  %v220_v42 = vsel %vm156_vm0, %v48_v40, -inf  ;;  %v50_v44 = vld [vmem:[%s11329_s0 + $0xb8] sm:$0xff]  ;;  %v49_v45 = vld [vmem:[%s11329_s0 + $0xb0] sm:$0xff] }
   0x9   :  { %v217_v43 = vsel %vm156_vm0, %v47_v41, -inf  ;;  %v226_v46 = vsel %vm156_vm0, %v50_v44, -inf  ;;  %v223_v47 = vsel %vm156_vm0, %v49_v45, -inf  ;;  %v52_v48 = vld [vmem:[%s11329_s0 + $0xc8] sm:$0xff]  ;;  %v51_v49 = vld [vmem:[%s11329_s0 + $0xc0] sm:$0xff]  ;;  %v54_v52 = vld [vmem:[%s11329_s0 + $0xd8] sm:$0xff] }
   0xa   :  { %v232_v50 = vsel %vm156_vm0, %v52_v48, -inf  ;;  %v229_v51 = vsel %vm156_vm0, %v51_v49, -inf  ;;  %v53_v53 = vld [vmem:[%s11329_s0 + $0xd0] sm:$0xff]  ;;  %v238_v54 = vsel %vm156_vm0, %v54_v52, -inf  ;;  %v56_v56 = vld [vmem:[%s11329_s0 + $0xe8] sm:$0xff]  ;;  %v55_v57 = vld [vmem:[%s11329_s0 + $0xe0] sm:$0xff] }
   0xb   :  { %173 = vmax.xlane.f32.xlu1 %v172_v10  ;;  %170 = vmax.xlane.f32.xlu0 %v169_v11  ;;  %v235_v55 = vsel %vm156_vm0, %v53_v53, -inf  ;;  %v244_v58 = vsel %vm156_vm0, %v56_v56, -inf  ;;  %v241_v59 = vsel %vm156_vm0, %v55_v57, -inf  ;;  %v58_v60 = vld [vmem:[%s11329_s0 + $0xf8] sm:$0xff]  ;;  %v57_v61 = vld [vmem:[%s11329_s0 + $0xf0] sm:$0xff]  ;;  %v60_v0 = vld [vmem:[%s11329_s0 + $0x108] sm:$0xff] }
   0xc   :  { %v250_v62 = vsel %vm156_vm0, %v58_v60, -inf  ;;  %v247_v63 = vsel %vm156_vm0, %v57_v61, -inf  ;;  %v59_v1 = vld [vmem:[%s11329_s0 + $0x100] sm:$0xff]  ;;  %v256_v2 = vsel %vm156_vm0, %v60_v0, -inf  ;;  %v62_v4 = vld [vmem:[%s11329_s0 + $0x118] sm:$0xff]  ;;  %v61_v5 = vld [vmem:[%s11329_s0 + $0x110] sm:$0xff] }
   0xd   :  { %v253_v3 = vsel %vm156_vm0, %v59_v1, -inf  ;;  %v262_v6 = vsel %vm156_vm0, %v62_v4, -inf  ;;  %v259_v7 = vsel %vm156_vm0, %v61_v5, -inf  ;;  %v64_v8 = vld [vmem:[%s11329_s0 + $0x128] sm:$0xff]  ;;  %v63_v9 = vld [vmem:[%s11329_s0 + $0x120] sm:$0xff]  ;;  %v66_v12 = vld [vmem:[%s11329_s0 + $0x138] sm:$0xff] }
   0xe   :  { %v268_v10 = vsel %vm156_vm0, %v64_v8, -inf  ;;  %v265_v11 = vsel %vm156_vm0, %v63_v9, -inf  ;;  %v65_v13 = vld [vmem:[%s11329_s0 + $0x130] sm:$0xff]  ;;  %v68_v16 = vld [vmem:[%s11329_s0 + $0x148] sm:$0xff]  ;;  %v67_v17 = vld [vmem:[%s11329_s0 + $0x140] sm:$0xff]  ;;  %vm6866_vm7 = vcmask 523712  }
   0xf   :  { %179 = vmax.xlane.f32.xlu1 %v178_v14  ;;  %176 = vmax.xlane.f32.xlu0 %v175_v15  ;;  %v274_v14 = vsel %vm156_vm0, %v66_v12, -inf  ;;  %v271_v15 = vsel %vm156_vm0, %v65_v13, -inf  ;;  %v70_v20 = vld [vmem:[%s11329_s0 + $0x158] sm:$0xff]  ;;  %v69_v21 = vld [vmem:[%s11329_s0 + $0x150] sm:$0xff]  ;;  %v72_v24 = vld [vmem:[%s11329_s0 + $0x168] sm:$0xff]  ;;  %vm6873_vm8 = vcmask 589312  }
  0x10   :  { %v71_v25 = vld [vmem:[%s11329_s0 + $0x160] sm:$0xff]  ;;  %v74_v28 = vld [vmem:[%s11329_s0 + $0x178] sm:$0xff]  ;;  %v73_v29 = vld [vmem:[%s11329_s0 + $0x170] sm:$0xff]  ;;  %vm6880_vm9 = vcmask 654912   ;;  %vm6887_vm10 = vcmask 720512   ;;  %vm6894_vm11 = vcmask 786112  }
  0x11   :  { %v76_v32 = vld [vmem:[%s11329_s0 + $0x188] sm:$0xff]  ;;  %v75_v33 = vld [vmem:[%s11329_s0 + $0x180] sm:$0xff]  ;;  %v78_v36 = vld [vmem:[%s11329_s0 + $0x198] sm:$0xff]  ;;  %vm6901_vm12 = vcmask 851712   ;;  %vm6908_vm13 = vcmask 917312   ;;  %vm6915_vm14 = vcmask 982912  }
  0x12   :  { %v77_v37 = vld [vmem:[%s11329_s0 + $0x190] sm:$0xff]  ;;  %v80_v40 = vld [vmem:[%s11329_s0 + $0x1a8] sm:$0xff]  ;;  %v79_v41 = vld [vmem:[%s11329_s0 + $0x1a0] sm:$0xff]  ;;  %vm6922_vm15 = vcmask 1048512  }
  0x13   :  { %185 = vmax.xlane.f32.xlu1 %v184_v18  ;;  %182 = vmax.xlane.f32.xlu0 %v181_v19  ;;  %v280_v18 = vsel %vm156_vm0, %v68_v16, -inf  ;;  %v277_v19 = vsel %vm156_vm0, %v67_v17, -inf  ;;  %v82_v44 = vld [vmem:[%s11329_s0 + $0x1b8] sm:$0xff]  ;;  %v81_v45 = vld [vmem:[%s11329_s0 + $0x1b0] sm:$0xff]  ;;  %v84_v48 = vld [vmem:[%s11329_s0 + $0x1c8] sm:$0xff] }
  0x14   :  { %v83_v49 = vld [vmem:[%s11329_s0 + $0x1c0] sm:$0xff]  ;;  %v86_v52 = vld [vmem:[%s11329_s0 + $0x1d8] sm:$0xff]  ;;  %v85_v53 = vld [vmem:[%s11329_s0 + $0x1d0] sm:$0xff] }
  0x15   :  { %v88_v56 = vld [vmem:[%s11329_s0 + $0x1e8] sm:$0xff]  ;;  %v87_v57 = vld [vmem:[%s11329_s0 + $0x1e0] sm:$0xff]  ;;  %v90_v60 = vld [vmem:[%s11329_s0 + $0x1f8] sm:$0xff] }
  0x16   :  { %v89_v61 = vld [vmem:[%s11329_s0 + $0x1f0] sm:$0xff]  ;;  %v92_v0 = vld [vmem:[%s11329_s0 + $0x208] sm:$0xff]  ;;  %v91_v1 = vld [vmem:[%s11329_s0 + $0x200] sm:$0xff] }
  0x17   :  { %191 = vmax.xlane.f32.xlu1 %v190_v22  ;;  %188 = vmax.xlane.f32.xlu0 %v187_v23  ;;  %v286_v22 = vsel %vm156_vm0, %v70_v20, -inf  ;;  %v283_v23 = vsel %vm156_vm0, %v69_v21, -inf  ;;  %v94_v4 = vld [vmem:[%s11329_s0 + $0x218] sm:$0xff]  ;;  %v93_v5 = vld [vmem:[%s11329_s0 + $0x210] sm:$0xff]  ;;  %v96_v8 = vld [vmem:[%s11329_s0 + $0x228] sm:$0xff] }
  0x18   :  { %v95_v9 = vld [vmem:[%s11329_s0 + $0x220] sm:$0xff]  ;;  %v98_v12 = vld [vmem:[%s11329_s0 + $0x238] sm:$0xff]  ;;  %v97_v13 = vld [vmem:[%s11329_s0 + $0x230] sm:$0xff] }
  0x19   :  { %v100_v16 = vld [vmem:[%s11329_s0 + $0x248] sm:$0xff]  ;;  %v99_v17 = vld [vmem:[%s11329_s0 + $0x240] sm:$0xff] }
  0x1a   :  { %v376_v20 = vsel %vm156_vm0, %v100_v16, -inf  ;;  %v373_v21 = vsel %vm156_vm0, %v99_v17, -inf }
  0x1b   :  { %197 = vmax.xlane.f32.xlu1 %v196_v26  ;;  %194 = vmax.xlane.f32.xlu0 %v193_v27  ;;  %v292_v26 = vsel %vm156_vm0, %v72_v24, -inf  ;;  %v289_v27 = vsel %vm156_vm0, %v71_v25, -inf  ;;  %v101_v24 = vld [vmem:[%s11329_s0 + $0x250] sm:$0xff] }
  0x1f   :  { %203 = vmax.xlane.f32.xlu1 %v202_v30  ;;  %200 = vmax.xlane.f32.xlu0 %v199_v31  ;;  %v298_v30 = vsel %vm156_vm0, %v74_v28, -inf  ;;  %v295_v31 = vsel %vm156_vm0, %v73_v29, -inf  ;;  %v379_v28 = vsel %vm156_vm0, %v101_v24, -inf  ;;  %v104_v29 = vld [vmem:[%s11329_s0 + $0x268] sm:$0xff] }
  0x23   :  { %209 = vmax.xlane.f32.xlu1 %v208_v34  ;;  %206 = vmax.xlane.f32.xlu0 %v205_v35  ;;  %v304_v34 = vsel %vm156_vm0, %v76_v32, -inf  ;;  %v301_v35 = vsel %vm156_vm0, %v75_v33, -inf  ;;  %v388_v33 = vsel %vm156_vm0, %v104_v29, -inf  ;;  %v124_v29 = vld [vmem:[%s11329_s0 + $0x308] sm:$0xff] }
  0x27   :  { %215 = vmax.xlane.f32.xlu1 %v214_v38  ;;  %212 = vmax.xlane.f32.xlu0 %v211_v39  ;;  %v310_v38 = vsel %vm156_vm0, %v78_v36, -inf  ;;  %v307_v39 = vsel %vm156_vm0, %v77_v37, -inf  ;;  %v105_v36 = vld [vmem:[%s11329_s0 + $0x270] sm:$0xff] }
  0x2b   :  { %221 = vmax.xlane.f32.xlu1 %v220_v42  ;;  %218 = vmax.xlane.f32.xlu0 %v217_v43  ;;  %v316_v42 = vsel %vm156_vm0, %v80_v40, -inf  ;;  %v313_v43 = vsel %vm156_vm0, %v79_v41, -inf  ;;  %v391_v40 = vsel %vm156_vm0, %v105_v36, -inf  ;;  %v108_v41 = vld [vmem:[%s11329_s0 + $0x288] sm:$0xff] }
  0x2f   :  { %227 = vmax.xlane.f32.xlu1 %v226_v46  ;;  %224 = vmax.xlane.f32.xlu0 %v223_v47  ;;  %v322_v46 = vsel %vm156_vm0, %v82_v44, -inf  ;;  %v319_v47 = vsel %vm156_vm0, %v81_v45, -inf  ;;  %v400_v45 = vsel %vm156_vm0, %v108_v41, -inf }
  0x33   :  { %233 = vmax.xlane.f32.xlu1 %v232_v50  ;;  %230 = vmax.xlane.f32.xlu0 %v229_v51  ;;  %v328_v50 = vsel %vm156_vm0, %v84_v48, -inf  ;;  %v325_v51 = vsel %vm156_vm0, %v83_v49, -inf  ;;  %v109_v48 = vld [vmem:[%s11329_s0 + $0x290] sm:$0xff] }
  0x37   :  { %239 = vmax.xlane.f32.xlu1 %v238_v54  ;;  %236 = vmax.xlane.f32.xlu0 %v235_v55  ;;  %v334_v54 = vsel %vm156_vm0, %v86_v52, -inf  ;;  %v331_v55 = vsel %vm156_vm0, %v85_v53, -inf  ;;  %v403_v52 = vsel %vm156_vm0, %v109_v48, -inf  ;;  %v112_v53 = vld [vmem:[%s11329_s0 + $0x2a8] sm:$0xff]  ;;  %v127_v48 = vld [vmem:[%s11329_s0 + $0x320] sm:$0xff] }
  0x3b   :  { %245 = vmax.xlane.f32.xlu1 %v244_v58  ;;  %242 = vmax.xlane.f32.xlu0 %v241_v59  ;;  %v340_v58 = vsel %vm156_vm0, %v88_v56, -inf  ;;  %v337_v59 = vsel %vm156_vm0, %v87_v57, -inf  ;;  %v412_v57 = vsel %vm156_vm0, %v112_v53, -inf }
  0x3f   :  { %251 = vmax.xlane.f32.xlu1 %v250_v62  ;;  %248 = vmax.xlane.f32.xlu0 %v247_v63  ;;  %v346_v62 = vsel %vm156_vm0, %v90_v60, -inf  ;;  %v343_v63 = vsel %vm156_vm0, %v89_v61, -inf  ;;  %v113_v60 = vld [vmem:[%s11329_s0 + $0x2b0] sm:$0xff] }
  0x43   :  { %257 = vmax.xlane.f32.xlu1 %v256_v2  ;;  %254 = vmax.xlane.f32.xlu0 %v253_v3  ;;  %v352_v2 = vsel %vm156_vm0, %v92_v0, -inf  ;;  %v349_v3 = vsel %vm156_vm0, %v91_v1, -inf  ;;  %v415_v0 = vsel %vm156_vm0, %v113_v60, -inf  ;;  %v116_v1 = vld [vmem:[%s11329_s0 + $0x2c8] sm:$0xff] }
  0x47   :  { %263 = vmax.xlane.f32.xlu1 %v262_v6  ;;  %260 = vmax.xlane.f32.xlu0 %v259_v7  ;;  %v358_v6 = vsel %vm156_vm0, %v94_v4, -inf  ;;  %v355_v7 = vsel %vm156_vm0, %v93_v5, -inf  ;;  %v424_v5 = vsel %vm156_vm0, %v116_v1, -inf  ;;  %v132_v1 = vld [vmem:[%s11329_s0 + $0x348] sm:$0xff] }
  0x4b   :  { %269 = vmax.xlane.f32.xlu1 %v268_v10  ;;  %266 = vmax.xlane.f32.xlu0 %v265_v11  ;;  %v364_v10 = vsel %vm156_vm0, %v96_v8, -inf  ;;  %v361_v11 = vsel %vm156_vm0, %v95_v9, -inf  ;;  %v117_v8 = vld [vmem:[%s11329_s0 + $0x2d0] sm:$0xff] }
  0x4f   :  { %275 = vmax.xlane.f32.xlu1 %v274_v14  ;;  %272 = vmax.xlane.f32.xlu0 %v271_v15  ;;  %v370_v14 = vsel %vm156_vm0, %v98_v12, -inf  ;;  %v367_v15 = vsel %vm156_vm0, %v97_v13, -inf  ;;  %v427_v12 = vsel %vm156_vm0, %v117_v8, -inf  ;;  %v120_v13 = vld [vmem:[%s11329_s0 + $0x2e8] sm:$0xff] }
  0x50   :  { %v436_v17 = vsel %vm156_vm0, %v120_v13, -inf }
  0x53   :  { %281 = vmax.xlane.f32.xlu1 %v280_v18  ;;  %278 = vmax.xlane.f32.xlu0 %v277_v19 }
  0x57   :  { %287 = vmax.xlane.f32.xlu1 %v286_v22  ;;  %284 = vmax.xlane.f32.xlu0 %v283_v23  ;;  %v7923_v22 = vmov 0   ;;  %v102_v23 = vld [vmem:[%s11329_s0 + $0x258] sm:$0xff] }
  0x58   :  { %7918 = vset.pattern.permute.xlu1 %v7923_v22  ;;  %7917 = vset.pattern.permute.xlu0 %v7923_v22  ;;  %v121_v22 = vld [vmem:[%s11329_s0 + $0x2f0] sm:$0xff] }
  0x5b   :  { %293 = vmax.xlane.f32.xlu1 %v292_v26  ;;  %290 = vmax.xlane.f32.xlu0 %v289_v27  ;;  %v382_v27 = vsel %vm156_vm0, %v102_v23, -inf }
  0x5f   :  { %299 = vmax.xlane.f32.xlu1 %v298_v30  ;;  %296 = vmax.xlane.f32.xlu0 %v295_v31  ;;  %v103_v30 = vld [vmem:[%s11329_s0 + $0x260] sm:$0xff] }
  0x63   :  { %305 = vmax.xlane.f32.xlu1 %v304_v34  ;;  %302 = vmax.xlane.f32.xlu0 %v301_v35  ;;  %v385_v34 = vsel %vm156_vm0, %v103_v30, -inf  ;;  %v106_v35 = vld [vmem:[%s11329_s0 + $0x278] sm:$0xff]  ;;  %v123_v30 = vld [vmem:[%s11329_s0 + $0x300] sm:$0xff] }
  0x64   :  { %v445_v36 = vsel %vm156_vm0, %v123_v30, -inf  ;;  %v7925_v30 = vmov 842150450  }
  0x67   :  { %311 = vmax.xlane.f32.xlu1 %v310_v38  ;;  %308 = vmax.xlane.f32.xlu0 %v307_v39  ;;  %v394_v39 = vsel %vm156_vm0, %v106_v35, -inf  ;;  %v448_v35 = vsel %vm156_vm0, %v124_v29, -inf  ;;  %v11335_v29 = vlaneseq }
  0x6b   :  { %317 = vmax.xlane.f32.xlu1 %v316_v42  ;;  %314 = vmax.xlane.f32.xlu0 %v313_v43  ;;  %v107_v42 = vld [vmem:[%s11329_s0 + $0x280] sm:$0xff] }
  0x6f   :  { %323 = vmax.xlane.f32.xlu1 %v322_v46  ;;  %320 = vmax.xlane.f32.xlu0 %v319_v47  ;;  %v397_v46 = vsel %vm156_vm0, %v107_v42, -inf  ;;  %v110_v47 = vld [vmem:[%s11329_s0 + $0x298] sm:$0xff] }
  0x73   :  { %329 = vmax.xlane.f32.xlu1 %v328_v50  ;;  %326 = vmax.xlane.f32.xlu0 %v325_v51  ;;  %v406_v51 = vsel %vm156_vm0, %v110_v47, -inf  ;;  %v128_v47 = vld [vmem:[%s11329_s0 + $0x328] sm:$0xff] }
  0x74   :  { %v460_v53 = vsel %vm156_vm0, %v128_v47, -inf }
  0x77   :  { %335 = vmax.xlane.f32.xlu1 %v334_v54  ;;  %332 = vmax.xlane.f32.xlu0 %v331_v55  ;;  %v111_v54 = vld [vmem:[%s11329_s0 + $0x2a0] sm:$0xff] }
  0x7b   :  { %341 = vmax.xlane.f32.xlu1 %v340_v58  ;;  %338 = vmax.xlane.f32.xlu0 %v337_v59  ;;  %v409_v58 = vsel %vm156_vm0, %v111_v54, -inf  ;;  %v114_v59 = vld [vmem:[%s11329_s0 + $0x2b8] sm:$0xff]  ;;  %v457_v54 = vsel %vm156_vm0, %v127_v48, -inf }
  0x7f   :  { %347 = vmax.xlane.f32.xlu1 %v346_v62  ;;  %344 = vmax.xlane.f32.xlu0 %v343_v63  ;;  %v418_v63 = vsel %vm156_vm0, %v114_v59, -inf }
  0x83   :  { %353 = vmax.xlane.f32.xlu1 %v352_v2  ;;  %350 = vmax.xlane.f32.xlu0 %v349_v3  ;;  %v115_v2 = vld [vmem:[%s11329_s0 + $0x2c0] sm:$0xff] }
  0x87   :  { %359 = vmax.xlane.f32.xlu1 %v358_v6  ;;  %356 = vmax.xlane.f32.xlu0 %v355_v7  ;;  %v421_v6 = vsel %vm156_vm0, %v115_v2, -inf  ;;  %v118_v7 = vld [vmem:[%s11329_s0 + $0x2d8] sm:$0xff]  ;;  %v131_v2 = vld [vmem:[%s11329_s0 + $0x340] sm:$0xff] }
  0x88   :  { %v469_v8 = vsel %vm156_vm0, %v131_v2, -inf }
  0x8b   :  { %365 = vmax.xlane.f32.xlu1 %v364_v10  ;;  %362 = vmax.xlane.f32.xlu0 %v361_v11  ;;  %v430_v11 = vsel %vm156_vm0, %v118_v7, -inf  ;;  %v472_v7 = vsel %vm156_vm0, %v132_v1, -inf }
  0x8f   :  { %371 = vmax.xlane.f32.xlu1 %v370_v14  ;;  %368 = vmax.xlane.f32.xlu0 %v367_v15  ;;  %v119_v14 = vld [vmem:[%s11329_s0 + $0x2e0] sm:$0xff] }
  0x90   :  { %v8253_v18 = vpop.xlane.xlu1 %164  ;;  %v8255_v19 = vpop.xlane.xlu0 %158 }
  0x93   :  { %377 = vmax.xlane.f32.xlu1 %v376_v20  ;;  %374 = vmax.xlane.f32.xlu0 %v373_v21  ;;  %v433_v20 = vsel %vm156_vm0, %v119_v14, -inf  ;;  %v122_v21 = vld [vmem:[%s11329_s0 + $0x2f8] sm:$0xff] }
  0x94   :  { %v8265_v25 = vpop.xlane.xlu1 %167  ;;  %v8267_v26 = vpop.xlane.xlu0 %161 }
  0x97   :  { %383 = vmax.xlane.f32.xlu1 %v382_v27  ;;  %380 = vmax.xlane.f32.xlu0 %v379_v28  ;;  %v442_v27 = vsel %vm156_vm0, %v122_v21, -inf  ;;  %v439_v28 = vsel %vm156_vm0, %v121_v22, -inf  ;;  %v136_v21 = vld [vmem:[%s11329_s0 + $0x368] sm:$0xff]  ;;  %v135_v22 = vld [vmem:[%s11329_s0 + $0x360] sm:$0xff] }
  0x98   :  { %v8277_v31 = vpop.xlane.xlu1 %173  ;;  %v8279_v32 = vpop.xlane.xlu0 %170  ;;  %v484_v48 = vsel %vm156_vm0, %v136_v21, -inf  ;;  %v7928_v21 = vmov 1983009808  }
  0x9b   :  { %389 = vmax.xlane.f32.xlu1 %v388_v33  ;;  %386 = vmax.xlane.f32.xlu0 %v385_v34 }
  0x9c   :  { %v8289_v37 = vpop.xlane.xlu1 %179  ;;  %v8291_v38 = vpop.xlane.xlu0 %176 }
  0x9f   :  { %395 = vmax.xlane.f32.xlu1 %v394_v39  ;;  %392 = vmax.xlane.f32.xlu0 %v391_v40  ;;  %v126_v39 = vld [vmem:[%s11329_s0 + $0x318] sm:$0xff]  ;;  %v125_v40 = vld [vmem:[%s11329_s0 + $0x310] sm:$0xff] }
  0xa0   :  { %v8301_v43 = vpop.xlane.xlu1 %185  ;;  %v8303_v44 = vpop.xlane.xlu0 %182 }
  0xa3   :  { %401 = vmax.xlane.f32.xlu1 %v400_v45  ;;  %398 = vmax.xlane.f32.xlu0 %v397_v46  ;;  %v454_v45 = vsel %vm156_vm0, %v126_v39, -inf  ;;  %v451_v46 = vsel %vm156_vm0, %v125_v40, -inf  ;;  %v7927_v40 = vmov 1987475062  }
  0xa4   :  { %v8313_v49 = vpop.xlane.xlu1 %191  ;;  %v8315_v50 = vpop.xlane.xlu0 %188 }
  0xa7   :  { %407 = vmax.xlane.f32.xlu1 %v406_v51  ;;  %404 = vmax.xlane.f32.xlu0 %v403_v52 }
  0xa8   :  { %v8325_v55 = vpop.xlane.xlu1 %197  ;;  %v8327_v56 = vpop.xlane.xlu0 %194 }
  0xab   :  { %413 = vmax.xlane.f32.xlu1 %v412_v57  ;;  %410 = vmax.xlane.f32.xlu0 %v409_v58  ;;  %v130_v57 = vld [vmem:[%s11329_s0 + $0x338] sm:$0xff]  ;;  %v129_v58 = vld [vmem:[%s11329_s0 + $0x330] sm:$0xff] }
  0xac   :  { %v8337_v61 = vpop.xlane.xlu1 %203  ;;  %v8339_v62 = vpop.xlane.xlu0 %200 }
  0xaf   :  { %419 = vmax.xlane.f32.xlu1 %v418_v63  ;;  %416 = vmax.xlane.f32.xlu0 %v415_v0  ;;  %v466_v63 = vsel %vm156_vm0, %v130_v57, -inf  ;;  %v463_v0 = vsel %vm156_vm0, %v129_v58, -inf  ;;  %v137_v57 = vld [vmem:[%s11329_s0 + $0x370] sm:$0xff] }
  0xb0   :  { %v8349_v3 = vpop.xlane.xlu1 %209  ;;  %v8351_v4 = vpop.xlane.xlu0 %206 }
  0xb3   :  { %425 = vmax.xlane.f32.xlu1 %v424_v5  ;;  %422 = vmax.xlane.f32.xlu0 %v421_v6 }
  0xb4   :  { %v8361_v9 = vpop.xlane.xlu1 %215  ;;  %v8363_v10 = vpop.xlane.xlu0 %212 }
  0xb7   :  { %431 = vmax.xlane.f32.xlu1 %v430_v11  ;;  %428 = vmax.xlane.f32.xlu0 %v427_v12  ;;  %v134_v11 = vld [vmem:[%s11329_s0 + $0x358] sm:$0xff]  ;;  %v133_v12 = vld [vmem:[%s11329_s0 + $0x350] sm:$0xff] }
  0xb8   :  { %v8373_v15 = vpop.xlane.xlu1 %221  ;;  %v8375_v16 = vpop.xlane.xlu0 %218 }
  0xbb   :  { %437 = vmax.xlane.f32.xlu1 %v436_v17  ;;  %434 = vmax.xlane.f32.xlu0 %v433_v20  ;;  %v478_v17 = vsel %vm156_vm0, %v134_v11, -inf  ;;  %v475_v20 = vsel %vm156_vm0, %v133_v12, -inf  ;;  %v487_v12 = vsel %vm156_vm0, %v137_v57, -inf }
  0xbc   :  { %v8385_v23 = vpop.xlane.xlu1 %227  ;;  %v8387_v24 = vpop.xlane.xlu0 %224 }
  0xbf   :  { %443 = vmax.xlane.f32.xlu1 %v442_v27  ;;  %440 = vmax.xlane.f32.xlu0 %v439_v28  ;;  %v7924_v27 = vmov 269488144  }
  0xc0   :  { %v8397_v33 = vpop.xlane.xlu1 %233  ;;  %v8399_v34 = vpop.xlane.xlu0 %230  ;;  %v670_v28 = vunpack.c.l.s4 %v7924_v27 }
  0xc1   :  { %11414 = vst [vmem:[#allocation4_spill] sm:$0xff] %v8399_v34 }
  0xc2   :  { %v671_v58 = vunpack.c.0.s8 %v670_v28 }
  0xc3   :  { %449 = vmax.xlane.f32.xlu1 %v448_v35  ;;  %446 = vmax.xlane.f32.xlu0 %v445_v36  ;;  %v677_v35 = vunpack.c.l.s4 %v7925_v30  ;;  %v7926_v36 = vmov 1414812756  }
  0xc4   :  { %v8409_v41 = vpop.xlane.xlu1 %239  ;;  %v8411_v42 = vpop.xlane.xlu0 %236  ;;  %v684_v39 = vunpack.c.l.s4 %v7926_v36 }
  0xc5   :  { %11415 = vst [vmem:[#allocation5_spill] sm:$0xff] %v8409_v41  ;;  %11416 = vst [vmem:[#allocation6_spill] sm:$0xff] %v8411_v42 }
  0xc6   :  { %v685_v1 = vunpack.c.0.s8 %v684_v39 }
  0xc7   :  { %455 = vmax.xlane.f32.xlu1 %v454_v45  ;;  %452 = vmax.xlane.f32.xlu0 %v451_v46  ;;  %v691_v45 = vunpack.c.l.s4 %v7927_v40 }
  0xc8   :  { %v8421_v51 = vpop.xlane.xlu1 %245  ;;  %v8423_v52 = vpop.xlane.xlu0 %242 }
  0xc9   :  { %11417 = vst [vmem:[#allocation7_spill] sm:$0xff] %v8421_v51  ;;  %11418 = vst [vmem:[#allocation8_spill] sm:$0xff] %v8423_v52  ;;  %v692_v2 = vunpack.c.0.s8 %v691_v45 }
  0xcb   :  { %461 = vmax.xlane.f32.xlu1 %v460_v53  ;;  %458 = vmax.xlane.f32.xlu0 %v457_v54  ;;  %v481_v53 = vsel %vm156_vm0, %v135_v22, -inf  ;;  %v138_v54 = vld [vmem:[%s11329_s0 + $0x378] sm:$0xff]  ;;  %v4256_v22 = vunpack.c.l.s4 %v7928_v21  ;;  %v143_v21 = vld [vmem:[%s11329_s0 + $0x3a0] sm:$0xff] }
  0xcc   :  { %v8433_v59 = vpop.xlane.xlu1 %251  ;;  %v8435_v60 = vpop.xlane.xlu0 %248  ;;  %v490_v11 = vsel %vm156_vm0, %v138_v54, -inf }
  0xcd   :  { %11419 = vst [vmem:[#allocation9_spill] sm:$0xff] %v8433_v59  ;;  %11420 = vst [vmem:[#allocation10_spill] sm:$0xff] %v8435_v60  ;;  %v4257_v54 = vunpack.c.0.s8 %v4256_v22 }
  0xcf   :  { %467 = vmax.xlane.f32.xlu1 %v466_v63  ;;  %464 = vmax.xlane.f32.xlu0 %v463_v0  ;;  %v8482_v63 = vshrl.u32 %v11335_v29, 7  ;;  %v678_v0 = vunpack.c.0.s8 %v677_v35 }
  0xd0   :  { %v8445_v5 = vpop.xlane.xlu1 %257  ;;  %v8447_v6 = vpop.xlane.xlu0 %254 }
  0xd1   :  { %11421 = vst [vmem:[#allocation11_spill] sm:$0xff] %v8445_v5  ;;  %11422 = vst [vmem:[#allocation12_spill] sm:$0xff] %v8447_v6  ;;  %v8497_v27 = vsub.s32 %v671_v58, %v8482_v63  ;;  %v8500_v28 = vsub.s32 %v678_v0, %v8482_v63  ;;  %v8503_v30 = vsub.s32 %v685_v1, %v8482_v63 }
  0xd2   :  { %11427 = vst [vmem:[#allocation17_spill] sm:$0xff] %v8482_v63  ;;  %v8506_v35 = vsub.s32 %v692_v2, %v8482_v63  ;;  %v8541_v22 = vsub.s32 %v4257_v54, %v8482_v63 }
  0xd3   :  { %473 = vmax.xlane.f32.xlu1 %v472_v7  ;;  %470 = vmax.xlane.f32.xlu0 %v469_v8  ;;  %v731_v0 = vrot.slane %v8253_v18, %v8497_v27  ;;  %v738_v1 = vrot.slane %v8253_v18, %v8500_v28  ;;  %v745_v2 = vrot.slane %v8253_v18, %v8503_v30 }
  0xd4   :  { %v8457_v13 = vpop.xlane.xlu1 %263  ;;  %v8459_v14 = vpop.xlane.xlu0 %260  ;;  %v689_v54 = vrot.slane %v8255_v19, %v8503_v30  ;;  %v696_v63 = vrot.slane %v8255_v19, %v8506_v35  ;;  %v948_v60 = vrot.slane %v8301_v43, %v8506_v35 }
  0xd5   :  { %11423 = vst [vmem:[#allocation13_spill] sm:$0xff] %v8457_v13  ;;  %11424 = vst [vmem:[#allocation14_spill] sm:$0xff] %v8459_v14 }
  0xd7   :  { %479 = vmax.xlane.f32.xlu1 %v478_v17  ;;  %476 = vmax.xlane.f32.xlu0 %v475_v20  ;;  %v140_v17 = vld [vmem:[%s11329_s0 + $0x388] sm:$0xff]  ;;  %v139_v20 = vld [vmem:[%s11329_s0 + $0x380] sm:$0xff] }
  0xd8   :  { %v8469_v46 = vpop.xlane.xlu1 %269  ;;  %v8471_v47 = vpop.xlane.xlu0 %266  ;;  %v496_v40 = vsel %vm156_vm0, %v140_v17, -inf  ;;  %v493_v45 = vsel %vm156_vm0, %v139_v20, -inf  ;;  %v144_v20 = vld [vmem:[%s11329_s0 + $0x3a8] sm:$0xff] }
  0xd9   :  { %11425 = vst [vmem:[#allocation15_spill] sm:$0xff] %v8469_v46  ;;  %11426 = vst [vmem:[#allocation16_spill] sm:$0xff] %v8471_v47 }
  0xdb   :  { %485 = vmax.xlane.f32.xlu1 %v484_v48  ;;  %482 = vmax.xlane.f32.xlu0 %v481_v53  ;;  %v142_v48 = vld [vmem:[%s11329_s0 + $0x398] sm:$0xff]  ;;  %v141_v53 = vld [vmem:[%s11329_s0 + $0x390] sm:$0xff] }
  0xdc   :  { %v8484_v7 = vpop.xlane.xlu1 %275  ;;  %v8486_v8 = vpop.xlane.xlu0 %272  ;;  %v502_v57 = vsel %vm156_vm0, %v142_v48, -inf  ;;  %v499_v58 = vsel %vm156_vm0, %v141_v53, -inf  ;;  %v505_v48 = vsel %vm156_vm0, %v143_v21, -inf  ;;  %v8549_v53 = vcombine.low %v731_v0, %v738_v1  ;;  %v148_v0 = vld [vmem:[%s11329_s0 + $0x3c8] sm:$0xff]  ;;  %v150_v21 = vld [vmem:[%s11329_s0 + $0x3d8] sm:$0xff] }
  0xdd   :  { %11428 = vst [vmem:[#allocation18_spill] sm:$0xff] %v8484_v7  ;;  %11429 = vst [vmem:[#allocation19_spill] sm:$0xff] %v8486_v8  ;;  %v703_v1 = vrot.slane %v8267_v26, %v8497_v27  ;;  %v520_v14 = vsel %vm156_vm0, %v148_v0, -inf  ;;  %v526_v6 = vsel %vm156_vm0, %v150_v21, -inf  ;;  %v892_v21 = vrot.slane %v8289_v37, %v8506_v35 }
  0xde   :  { %v4295_v0 = vrot.slane %v8549_v53, %v8541_v22 }
  0xdf   :  { %491 = vmax.xlane.f32.xlu1 %v490_v11  ;;  %488 = vmax.xlane.f32.xlu0 %v487_v12  ;;  %v752_v11 = vrot.slane %v8253_v18, %v8506_v35  ;;  %v682_v18 = vrot.slane %v8255_v19, %v8500_v28 }
  0xe0   :  { %v8508_v36 = vpop.xlane.xlu1 %281  ;;  %v8510_v39 = vpop.xlane.xlu0 %278 }
  0xe1   :  { %11430 = vst [vmem:[#allocation20_spill] sm:$0xff] %v8508_v36  ;;  %11431 = vst [vmem:[#allocation21_spill] sm:$0xff] %v8510_v39  ;;  %v8551_v29 = vcombine.low %v745_v2, %v752_v11  ;;  %v717_v2 = vrot.slane %v8267_v26, %v8503_v30  ;;  %v724_v11 = vrot.slane %v8267_v26, %v8506_v35 }
  0xe2   :  { %v766_v39 = vrot.slane %v8265_v25, %v8500_v28  ;;  %v780_v36 = vrot.slane %v8265_v25, %v8506_v35 }
  0xe3   :  { %497 = vmax.xlane.f32.xlu1 %v496_v40  ;;  %494 = vmax.xlane.f32.xlu0 %v493_v45  ;;  %v675_v40 = vrot.slane %v8255_v19, %v8497_v27  ;;  %v508_v45 = vsel %vm156_vm0, %v144_v20, -inf  ;;  %v710_v19 = vrot.slane %v8267_v26, %v8500_v28  ;;  %v147_v20 = vld [vmem:[%s11329_s0 + $0x3c0] sm:$0xff]  ;;  %v773_v26 = vrot.slane %v8265_v25, %v8503_v30 }
  0xe4   :  { %v8530_v12 = vpop.xlane.xlu1 %287  ;;  %v8532_v17 = vpop.xlane.xlu0 %284  ;;  %v517_v13 = vsel %vm156_vm0, %v147_v20, -inf  ;;  %v815_v20 = vrot.slane %v8277_v31, %v8497_v27 }
  0xe5   :  { %11432 = vst [vmem:[#allocation22_spill] sm:$0xff] %v8530_v12  ;;  %11433 = vst [vmem:[#allocation23_spill] sm:$0xff] %v8532_v17 }
  0xe7   :  { %503 = vmax.xlane.f32.xlu1 %v502_v57  ;;  %500 = vmax.xlane.f32.xlu0 %v499_v58  ;;  %v146_v57 = vld [vmem:[%s11329_s0 + $0x3b8] sm:$0xff]  ;;  %v145_v58 = vld [vmem:[%s11329_s0 + $0x3b0] sm:$0xff] }
  0xe8   :  { %v8557_v17 = vpop.xlane.xlu1 %293  ;;  %v8559_v12 = vpop.xlane.xlu0 %290  ;;  %v514_v8 = vsel %vm156_vm0, %v146_v57, -inf  ;;  %v511_v7 = vsel %vm156_vm0, %v145_v58, -inf  ;;  %v4270_v57 = vcombine.low %v703_v1, %v710_v19  ;;  %v4271_v58 = vcombine.low %v717_v2, %v724_v11 }
  0xe9   :  { %11434 = vst [vmem:[#allocation24_spill] sm:$0xff] %v8557_v17  ;;  %11435 = vst [vmem:[#allocation25_spill] sm:$0xff] %v8559_v12  ;;  %v149_v12 = vld [vmem:[%s11329_s0 + $0x3d0] sm:$0xff]  ;;  %v759_v17 = vrot.slane %v8265_v25, %v8497_v27  ;;  %v152_v25 = vld [vmem:[%s11329_s0 + $0x3e8] sm:$0xff]  ;;  %v878_v2 = vrot.slane %v8289_v37, %v8500_v28  ;;  %v885_v11 = vrot.slane %v8289_v37, %v8503_v30 }
  0xea   :  { %v523_v5 = vsel %vm156_vm0, %v149_v12, -inf  ;;  %v4302_v12 = vrot.slane %v8551_v29, %v8541_v22  ;;  %v794_v29 = vrot.slane %v8279_v32, %v8500_v28  ;;  %v4278_v1 = vrot.slane %v4270_v57, %v8541_v22 }
  0xeb   :  { %509 = vmax.xlane.f32.xlu1 %v508_v45  ;;  %506 = vmax.xlane.f32.xlu0 %v505_v48  ;;  %v8608_v45 = vcombine.low %v675_v40, %v682_v18  ;;  %v8610_v48 = vcombine.low %v689_v54, %v696_v63  ;;  %v822_v40 = vrot.slane %v8277_v31, %v8500_v28 }
  0xec   :  { %v8597_v47 = vpop.xlane.xlu1 %299  ;;  %v8599_v46 = vpop.xlane.xlu0 %296  ;;  %v829_v63 = vrot.slane %v8277_v31, %v8503_v30  ;;  %v801_v18 = vrot.slane %v8279_v32, %v8503_v30  ;;  %v4285_v19 = vrot.slane %v4271_v58, %v8541_v22  ;;  %v864_v57 = vrot.slane %v8291_v38, %v8506_v35 }
  0xed   :  { %11436 = vst [vmem:[#allocation26_spill] sm:$0xff] %v8597_v47  ;;  %11437 = vst [vmem:[#allocation27_spill] sm:$0xff] %v8599_v46  ;;  %v8612_v47 = vcombine.low %v759_v17, %v766_v39  ;;  %v8614_v46 = vcombine.low %v773_v26, %v780_v36  ;;  %v532_v36 = vsel %vm156_vm0, %v152_v25, -inf  ;;  %v836_v39 = vrot.slane %v8277_v31, %v8506_v35 }
  0xee   :  { %v787_v17 = vrot.slane %v8279_v32, %v8497_v27  ;;  %v808_v31 = vrot.slane %v8279_v32, %v8506_v35  ;;  %v843_v26 = vrot.slane %v8291_v38, %v8497_v27  ;;  %v850_v32 = vrot.slane %v8291_v38, %v8500_v28 }
  0xef   :  { %515 = vmax.xlane.f32.xlu1 %v514_v8  ;;  %512 = vmax.xlane.f32.xlu0 %v511_v7  ;;  %v151_v7 = vld [vmem:[%s11329_s0 + $0x3e0] sm:$0xff]  ;;  %v871_v8 = vrot.slane %v8289_v37, %v8497_v27  ;;  %v857_v25 = vrot.slane %v8291_v38, %v8503_v30  ;;  %v934_v37 = vrot.slane %v8301_v43, %v8500_v28  ;;  %v154_v38 = vld [vmem:[%s11329_s0 + $0x3f8] sm:$0xff] }
  0xf0   :  { %v8635_v53 = vpop.xlane.xlu1 %305  ;;  %v8637_v54 = vpop.xlane.xlu0 %302  ;;  %v529_v58 = vsel %vm156_vm0, %v151_v7, -inf  ;;  %v8682_v7 = vcombine.low %v787_v17, %v794_v29  ;;  %v4261_v51 = vrot.slane %v8608_v45, %v8541_v22  ;;  %v8686_v42 = vcombine.low %v801_v18, %v808_v31 }
  0xf1   :  { %11438 = vst [vmem:[#allocation28_spill] sm:$0xff] %v8635_v53  ;;  %11439 = vst [vmem:[#allocation29_spill] sm:$0xff] %v8637_v54  ;;  %v927_v54 = vrot.slane %v8301_v43, %v8497_v27  ;;  %v941_v53 = vrot.slane %v8301_v43, %v8503_v30  ;;  %v8688_v43 = vcombine.low %v871_v8, %v878_v2 }
  0xf2   :  { %v8694_v41 = vcombine.low %v843_v26, %v850_v32  ;;  %v8696_v34 = vcombine.low %v857_v25, %v864_v57  ;;  %v913_v29 = vrot.slane %v8303_v44, %v8503_v30  ;;  %v920_v18 = vrot.slane %v8303_v44, %v8506_v35 }
  0xf3   :  { %521 = vmax.xlane.f32.xlu1 %v520_v14  ;;  %518 = vmax.xlane.f32.xlu0 %v517_v13  ;;  %v8678_v13 = vcombine.low %v815_v20, %v822_v40  ;;  %v8680_v14 = vcombine.low %v829_v63, %v836_v39  ;;  %v538_v20 = vsel %vm156_vm0, %v154_v38, -inf  ;;  %v8699_v40 = vcombine.low %v4278_v1, %v4285_v19 }
  0xf4   :  { %v8671_v59 = vpop.xlane.xlu1 %311  ;;  %v8673_v52 = vpop.xlane.xlu0 %308  ;;  %v4406_v63 = vcombine.low %v927_v54, %v934_v37  ;;  %v4407_v45 = vcombine.low %v941_v53, %v948_v60  ;;  %v906_v60 = vrot.slane %v8303_v44, %v8500_v28  ;;  %v983_v53 = vrot.slane %v8313_v49, %v8497_v27 }
  0xf5   :  { %11440 = vst [vmem:[#allocation30_spill] sm:$0xff] %v8671_v59  ;;  %11441 = vst [vmem:[#allocation31_spill] sm:$0xff] %v8673_v52  ;;  %v8690_v59 = vcombine.low %v885_v11, %v892_v21  ;;  %v8692_v52 = vcombine.low %v4295_v0, %v4302_v12  ;;  %v153_v0 = vld [vmem:[%s11329_s0 + $0x3f0] sm:$0xff]  ;;  %v4268_v12 = vrot.slane %v8610_v48, %v8541_v22 }
  0xf6   :  { %v990_v48 = vrot.slane %v8313_v49, %v8500_v28  ;;  %v4319_v54 = vrot.slane %v8614_v46, %v8541_v22  ;;  %v1004_v31 = vrot.slane %v8313_v49, %v8506_v35  ;;  %v955_v8 = vrot.slane %v8315_v50, %v8497_v27 }
  0xf7   :  { %527 = vmax.xlane.f32.xlu1 %v526_v6  ;;  %524 = vmax.xlane.f32.xlu0 %v523_v5  ;;  %v4312_v5 = vrot.slane %v8612_v47, %v8541_v22  ;;  %v899_v6 = vrot.slane %v8303_v44, %v8497_v27  ;;  %v997_v47 = vrot.slane %v8313_v49, %v8503_v30  ;;  %v535_v1 = vsel %vm156_vm0, %v153_v0, -inf }
  0xf8   :  { %v8701_v39 = vpop.xlane.xlu1 %317  ;;  %v8703_v17 = vpop.xlane.xlu0 %314  ;;  %v962_v44 = vrot.slane %v8315_v50, %v8500_v28  ;;  %v969_v19 = vrot.slane %v8315_v50, %v8503_v30  ;;  %v976_v2 = vrot.slane %v8315_v50, %v8506_v35  ;;  %v4414_v49 = vrot.slane %v4406_v63, %v8541_v22 }
  0xf9   :  { %11442 = vst [vmem:[#allocation32_spill] sm:$0xff] %v8701_v39  ;;  %11443 = vst [vmem:[#allocation33_spill] sm:$0xff] %v8703_v17  ;;  %v4421_v21 = vrot.slane %v4407_v45, %v8541_v22  ;;  %v1046_v26 = vrot.slane %v8325_v55, %v8500_v28  ;;  %v1053_v32 = vrot.slane %v8325_v55, %v8503_v30  ;;  %vm7477_vm0 = vcmask 1041409  }
  0xfa   :  { %v1060_v50 = vrot.slane %v8325_v55, %v8506_v35  ;;  %v1011_v25 = vrot.slane %v8327_v56, %v8497_v27  ;;  %v1018_v57 = vrot.slane %v8327_v56, %v8500_v28  ;;  %v1032_v37 = vrot.slane %v8327_v56, %v8506_v35 }
  0xfb   :  { %533 = vmax.xlane.f32.xlu1 %v532_v36  ;;  %530 = vmax.xlane.f32.xlu0 %v529_v58  ;;  %v1039_v36 = vrot.slane %v8325_v55, %v8497_v27  ;;  %v1025_v58 = vrot.slane %v8327_v56, %v8503_v30  ;;  %v8761_v38 = vcombine.low %v899_v6, %v906_v60 }
  0xfc   :  { %v8739_v46 = vpop.xlane.xlu1 %323  ;;  %v8741_v11 = vpop.xlane.xlu0 %320  ;;  %v8763_v63 = vcombine.low %v913_v29, %v920_v18  ;;  %v8765_v45 = vcombine.low %v4261_v51, %v4268_v12  ;;  %v4440_v55 = vcombine.low %v983_v53, %v990_v48  ;;  %v4441_v0 = vcombine.low %v997_v47, %v1004_v31 }
  0xfd   :  { %11444 = vst [vmem:[#allocation34_spill] sm:$0xff] %v8739_v46  ;;  %11445 = vst [vmem:[#allocation35_spill] sm:$0xff] %v8741_v11  ;;  %v8771_v17 = vcombine.low %v4312_v5, %v4319_v54  ;;  %v4329_v39 = vrot.slane %v8682_v7, %v8541_v22  ;;  %v8775_v56 = vcombine.low %v955_v8, %v962_v44 }
  0xfe   :  { %v8777_v6 = vcombine.low %v969_v19, %v976_v2  ;;  %v8779_v60 = vcombine.low %v1039_v36, %v1046_v26  ;;  %v8783_v51 = vcombine.low %v1011_v25, %v1018_v57  ;;  %v8785_v12 = vcombine.low %v1025_v58, %v1032_v37 }
  0xff   :  { %539 = vmax.xlane.f32.xlu1 %v538_v20  ;;  %536 = vmax.xlane.f32.xlu0 %v535_v1  ;;  %v8781_v20 = vcombine.low %v1053_v32, %v1060_v50  ;;  %v8787_v29 = vcombine.low %v4414_v49, %v4421_v21  ;;  %v4336_v5 = vrot.slane %v8686_v42, %v8541_v22 }
 0x100   :  { %v8767_v11 = vpop.xlane.xlu1 %329  ;;  %v8769_v46 = vpop.xlane.xlu0 %326  ;;  %v1095_v7 = vrot.slane %v8337_v61, %v8497_v27  ;;  %v1102_v18 = vrot.slane %v8337_v61, %v8500_v28  ;;  %v1109_v53 = vrot.slane %v8337_v61, %v8503_v30  ;;  %v1116_v48 = vrot.slane %v8337_v61, %v8506_v35 }
 0x101   :  { %11446 = vst [vmem:[#allocation36_spill] sm:$0xff] %v8767_v11  ;;  %11447 = vst [vmem:[#allocation37_spill] sm:$0xff] %v8769_v46  ;;  %v1067_v47 = vrot.slane %v8339_v62, %v8497_v27  ;;  %v1074_v54 = vrot.slane %v8339_v62, %v8500_v28  ;;  %v1081_v42 = vrot.slane %v8339_v62, %v8503_v30 }
 0x102   :  { %v4448_v44 = vrot.slane %v4440_v55, %v8541_v22  ;;  %v1088_v1 = vrot.slane %v8339_v62, %v8506_v35  ;;  %v1151_v61 = vrot.slane %v8349_v3, %v8497_v27  ;;  %v1158_v19 = vrot.slane %v8349_v3, %v8500_v28 }
 0x103   :  { %v4455_v2 = vrot.slane %v4441_v0, %v8541_v22  ;;  %v1165_v49 = vrot.slane %v8349_v3, %v8503_v30  ;;  %v1172_v21 = vrot.slane %v8349_v3, %v8506_v35  ;;  %v1123_v36 = vrot.slane %v8351_v4, %v8497_v27 }
 0x104   :  { %v8805_v31 = vpop.xlane.xlu1 %335  ;;  %v8807_v8 = vpop.xlane.xlu0 %332  ;;  %v1130_v62 = vrot.slane %v8351_v4, %v8500_v28  ;;  %v8825_v26 = vcombine.low %v1095_v7, %v1102_v18  ;;  %v8827_v32 = vcombine.low %v1109_v53, %v1116_v48  ;;  %v1137_v50 = vrot.slane %v8351_v4, %v8503_v30 }
 0x105   :  { %11448 = vst [vmem:[#allocation38_spill] sm:$0xff] %v8805_v31  ;;  %11449 = vst [vmem:[#allocation39_spill] sm:$0xff] %v8807_v8  ;;  %v1144_v25 = vrot.slane %v8351_v4, %v8506_v35  ;;  %v8833_v57 = vcombine.low %v1067_v47, %v1074_v54  ;;  %v1207_v3 = vrot.slane %v8361_v9, %v8497_v27 }
 0x106   :  { %v1214_v58 = vrot.slane %v8361_v9, %v8500_v28  ;;  %v8843_v0 = vcombine.low %v4329_v39, %v4336_v5  ;;  %v8845_v7 = vcombine.low %v1081_v42, %v1088_v1  ;;  %v1221_v18 = vrot.slane %v8361_v9, %v8503_v30 }
 0x107   :  { %v1228_v4 = vrot.slane %v8361_v9, %v8506_v35  ;;  %v4346_v53 = vrot.slane %v8678_v13, %v8541_v22  ;;  %v8853_v48 = vcombine.low %v1151_v61, %v1158_v19  ;;  %v8855_v47 = vcombine.low %v1165_v49, %v1172_v21 }
 0x108   :  { %v8839_v37 = vpop.xlane.xlu1 %341  ;;  %v8841_v55 = vpop.xlane.xlu0 %338  ;;  %v8857_v54 = vcombine.low %v1123_v36, %v1130_v62  ;;  %v8861_v39 = vcombine.low %v1137_v50, %v1144_v25  ;;  %v1179_v5 = vrot.slane %v8363_v10, %v8497_v27  ;;  %v4353_v42 = vrot.slane %v8680_v14, %v8541_v22 }
 0x109   :  { %11450 = vst [vmem:[#allocation40_spill] sm:$0xff] %v8839_v37  ;;  %11451 = vst [vmem:[#allocation41_spill] sm:$0xff] %v8841_v55  ;;  %v8859_v55 = vcombine.low %v4448_v44, %v4455_v2  ;;  %v4482_v9 = vrot.slane %v8779_v60, %v8541_v22  ;;  %v8869_v13 = vcombine.low %v1207_v3, %v1214_v58 }
 0x10a   :  { %v1186_v1 = vrot.slane %v8363_v10, %v8500_v28  ;;  %v1193_v44 = vrot.slane %v8363_v10, %v8503_v30  ;;  %v1200_v61 = vrot.slane %v8363_v10, %v8506_v35  ;;  %v8881_v49 = vcombine.low %v1221_v18, %v1228_v4 }
 0x10b   :  { %v1263_v14 = vrot.slane %v8373_v15, %v8497_v27  ;;  %v4489_v60 = vrot.slane %v8781_v20, %v8541_v22  ;;  %v4363_v21 = vrot.slane %v8694_v41, %v8541_v22  ;;  %v1270_v36 = vrot.slane %v8373_v15, %v8500_v28 }
 0x10c   :  { %v8877_v19 = vpop.xlane.xlu1 %347  ;;  %v8879_v2 = vpop.xlane.xlu0 %344  ;;  %v1277_v10 = vrot.slane %v8373_v15, %v8503_v30  ;;  %v1284_v62 = vrot.slane %v8373_v15, %v8506_v35  ;;  %v1235_v50 = vrot.slane %v8375_v16, %v8497_v27  ;;  %v1242_v25 = vrot.slane %v8375_v16, %v8500_v28 }
 0x10d   :  { %11452 = vst [vmem:[#allocation42_spill] sm:$0xff] %v8877_v19  ;;  %11453 = vst [vmem:[#allocation43_spill] sm:$0xff] %v8879_v2  ;;  %v1249_v20 = vrot.slane %v8375_v16, %v8503_v30  ;;  %v1256_v41 = vrot.slane %v8375_v16, %v8506_v35  ;;  %v4370_v3 = vrot.slane %v8696_v34, %v8541_v22 }
 0x10e   :  { %v1319_v58 = vrot.slane %v8385_v23, %v8497_v27  ;;  %v1326_v15 = vrot.slane %v8385_v23, %v8500_v28  ;;  %v1333_v18 = vrot.slane %v8385_v23, %v8503_v30  ;;  %v1340_v4 = vrot.slane %v8385_v23, %v8506_v35 }
 0x10f   :  { %v8918_v19 = vcombine.low %v1179_v5, %v1186_v1  ;;  %v1291_v34 = vrot.slane %v8387_v24, %v8497_v27  ;;  %v1298_v37 = vrot.slane %v8387_v24, %v8500_v28  ;;  %v8924_v8 = vcombine.low %v4346_v53, %v4353_v42 }
 0x110   :  { %v8913_v2 = vpop.xlane.xlu1 %353  ;;  %6433 = vperm.xlu1 %7918, %v8699_v40   ;;  %v8916_v16 = vpop.xlane.xlu0 %350  ;;  %v8926_v31 = vcombine.low %v1193_v44, %v1200_v61  ;;  %v8928_v46 = vcombine.low %v1263_v14, %v1270_v36  ;;  %v8930_v23 = vcombine.low %v1277_v10, %v1284_v62  ;;  %v8932_v11 = vcombine.low %v4482_v9, %v4489_v60  ;;  %v11460_v10 = vld [vmem:[#allocation4_spill] sm:$0xff] }
 0x111   :  { %11454 = vst [vmem:[#allocation44_spill] sm:$0xff] %v8916_v16  ;;  %v8934_v40 = vcombine.low %v1235_v50, %v1242_v25  ;;  %v8936_v5 = vcombine.low %v1249_v20, %v1256_v41  ;;  %v1305_v1 = vrot.slane %v8387_v24, %v8503_v30  ;;  %v4516_v16 = vrot.slane %v8825_v26, %v8541_v22  ;;  %v11461_v25 = vld [vmem:[#allocation5_spill] sm:$0xff] }
 0x112   :  { %v8942_v53 = vcombine.low %v1319_v58, %v1326_v15  ;;  %v8944_v42 = vcombine.low %v1333_v18, %v1340_v4  ;;  %v1312_v44 = vrot.slane %v8387_v24, %v8506_v35  ;;  %v8953_v14 = vcombine.low %v4363_v21, %v4370_v3 }
 0x113   :  { %11455 = vst [vmem:[#allocation45_spill] sm:$0xff] %v8934_v40  ;;  %11456 = vst [vmem:[#allocation46_spill] sm:$0xff] %v8936_v5  ;;  %v8955_v60 = vcombine.low %v1291_v34, %v1298_v37  ;;  %v1375_v26 = vrot.slane %v8397_v33, %v8497_v27  ;;  %v4523_v36 = vrot.slane %v8827_v32, %v8541_v22 }
 0x114   :  { %v8948_v61 = vpop.xlane.xlu1 %359  ;;  %6436 = vperm.xlu1 %7918, %v8692_v52   ;;  %v8951_v9 = vpop.xlane.xlu0 %356  ;;  %v4380_v24 = vrot.slane %v8688_v43, %v8541_v22  ;;  %v1382_v52 = vrot.slane %v8397_v33, %v8500_v28  ;;  %v1389_v21 = vrot.slane %v8397_v33, %v8503_v30  ;;  %v1396_v37 = vrot.slane %v8397_v33, %v8506_v35 }
 0x115   :  { %11457 = vst [vmem:[#allocation47_spill] sm:$0xff] %v8948_v61  ;;  %11458 = vst [vmem:[#allocation48_spill] sm:$0xff] %v8951_v9  ;;  %6430 = vperm.xlu0 %7917, %v8765_v45   ;;  %v1347_v62 = vrot.slane %v11460_v10, %v8497_v27  ;;  %v1354_v45 = vrot.slane %v11460_v10, %v8500_v28  ;;  %v1361_v32 = vrot.slane %v11460_v10, %v8503_v30 }
 0x116   :  { %11459 = vst [vmem:[#allocation49_spill] sm:$0xff] %v8955_v60  ;;  %v1368_v43 = vrot.slane %v11460_v10, %v8506_v35  ;;  %v4387_v50 = vrot.slane %v8690_v59, %v8541_v22  ;;  %v1431_v20 = vrot.slane %v11461_v25, %v8497_v27  ;;  %v1438_v33 = vrot.slane %v11461_v25, %v8500_v28  ;;  %v11464_v59 = vld [vmem:[#allocation6_spill] sm:$0xff]  ;;  %v11467_v60 = vld [vmem:[#allocation7_spill] sm:$0xff] }
 0x117   :  { %v1445_v41 = vrot.slane %v11461_v25, %v8503_v30  ;;  %v1452_v3 = vrot.slane %v11461_v25, %v8506_v35  ;;  %v1403_v18 = vrot.slane %v11464_v59, %v8497_v27  ;;  %v1410_v4 = vrot.slane %v11464_v59, %v8500_v28 }
 0x118   :  { %v8988_v58 = vpop.xlane.xlu1 %365  ;;  %6439 = vperm.xlu1 %7918, %v8771_v17   ;;  %v8991_v15 = vpop.xlane.xlu0 %362  ;;  %v1417_v34 = vrot.slane %v11464_v59, %v8503_v30  ;;  %v1424_v10 = vrot.slane %v11464_v59, %v8506_v35  ;;  %v9002_v25 = vcombine.low %v1305_v1, %v1312_v44  ;;  %v9006_v17 = vcombine.low %v1389_v21, %v1396_v37 }
 0x119   :  { %11462 = vst [vmem:[#allocation4_spill] sm:$0xff] %v8988_v58  ;;  %11463 = vst [vmem:[#allocation5_spill] sm:$0xff] %v8991_v15  ;;  %6457 = vperm.xlu0 %7917, %v8787_v29   ;;  %v9004_v58 = vcombine.low %v1375_v26, %v1382_v52  ;;  %v4524_v15 = vcombine.low %v4516_v16, %v4523_v36  ;;  %v9008_v61 = vcombine.low %v1347_v62, %v1354_v45 }
 0x11a   :  { %v9010_v9 = vcombine.low %v1361_v32, %v1368_v43  ;;  %v1487_v5 = vrot.slane %v11467_v60, %v8497_v27  ;;  %v1494_v40 = vrot.slane %v11467_v60, %v8500_v28  ;;  %v9016_v59 = vcombine.low %v1431_v20, %v1438_v33  ;;  %v11474_v43 = vld [vmem:[#allocation9_spill] sm:$0xff] }
 0x11b   :  { %11465 = vst [vmem:[#allocation6_spill] sm:$0xff] %v9008_v61  ;;  %v9018_v29 = vcombine.low %v1445_v41, %v1452_v3  ;;  %v4388_v16 = vcombine.low %v4380_v24, %v4387_v50  ;;  %v4550_v26 = vrot.slane %v8853_v48, %v8541_v22  ;;  %v9027_v36 = vcombine.low %v1403_v18, %v1410_v4  ;;  %v11472_v48 = vld [vmem:[#allocation8_spill] sm:$0xff]  ;;  %v11477_v41 = vld [vmem:[#allocation10_spill] sm:$0xff] }
 0x11c   :  { %11466 = vst [vmem:[#allocation50_spill] sm:$0xff] %v9010_v9  ;;  %v9020_v1 = vpop.xlane.xlu1 %371  ;;  %6442 = vperm.xlu1 %7918, %v8843_v0   ;;  %v9023_v44 = vpop.xlane.xlu0 %368  ;;  %v9029_v52 = vcombine.low %v1417_v34, %v1424_v10  ;;  %v4557_v21 = vrot.slane %v8855_v47, %v8541_v22  ;;  %v4397_v37 = vrot.slane %v8761_v38, %v8541_v22  ;;  %v11478_v34 = vld [vmem:[#allocation11_spill] sm:$0xff] }
 0x11d   :  { %11468 = vst [vmem:[#allocation7_spill] sm:$0xff] %v9020_v1  ;;  %11469 = vst [vmem:[#allocation51_spill] sm:$0xff] %v9023_v44  ;;  %6463 = vperm.xlu0 %7917, %v8859_v55   ;;  %v1501_v0 = vrot.slane %v11467_v60, %v8503_v30  ;;  %v1508_v24 = vrot.slane %v11467_v60, %v8506_v35  ;;  %v1459_v62 = vrot.slane %v11472_v48, %v8497_v27 }
 0x11e   :  { %11470 = vst [vmem:[#allocation52_spill] sm:$0xff] %v9027_v36  ;;  %11471 = vst [vmem:[#allocation53_spill] sm:$0xff] %v9029_v52  ;;  %v1466_v45 = vrot.slane %v11472_v48, %v8500_v28  ;;  %v9044_v32 = vcombine.low %v1487_v5, %v1494_v40  ;;  %v1473_v55 = vrot.slane %v11472_v48, %v8503_v30 }
 0x11f   :  { %v1480_v38 = vrot.slane %v11472_v48, %v8506_v35  ;;  %v4404_v47 = vrot.slane %v8763_v63, %v8541_v22  ;;  %v1543_v60 = vrot.slane %v11474_v43, %v8497_v27  ;;  %v1550_v50 = vrot.slane %v11474_v43, %v8500_v28 }
 0x120   :  { %11473 = vst [vmem:[#allocation8_spill] sm:$0xff] %v9044_v32  ;;  %v1557_v20 = vrot.slane %v11474_v43, %v8503_v30  ;;  %v9058_v40 = vpop.xlane.xlu1 %377  ;;  %6445 = vperm.xlu1 %7918, %v8924_v8   ;;  %v9061_v5 = vpop.xlane.xlu0 %374  ;;  %v4584_v33 = vrot.slane %v8869_v13, %v8541_v22  ;;  %v1564_v63 = vrot.slane %v11474_v43, %v8506_v35 }
 0x121   :  { %11475 = vst [vmem:[#allocation9_spill] sm:$0xff] %v9058_v40  ;;  %11476 = vst [vmem:[#allocation54_spill] sm:$0xff] %v9061_v5  ;;  %v1515_v3 = vrot.slane %v11477_v41, %v8497_v27  ;;  %v1522_v18 = vrot.slane %v11477_v41, %v8500_v28  ;;  %v1529_v4 = vrot.slane %v11477_v41, %v8503_v30  ;;  %6469 = vperm.xlu0 %7917, %v8932_v11   ;;  %v11479_v11 = vld [vmem:[#allocation12_spill] sm:$0xff] }
 0x122   :  { %v1536_v8 = vrot.slane %v11477_v41, %v8506_v35  ;;  %v1599_v13 = vrot.slane %v11478_v34, %v8497_v27  ;;  %v1606_v10 = vrot.slane %v11478_v34, %v8500_v28  ;;  %v4591_v48 = vrot.slane %v8881_v49, %v8541_v22 }
 0x123   :  { %v1613_v43 = vrot.slane %v11478_v34, %v8503_v30  ;;  %v1620_v32 = vrot.slane %v11478_v34, %v8506_v35  ;;  %v1571_v5 = vrot.slane %v11479_v11, %v8497_v27  ;;  %v1578_v41 = vrot.slane %v11479_v11, %v8500_v28 }
 0x124   :  { %v9090_v40 = vcombine.low %v1501_v0, %v1508_v24  ;;  %v1585_v44 = vrot.slane %v11479_v11, %v8503_v30  ;;  %v1592_v49 = vrot.slane %v11479_v11, %v8506_v35  ;;  %v9096_v1 = vpop.xlane.xlu1 %383  ;;  %6448 = vperm.xlu1 %7918, %v8953_v14   ;;  %v9099_v52 = vpop.xlane.xlu0 %380  ;;  %v4558_v34 = vcombine.low %v4550_v26, %v4557_v21 }
 0x125   :  { %11481 = vst [vmem:[#allocation11_spill] sm:$0xff] %v9096_v1  ;;  %11482 = vst [vmem:[#allocation12_spill] sm:$0xff] %v9099_v52  ;;  %v9101_v36 = vcombine.low %v1459_v62, %v1466_v45  ;;  %v9103_v9 = vcombine.low %v1473_v55, %v1480_v38  ;;  %v9105_v61 = vcombine.low %v1543_v60, %v1550_v50  ;;  %6475 = vperm.xlu0 %7917, %v4524_v15   ;;  %v11489_v55 = vld [vmem:[#allocation13_spill] sm:$0xff] }
 0x126   :  { %11480 = vst [vmem:[#allocation10_spill] sm:$0xff] %v9090_v40  ;;  %v9107_v0 = vcombine.low %v1557_v20, %v1564_v63  ;;  %v9109_v24 = vcombine.low %v1515_v3, %v1522_v18  ;;  %v9111_v40 = vcombine.low %v1529_v4, %v1536_v8  ;;  %v4405_v11 = vcombine.low %v4397_v37, %v4404_v47  ;;  %v11492_v47 = vld [vmem:[#allocation14_spill] sm:$0xff] }
 0x127   :  { %11483 = vst [vmem:[#allocation55_spill] sm:$0xff] %v9101_v36  ;;  %11484 = vst [vmem:[#allocation56_spill] sm:$0xff] %v9103_v9  ;;  %v4431_v14 = vrot.slane %v8775_v56, %v8541_v22  ;;  %v9115_v1 = vcombine.low %v1599_v13, %v1606_v10  ;;  %v9117_v26 = vcombine.low %v1613_v43, %v1620_v32  ;;  %v11494_v13 = vld [vmem:[#allocation16_spill] sm:$0xff]  ;;  %v11519_v36 = vld [vmem:[#allocation49_spill] sm:$0xff] }
 0x128   :  { %11485 = vst [vmem:[#allocation57_spill] sm:$0xff] %v9105_v61  ;;  %11486 = vst [vmem:[#allocation58_spill] sm:$0xff] %v9107_v0  ;;  %v9119_v21 = vcombine.low %v1571_v5, %v1578_v41  ;;  %v4592_v62 = vcombine.low %v4584_v33, %v4591_v48  ;;  %v9121_v45 = vcombine.low %v1585_v44, %v1592_v49  ;;  %v9127_v60 = vpop.xlane.xlu1 %389  ;;  %6451 = vperm.xlu1 %7918, %v4388_v16   ;;  %v9129_v37 = vpop.xlane.xlu0 %386 }
 0x129   :  { %11487 = vst [vmem:[#allocation59_spill] sm:$0xff] %v9109_v24  ;;  %11488 = vst [vmem:[#allocation60_spill] sm:$0xff] %v9111_v40  ;;  %v1655_v15 = vrot.slane %v11489_v55, %v8497_v27  ;;  %v1662_v38 = vrot.slane %v11489_v55, %v8500_v28  ;;  %v4438_v56 = vrot.slane %v8777_v6, %v8541_v22  ;;  %6481 = vperm.xlu0 %7917, %v4558_v34   ;;  %v11493_v6 = vld [vmem:[#allocation15_spill] sm:$0xff] }
 0x12a   :  { %11490 = vst [vmem:[#allocation13_spill] sm:$0xff] %v9127_v60  ;;  %11491 = vst [vmem:[#allocation61_spill] sm:$0xff] %v9129_v37  ;;  %v1669_v32 = vrot.slane %v11489_v55, %v8503_v30  ;;  %v1676_v44 = vrot.slane %v11489_v55, %v8506_v35  ;;  %v1627_v50 = vrot.slane %v11492_v47, %v8497_v27 }
 0x12b   :  { %v1634_v20 = vrot.slane %v11492_v47, %v8500_v28  ;;  %v1641_v16 = vrot.slane %v11492_v47, %v8503_v30  ;;  %v1648_v5 = vrot.slane %v11492_v47, %v8506_v35  ;;  %v1711_v33 = vrot.slane %v11493_v6, %v8497_v27 }
 0x12c   :  { %v1718_v63 = vrot.slane %v11493_v6, %v8500_v28  ;;  %v1725_v3 = vrot.slane %v11493_v6, %v8503_v30  ;;  %v1732_v18 = vrot.slane %v11493_v6, %v8506_v35  ;;  %v4618_v4 = vrot.slane %v8928_v46, %v8541_v22  ;;  %v9165_v49 = vpop.xlane.xlu1 %395  ;;  %6454 = vperm.xlu1 %7918, %v4405_v11   ;;  %v9167_v34 = vpop.xlane.xlu0 %392 }
 0x12d   :  { %v4625_v8 = vrot.slane %v8930_v23, %v8541_v22  ;;  %v1683_v10 = vrot.slane %v11494_v13, %v8497_v27  ;;  %v1690_v48 = vrot.slane %v11494_v13, %v8500_v28  ;;  %v1697_v43 = vrot.slane %v11494_v13, %v8503_v30  ;;  %11495 = vst [vmem:[#allocation14_spill] sm:$0xff] %v9165_v49 }
 0x12e   :  { %v1704_v41 = vrot.slane %v11494_v13, %v8506_v35  ;;  %11496 = vst [vmem:[#allocation15_spill] sm:$0xff] %v9167_v34  ;;  %v9169_v46 = vcombine.low %v1655_v15, %v1662_v38  ;;  %v9171_v23 = vcombine.low %v1669_v32, %v1676_v44  ;;  %v9173_v55 = vcombine.low %v1627_v50, %v1634_v20  ;;  %v11499_v32 = vld [vmem:[#allocation18_spill] sm:$0xff]  ;;  %v11500_v20 = vld [vmem:[#allocation19_spill] sm:$0xff] }
 0x12f   :  { %6487 = vperm.xlu0 %7917, %v4592_v62   ;;  %v4439_v47 = vcombine.low %v4431_v14, %v4438_v56  ;;  %v9175_v6 = vcombine.low %v1641_v16, %v1648_v5  ;;  %v9177_v0 = vcombine.low %v1711_v33, %v1718_v63  ;;  %v4465_v13 = vrot.slane %v8783_v51, %v8541_v22 }
 0x130   :  { %v4472_v11 = vrot.slane %v8785_v12, %v8541_v22  ;;  %v9183_v61 = vcombine.low %v1725_v3, %v1732_v18  ;;  %v4626_v15 = vcombine.low %v4618_v4, %v4625_v8  ;;  %v4652_v38 = vrot.slane %v8942_v53, %v8541_v22  ;;  %v9197_v12 = vpop.xlane.xlu1 %401  ;;  %v9199_v50 = vpop.xlane.xlu0 %398 }
 0x131   :  { %11497 = vst [vmem:[#allocation16_spill] sm:$0xff] %v9177_v0  ;;  %v4659_v62 = vrot.slane %v8944_v42, %v8541_v22  ;;  %v9189_v14 = vcombine.low %v1683_v10, %v1690_v48  ;;  %v9191_v56 = vcombine.low %v1697_v43, %v1704_v41  ;;  %v1767_v44 = vrot.slane %v11499_v32, %v8497_v27  ;;  %v11501_v43 = vld [vmem:[#allocation28_spill] sm:$0xff] }
 0x132   :  { %11498 = vst [vmem:[#allocation62_spill] sm:$0xff] %v9183_v61  ;;  %v1774_v51 = vrot.slane %v11499_v32, %v8500_v28  ;;  %6460 = vperm.xlu1 %7918, %v4439_v47   ;;  %v1781_v53 = vrot.slane %v11499_v32, %v8503_v30  ;;  %v1788_v42 = vrot.slane %v11499_v32, %v8506_v35  ;;  %v11505_v32 = vld [vmem:[#allocation20_spill] sm:$0xff] }
 0x133   :  { %v1739_v16 = vrot.slane %v11500_v20, %v8497_v27  ;;  %v1746_v5 = vrot.slane %v11500_v20, %v8500_v28  ;;  %6493 = vperm.xlu0 %7917, %v4626_v15   ;;  %v1753_v33 = vrot.slane %v11500_v20, %v8503_v30  ;;  %v4473_v63 = vcombine.low %v4465_v13, %v4472_v11 }
 0x134   :  { %v4499_v3 = vrot.slane %v8833_v57, %v8541_v22  ;;  %v4506_v18 = vrot.slane %v8845_v7, %v8541_v22  ;;  %v1760_v4 = vrot.slane %v11500_v20, %v8506_v35  ;;  %v4660_v8 = vcombine.low %v4652_v38, %v4659_v62  ;;  %v9225_v57 = vpop.xlane.xlu1 %407  ;;  %v9227_v7 = vpop.xlane.xlu0 %404 }
 0x135   :  { %v4686_v10 = vrot.slane %v9004_v58, %v8541_v22  ;;  %v4693_v48 = vrot.slane %v9006_v17, %v8541_v22  ;;  %v2047_v41 = vrot.slane %v11501_v43, %v8497_v27  ;;  %v2054_v47 = vrot.slane %v11501_v43, %v8500_v28 }
 0x136   :  { %6466 = vperm.xlu1 %7918, %v4473_v63   ;;  %v4533_v13 = vrot.slane %v8857_v54, %v8541_v22  ;;  %v4540_v58 = vrot.slane %v8861_v39, %v8541_v22  ;;  %v9233_v11 = vcombine.low %v1767_v44, %v1774_v51  ;;  %v9235_v17 = vcombine.low %v1781_v53, %v1788_v42 }
 0x137   :  { %v2061_v15 = vrot.slane %v11501_v43, %v8503_v30  ;;  %v2068_v38 = vrot.slane %v11501_v43, %v8506_v35  ;;  %6499 = vperm.xlu0 %7917, %v4660_v8   ;;  %v9241_v62 = vcombine.low %v1739_v16, %v1746_v5  ;;  %v1823_v20 = vrot.slane %v11505_v32, %v8497_v27 }
 0x138   :  { %11502 = vst [vmem:[#allocation18_spill] sm:$0xff] %v9233_v11  ;;  %11503 = vst [vmem:[#allocation19_spill] sm:$0xff] %v9235_v17  ;;  %v1830_v54 = vrot.slane %v11505_v32, %v8500_v28  ;;  %v4507_v39 = vcombine.low %v4499_v3, %v4506_v18  ;;  %v1837_v44 = vrot.slane %v11505_v32, %v8503_v30  ;;  %v9255_v63 = vpop.xlane.xlu1 %413  ;;  %v9257_v8 = vpop.xlane.xlu0 %410 }
 0x139   :  { %11504 = vst [vmem:[#allocation28_spill] sm:$0xff] %v9241_v62  ;;  %v4694_v51 = vcombine.low %v4686_v10, %v4693_v48  ;;  %v4720_v53 = vrot.slane %v9016_v59, %v8541_v22  ;;  %v4727_v42 = vrot.slane %v9018_v29, %v8541_v22  ;;  %v1844_v16 = vrot.slane %v11505_v32, %v8506_v35 }
 0x13a   :  { %v5086_v5 = vcombine.low %v2047_v41, %v2054_v47  ;;  %11506 = vst [vmem:[#allocation20_spill] sm:$0xff] %v9255_v63  ;;  %6472 = vperm.xlu1 %7918, %v4507_v39   ;;  %v4541_v3 = vcombine.low %v4533_v13, %v4540_v58  ;;  %v4567_v18 = vrot.slane %v8918_v19, %v8541_v22 }
 0x13b   :  { %v5087_v10 = vcombine.low %v2061_v15, %v2068_v38  ;;  %6505 = vperm.xlu0 %7917, %v4694_v51   ;;  %v4574_v59 = vrot.slane %v8926_v31, %v8541_v22  ;;  %v4822_v29 = vrot.slane %v9115_v1, %v8541_v22  ;;  %v4829_v48 = vrot.slane %v9117_v26, %v8541_v22  ;;  %v11508_v31 = vld [vmem:[#allocation21_spill] sm:$0xff] }
 0x13c   :  { %v2495_v43 = vrot.slane %v8913_v2, %v8497_v27  ;;  %v2502_v41 = vrot.slane %v8913_v2, %v8500_v28  ;;  %v2509_v19 = vrot.slane %v8913_v2, %v8503_v30  ;;  %v2516_v47 = vrot.slane %v8913_v2, %v8506_v35  ;;  %v9289_v2 = vpop.xlane.xlu1 %419 }
 0x13d   :  { %v9275_v13 = vcombine.low %v1753_v33, %v1760_v4  ;;  %v1795_v1 = vrot.slane %v11508_v31, %v8497_v27  ;;  %v1802_v26 = vrot.slane %v11508_v31, %v8500_v28  ;;  %v4728_v58 = vcombine.low %v4720_v53, %v4727_v42  ;;  %11511 = vst [vmem:[#allocation65_spill] sm:$0xff] %v9289_v2  ;;  %v9291_v33 = vpop.xlane.xlu0 %416  ;;  %v11513_v53 = vld [vmem:[#allocation45_spill] sm:$0xff] }
 0x13e   :  { %v9281_v15 = vcombine.low %v1823_v20, %v1830_v54  ;;  %v9283_v38 = vcombine.low %v1837_v44, %v1844_v16  ;;  %v1809_v32 = vrot.slane %v11508_v31, %v8503_v30  ;;  %v1816_v39 = vrot.slane %v11508_v31, %v8506_v35  ;;  %6478 = vperm.xlu1 %7918, %v4541_v3   ;;  %v11514_v54 = vld [vmem:[#allocation46_spill] sm:$0xff] }
 0x13f   :  { %11507 = vst [vmem:[#allocation63_spill] sm:$0xff] %v9275_v13  ;;  %11512 = vst [vmem:[#allocation66_spill] sm:$0xff] %v9291_v33  ;;  %6511 = vperm.xlu0 %7917, %v4728_v58   ;;  %v4575_v4 = vcombine.low %v4567_v18, %v4574_v59  ;;  %v4830_v51 = vcombine.low %v4822_v29, %v4829_v48  ;;  %v4601_v20 = vrot.slane %v11513_v53, %v8541_v22  ;;  %v11515_v29 = vld [vmem:[#allocation22_spill] sm:$0xff] }
 0x140   :  { %11509 = vst [vmem:[#allocation21_spill] sm:$0xff] %v9281_v15  ;;  %11510 = vst [vmem:[#allocation64_spill] sm:$0xff] %v9283_v38  ;;  %v4608_v44 = vrot.slane %v11514_v54, %v8541_v22  ;;  %v5358_v42 = vcombine.low %v2495_v43, %v2502_v41  ;;  %v5359_v16 = vcombine.low %v2509_v19, %v2516_v47  ;;  %v9315_v41 = vpop.xlane.xlu1 %425  ;;  %v11518_v47 = vld [vmem:[#allocation23_spill] sm:$0xff] }
 0x141   :  { %v5094_v40 = vrot.slane %v5086_v5, %v8541_v22  ;;  %v5101_v31 = vrot.slane %v5087_v10, %v8541_v22  ;;  %v2943_v3 = vrot.slane %v9197_v12, %v8497_v27  ;;  %v2950_v58 = vrot.slane %v9197_v12, %v8500_v28  ;;  %11516 = vst [vmem:[#allocation45_spill] sm:$0xff] %v9315_v41  ;;  %v9317_v19 = vpop.xlane.xlu0 %422 }
 0x142   :  { %v2957_v18 = vrot.slane %v9197_v12, %v8503_v30  ;;  %v2964_v59 = vrot.slane %v9197_v12, %v8506_v35  ;;  %v1879_v48 = vrot.slane %v11515_v29, %v8497_v27  ;;  %v1886_v5 = vrot.slane %v11515_v29, %v8500_v28  ;;  %6484 = vperm.xlu1 %7918, %v4575_v4  }
 0x143   :  { %v1893_v10 = vrot.slane %v11515_v29, %v8503_v30  ;;  %v1900_v43 = vrot.slane %v11515_v29, %v8506_v35  ;;  %11517 = vst [vmem:[#allocation46_spill] sm:$0xff] %v9317_v19  ;;  %v1851_v12 = vrot.slane %v11518_v47, %v8497_v27  ;;  %v1858_v53 = vrot.slane %v11518_v47, %v8500_v28 }
 0x144   :  { %v1865_v54 = vrot.slane %v11518_v47, %v8503_v30  ;;  %v1872_v24 = vrot.slane %v11518_v47, %v8506_v35  ;;  %6529 = vperm.xlu0 %7917, %v4830_v51   ;;  %v4609_v9 = vcombine.low %v4601_v20, %v4608_v44  ;;  %v5102_v29 = vcombine.low %v5094_v40, %v5101_v31  ;;  %v9341_v40 = vpop.xlane.xlu1 %431 }
 0x145   :  { %v4635_v4 = vrot.slane %v11519_v36, %v8541_v22  ;;  %v4642_v34 = vrot.slane %v9002_v25, %v8541_v22  ;;  %v5630_v49 = vcombine.low %v2943_v3, %v2950_v58  ;;  %v5631_v38 = vcombine.low %v2957_v18, %v2964_v59  ;;  %11524 = vst [vmem:[#allocation68_spill] sm:$0xff] %v9341_v40  ;;  %v9343_v36 = vpop.xlane.xlu0 %428  ;;  %v11526_v25 = vld [vmem:[#allocation29_spill] sm:$0xff] }
 0x146   :  { %v5366_v15 = vrot.slane %v5358_v42, %v8541_v22  ;;  %v5373_v41 = vrot.slane %v5359_v16, %v8541_v22  ;;  %v9333_v37 = vcombine.low %v1795_v1, %v1802_v26  ;;  %v9335_v60 = vcombine.low %v1809_v32, %v1816_v39  ;;  %6490 = vperm.xlu1 %7918, %v4609_v9   ;;  %v11528_v9 = vld [vmem:[#allocation6_spill] sm:$0xff] }
 0x147   :  { %v9337_v47 = vcombine.low %v1879_v48, %v1886_v5  ;;  %v9339_v51 = vcombine.low %v1893_v10, %v1900_v43  ;;  %11525 = vst [vmem:[#allocation69_spill] sm:$0xff] %v9343_v36  ;;  %v2019_v20 = vrot.slane %v11526_v25, %v8497_v27  ;;  %v2026_v44 = vrot.slane %v11526_v25, %v8500_v28  ;;  %v11529_v16 = vld [vmem:[#allocation50_spill] sm:$0xff]  ;;  %v11531_v48 = vld [vmem:[#allocation24_spill] sm:$0xff] }
 0x148   :  { %11520 = vst [vmem:[#allocation22_spill] sm:$0xff] %v9333_v37  ;;  %11521 = vst [vmem:[#allocation23_spill] sm:$0xff] %v9335_v60  ;;  %v2033_v1 = vrot.slane %v11526_v25, %v8503_v30  ;;  %v2040_v26 = vrot.slane %v11526_v25, %v8506_v35  ;;  %6577 = vperm.xlu0 %7917, %v5102_v29   ;;  %v9353_v32 = vcombine.low %v1851_v12, %v1858_v53  ;;  %v9371_v12 = vpop.xlane.xlu1 %437  ;;  %v11536_v25 = vld [vmem:[#allocation52_spill] sm:$0xff] }
 0x149   :  { %11522 = vst [vmem:[#allocation49_spill] sm:$0xff] %v9337_v47  ;;  %11523 = vst [vmem:[#allocation67_spill] sm:$0xff] %v9339_v51  ;;  %v4643_v39 = vcombine.low %v4635_v4, %v4642_v34  ;;  %v4669_v42 = vrot.slane %v11528_v9, %v8541_v22  ;;  %v4676_v31 = vrot.slane %v11529_v16, %v8541_v22 }
 0x14a   :  { %11527 = vst [vmem:[#allocation29_spill] sm:$0xff] %v9353_v32  ;;  %v9359_v3 = vcombine.low %v1865_v54, %v1872_v24  ;;  %v5374_v58 = vcombine.low %v5366_v15, %v5373_v41  ;;  %v5638_v18 = vrot.slane %v5630_v49, %v8541_v22  ;;  %v5645_v59 = vrot.slane %v5631_v38, %v8541_v22  ;;  %v9373_v24 = vpop.xlane.xlu0 %434  ;;  %v11534_v49 = vld [vmem:[#allocation25_spill] sm:$0xff]  ;;  %v11535_v54 = vld [vmem:[#allocation44_spill] sm:$0xff] }
 0x14b   :  { %v1935_v5 = vrot.slane %v11531_v48, %v8497_v27  ;;  %v1942_v10 = vrot.slane %v11531_v48, %v8500_v28  ;;  %v1949_v34 = vrot.slane %v11531_v48, %v8503_v30  ;;  %v1956_v43 = vrot.slane %v11531_v48, %v8506_v35  ;;  %11532 = vst [vmem:[#allocation50_spill] sm:$0xff] %v9371_v12 }
 0x14c   :  { %11530 = vst [vmem:[#allocation6_spill] sm:$0xff] %v9359_v3  ;;  %6496 = vperm.xlu1 %7918, %v4643_v39   ;;  %11533 = vst [vmem:[#allocation24_spill] sm:$0xff] %v9373_v24  ;;  %v1907_v15 = vrot.slane %v11534_v49, %v8497_v27  ;;  %v1914_v38 = vrot.slane %v11534_v49, %v8500_v28  ;;  %v5069_v41 = vcombine.low %v2019_v20, %v2026_v44  ;;  %v11537_v39 = vld [vmem:[#allocation53_spill] sm:$0xff] }
 0x14d   :  { %v5070_v53 = vcombine.low %v2033_v1, %v2040_v26  ;;  %6625 = vperm.xlu0 %7917, %v5374_v58   ;;  %v2467_v29 = vrot.slane %v11535_v54, %v8497_v27  ;;  %v4677_v4 = vcombine.low %v4669_v42, %v4676_v31  ;;  %v4703_v9 = vrot.slane %v11536_v25, %v8541_v22  ;;  %v11539_v31 = vld [vmem:[#allocation26_spill] sm:$0xff]  ;;  %v9399_v25 = vpop.xlane.xlu1 %443 }
 0x14e   :  { %v4710_v16 = vrot.slane %v11537_v39, %v8541_v22  ;;  %v2474_v48 = vrot.slane %v11535_v54, %v8500_v28  ;;  %v2481_v24 = vrot.slane %v11535_v54, %v8503_v30  ;;  %v2488_v20 = vrot.slane %v11535_v54, %v8506_v35  ;;  %11540 = vst [vmem:[#allocation44_spill] sm:$0xff] %v9399_v25  ;;  %v9401_v39 = vpop.xlane.xlu0 %440 }
 0x14f   :  { %v5646_v44 = vcombine.low %v5638_v18, %v5645_v59  ;;  %v9391_v1 = vcombine.low %v1935_v5, %v1942_v10  ;;  %v1921_v26 = vrot.slane %v11534_v49, %v8503_v30  ;;  %v1928_v42 = vrot.slane %v11534_v49, %v8506_v35  ;;  %11541 = vst [vmem:[#allocation52_spill] sm:$0xff] %v9401_v39  ;;  %v11542_v5 = vld [vmem:[#allocation27_spill] sm:$0xff] }
 0x150   :  { %v1991_v58 = vrot.slane %v11539_v31, %v8497_v27  ;;  %6502 = vperm.xlu1 %7918, %v4677_v4   ;;  %v1998_v54 = vrot.slane %v11539_v31, %v8500_v28  ;;  %v2005_v18 = vrot.slane %v11539_v31, %v8503_v30  ;;  %v2012_v59 = vrot.slane %v11539_v31, %v8506_v35 }
 0x151   :  { %11538 = vst [vmem:[#allocation25_spill] sm:$0xff] %v9391_v1  ;;  %v1963_v10 = vrot.slane %v11542_v5, %v8497_v27  ;;  %6673 = vperm.xlu0 %7917, %v5646_v44   ;;  %v1970_v49 = vrot.slane %v11542_v5, %v8500_v28  ;;  %v4711_v1 = vcombine.low %v4703_v9, %v4710_v16  ;;  %v450_v16 = vpop.xlane.xlu1 %449 }
 0x152   :  { %v4805_v4 = vrot.slane %v9119_v21, %v8541_v22  ;;  %v4812_v39 = vrot.slane %v9121_v45, %v8541_v22  ;;  %v5341_v25 = vcombine.low %v2467_v29, %v2474_v48  ;;  %v5342_v12 = vcombine.low %v2481_v24, %v2488_v20  ;;  %v447_v45 = vpop.xlane.xlu0 %446 }
 0x153   :  { %v5077_v51 = vrot.slane %v5069_v41, %v8541_v22  ;;  %v5084_v31 = vrot.slane %v5070_v53, %v8541_v22  ;;  %v2915_v47 = vrot.slane %v9199_v50, %v8497_v27  ;;  %v2922_v44 = vrot.slane %v9199_v50, %v8500_v28 }
 0x154   :  { %v2929_v9 = vrot.slane %v9199_v50, %v8503_v30  ;;  %v2936_v21 = vrot.slane %v9199_v50, %v8506_v35  ;;  %6508 = vperm.xlu1 %7918, %v4711_v1   ;;  %v3391_v24 = vrot.slane %v450_v16, %v8497_v27  ;;  %v3398_v41 = vrot.slane %v450_v16, %v8500_v28 }
 0x155   :  { %v3405_v53 = vrot.slane %v450_v16, %v8503_v30  ;;  %v3412_v29 = vrot.slane %v450_v16, %v8506_v35  ;;  %v9431_v48 = vcombine.low %v1949_v34, %v1956_v43  ;;  %v9433_v20 = vcombine.low %v1907_v15, %v1914_v38  ;;  %v9447_v34 = vpop.xlane.xlu1 %455 }
 0x156   :  { %v9435_v40 = vcombine.low %v1921_v26, %v1928_v42  ;;  %v4813_v3 = vcombine.low %v4805_v4, %v4812_v39  ;;  %v1977_v50 = vrot.slane %v11542_v5, %v8503_v30  ;;  %v1984_v1 = vrot.slane %v11542_v5, %v8506_v35  ;;  %v9449_v43 = vpop.xlane.xlu0 %452  ;;  %v11551_v4 = vld [vmem:[#allocation31_spill] sm:$0xff] }
 0x157   :  { %11543 = vst [vmem:[#allocation53_spill] sm:$0xff] %v9431_v48  ;;  %11544 = vst [vmem:[#allocation26_spill] sm:$0xff] %v9433_v20  ;;  %v5902_v32 = vcombine.low %v3391_v24, %v3398_v41  ;;  %v5903_v36 = vcombine.low %v3405_v53, %v3412_v29  ;;  %v9441_v60 = vcombine.low %v1991_v58, %v1998_v54 }
 0x158   :  { %11545 = vst [vmem:[#allocation27_spill] sm:$0xff] %v9435_v40  ;;  %v9443_v37 = vcombine.low %v2005_v18, %v2012_v59  ;;  %v9445_v16 = vcombine.low %v1963_v10, %v1970_v49  ;;  %6526 = vperm.xlu1 %7918, %v4813_v3   ;;  %v5085_v15 = vcombine.low %v5077_v51, %v5084_v31  ;;  %v11550_v3 = vld [vmem:[#allocation30_spill] sm:$0xff] }
 0x159   :  { %11546 = vst [vmem:[#allocation70_spill] sm:$0xff] %v9441_v60  ;;  %v5613_v38 = vcombine.low %v2915_v47, %v2922_v44  ;;  %v5614_v26 = vcombine.low %v2929_v9, %v2936_v21  ;;  %v5349_v42 = vrot.slane %v5341_v25, %v8541_v22  ;;  %v5356_v39 = vrot.slane %v5342_v12, %v8541_v22  ;;  %v9471_v44 = vpop.xlane.xlu1 %461 }
 0x15a   :  { %11547 = vst [vmem:[#allocation71_spill] sm:$0xff] %v9443_v37  ;;  %11548 = vst [vmem:[#allocation72_spill] sm:$0xff] %v9445_v16  ;;  %v3363_v5 = vrot.slane %v447_v45, %v8497_v27  ;;  %v3370_v58 = vrot.slane %v447_v45, %v8500_v28  ;;  %v3377_v54 = vrot.slane %v447_v45, %v8503_v30  ;;  %v9473_v9 = vpop.xlane.xlu0 %458 }
 0x15b   :  { %v3384_v18 = vrot.slane %v447_v45, %v8506_v35  ;;  %v9457_v59 = vcombine.low %v1977_v50, %v1984_v1  ;;  %v2103_v10 = vrot.slane %v11550_v3, %v8497_v27  ;;  %v5910_v47 = vrot.slane %v5902_v32, %v8541_v22  ;;  %11552 = vst [vmem:[#allocation30_spill] sm:$0xff] %v9471_v44  ;;  %v11553_v50 = vld [vmem:[#allocation32_spill] sm:$0xff] }
 0x15c   :  { %v5917_v51 = vrot.slane %v5903_v36, %v8541_v22  ;;  %v2110_v12 = vrot.slane %v11550_v3, %v8500_v28  ;;  %v2117_v25 = vrot.slane %v11550_v3, %v8503_v30  ;;  %v2124_v49 = vrot.slane %v11550_v3, %v8506_v35  ;;  %6574 = vperm.xlu1 %7918, %v5085_v15  }
 0x15d   :  { %11549 = vst [vmem:[#allocation73_spill] sm:$0xff] %v9457_v59  ;;  %v2075_v31 = vrot.slane %v11551_v4, %v8497_v27  ;;  %v2082_v36 = vrot.slane %v11551_v4, %v8500_v28  ;;  %v2089_v32 = vrot.slane %v11551_v4, %v8503_v30  ;;  %v2096_v21 = vrot.slane %v11551_v4, %v8506_v35 }
 0x15e   :  { %v5357_v45 = vcombine.low %v5349_v42, %v5356_v39  ;;  %v5885_v24 = vcombine.low %v3363_v5, %v3370_v58  ;;  %v5886_v41 = vcombine.low %v3377_v54, %v3384_v18  ;;  %v5621_v53 = vrot.slane %v5613_v38, %v8541_v22  ;;  %v11554_v42 = vld [vmem:[#allocation33_spill] sm:$0xff]  ;;  %v9497_v5 = vpop.xlane.xlu1 %467  ;;  %v9499_v58 = vpop.xlane.xlu0 %464  ;;  %v11557_v18 = vld [vmem:[#allocation34_spill] sm:$0xff] }
 0x15f   :  { %v5628_v29 = vrot.slane %v5614_v26, %v8541_v22  ;;  %v2159_v1 = vrot.slane %v11553_v50, %v8497_v27  ;;  %v2166_v15 = vrot.slane %v11553_v50, %v8500_v28  ;;  %v2173_v3 = vrot.slane %v11553_v50, %v8503_v30  ;;  %11555 = vst [vmem:[#allocation31_spill] sm:$0xff] %v9497_v5  ;;  %v11563_v5 = vld [vmem:[#allocation36_spill] sm:$0xff] }
 0x160   :  { %v5918_v37 = vcombine.low %v5910_v47, %v5917_v51  ;;  %v2180_v4 = vrot.slane %v11553_v50, %v8506_v35  ;;  %v2131_v39 = vrot.slane %v11554_v42, %v8497_v27  ;;  %v2138_v38 = vrot.slane %v11554_v42, %v8500_v28  ;;  %6622 = vperm.xlu1 %7918, %v5357_v45  }
 0x161   :  { %v2145_v26 = vrot.slane %v11554_v42, %v8503_v30  ;;  %11556 = vst [vmem:[#allocation32_spill] sm:$0xff] %v9499_v58  ;;  %v2152_v54 = vrot.slane %v11554_v42, %v8506_v35  ;;  %v2215_v47 = vrot.slane %v11557_v18, %v8497_v27  ;;  %v2222_v51 = vrot.slane %v11557_v18, %v8500_v28  ;;  %v11558_v42 = vld [vmem:[#allocation35_spill] sm:$0xff] }
 0x162   :  { %v2229_v50 = vrot.slane %v11557_v18, %v8503_v30  ;;  %6721 = vperm.xlu0 %7917, %v5918_v37   ;;  %v2236_v60 = vrot.slane %v11557_v18, %v8506_v35  ;;  %v5629_v59 = vcombine.low %v5621_v53, %v5628_v29  ;;  %v5893_v45 = vrot.slane %v5885_v24, %v8541_v22  ;;  %v9531_v29 = vpop.xlane.xlu0 %470 }
 0x163   :  { %v5900_v16 = vrot.slane %v5886_v41, %v8541_v22  ;;  %v2187_v48 = vrot.slane %v11558_v42, %v8497_v27  ;;  %v2194_v40 = vrot.slane %v11558_v42, %v8500_v28  ;;  %v2201_v20 = vrot.slane %v11558_v42, %v8503_v30  ;;  %v9529_v41 = vpop.xlane.xlu1 %473  ;;  %11560 = vst [vmem:[#allocation34_spill] sm:$0xff] %v9531_v29 }
 0x164   :  { %v2208_v37 = vrot.slane %v11558_v42, %v8506_v35  ;;  %v9521_v19 = vcombine.low %v2103_v10, %v2110_v12  ;;  %v9523_v18 = vcombine.low %v2117_v25, %v2124_v49  ;;  %v9525_v53 = vcombine.low %v2075_v31, %v2082_v36  ;;  %11559 = vst [vmem:[#allocation33_spill] sm:$0xff] %v9529_v41 }
 0x165   :  { %v9527_v24 = vcombine.low %v2089_v32, %v2096_v21  ;;  %6670 = vperm.xlu1 %7918, %v5629_v59   ;;  %v9533_v17 = vcombine.low %v2159_v1, %v2166_v15  ;;  %v9535_v11 = vcombine.low %v2173_v3, %v2180_v4  ;;  %v2271_v42 = vrot.slane %v11563_v5, %v8497_v27  ;;  %v11568_v15 = vld [vmem:[#allocation37_spill] sm:$0xff] }
 0x166   :  { %v2278_v10 = vrot.slane %v11563_v5, %v8500_v28  ;;  %v9541_v12 = vcombine.low %v2131_v39, %v2138_v38  ;;  %v9543_v25 = vcombine.low %v2145_v26, %v2152_v54  ;;  %v9545_v49 = vcombine.low %v2215_v47, %v2222_v51  ;;  %v11572_v39 = vld [vmem:[#allocation38_spill] sm:$0xff]  ;;  %v11573_v47 = vld [vmem:[#allocation39_spill] sm:$0xff] }
 0x167   :  { %11561 = vst [vmem:[#allocation35_spill] sm:$0xff] %v9533_v17  ;;  %11562 = vst [vmem:[#allocation74_spill] sm:$0xff] %v9535_v11  ;;  %v5901_v31 = vcombine.low %v5893_v45, %v5900_v16  ;;  %v9547_v59 = vcombine.low %v2229_v50, %v2236_v60  ;;  %v9549_v36 = vcombine.low %v2187_v48, %v2194_v40  ;;  %v9563_v16 = vpop.xlane.xlu1 %479  ;;  %v9565_v40 = vpop.xlane.xlu0 %476 }
 0x168   :  { %11564 = vst [vmem:[#allocation36_spill] sm:$0xff] %v9545_v49  ;;  %v9551_v32 = vcombine.low %v2201_v20, %v2208_v37  ;;  %v2285_v21 = vrot.slane %v11563_v5, %v8503_v30  ;;  %v2292_v1 = vrot.slane %v11563_v5, %v8506_v35  ;;  %v2243_v3 = vrot.slane %v11568_v15, %v8497_v27  ;;  %v11578_v49 = vld [vmem:[#allocation42_spill] sm:$0xff] }
 0x169   :  { %11565 = vst [vmem:[#allocation75_spill] sm:$0xff] %v9547_v59  ;;  %11566 = vst [vmem:[#allocation76_spill] sm:$0xff] %v9549_v36  ;;  %v2250_v4 = vrot.slane %v11568_v15, %v8500_v28  ;;  %v2257_v60 = vrot.slane %v11568_v15, %v8503_v30  ;;  %6718 = vperm.xlu1 %7918, %v5901_v31   ;;  %v9567_v48 = vcombine.low %v2271_v42, %v2278_v10  ;;  %v11574_v42 = vld [vmem:[#allocation40_spill] sm:$0xff] }
 0x16a   :  { %11567 = vst [vmem:[#allocation77_spill] sm:$0xff] %v9551_v32  ;;  %11569 = vst [vmem:[#allocation37_spill] sm:$0xff] %v9563_v16  ;;  %v2264_v20 = vrot.slane %v11568_v15, %v8506_v35  ;;  %v2327_v38 = vrot.slane %v11572_v39, %v8497_v27  ;;  %v2334_v26 = vrot.slane %v11572_v39, %v8500_v28  ;;  %v11575_v16 = vld [vmem:[#allocation41_spill] sm:$0xff] }
 0x16b   :  { %11570 = vst [vmem:[#allocation78_spill] sm:$0xff] %v9565_v40  ;;  %11571 = vst [vmem:[#allocation79_spill] sm:$0xff] %v9567_v48  ;;  %v2341_v5 = vrot.slane %v11572_v39, %v8503_v30  ;;  %v2348_v54 = vrot.slane %v11572_v39, %v8506_v35  ;;  %v2299_v51 = vrot.slane %v11573_v47, %v8497_v27  ;;  %v9599_v41 = vpop.xlane.xlu1 %485 }
 0x16c   :  { %v2306_v50 = vrot.slane %v11573_v47, %v8500_v28  ;;  %v2313_v45 = vrot.slane %v11573_v47, %v8503_v30  ;;  %v2320_v37 = vrot.slane %v11573_v47, %v8506_v35  ;;  %v2383_v10 = vrot.slane %v11574_v42, %v8497_v27  ;;  %11576 = vst [vmem:[#allocation38_spill] sm:$0xff] %v9599_v41  ;;  %v9601_v47 = vpop.xlane.xlu0 %482 }
 0x16d   :  { %v2390_v31 = vrot.slane %v11574_v42, %v8500_v28  ;;  %v2397_v15 = vrot.slane %v11574_v42, %v8503_v30  ;;  %v2404_v39 = vrot.slane %v11574_v42, %v8506_v35  ;;  %v2355_v40 = vrot.slane %v11575_v16, %v8497_v27  ;;  %11577 = vst [vmem:[#allocation39_spill] sm:$0xff] %v9601_v47  ;;  %v11579_v47 = vld [vmem:[#allocation43_spill] sm:$0xff] }
 0x16e   :  { %v2362_v48 = vrot.slane %v11575_v16, %v8500_v28  ;;  %v2369_v29 = vrot.slane %v11575_v16, %v8503_v30  ;;  %v2376_v59 = vrot.slane %v11575_v16, %v8506_v35  ;;  %v2439_v52 = vrot.slane %v11578_v49, %v8497_v27 }
 0x16f   :  { %v2446_v42 = vrot.slane %v11578_v49, %v8500_v28  ;;  %v2453_v2 = vrot.slane %v11578_v49, %v8503_v30  ;;  %v2460_v41 = vrot.slane %v11578_v49, %v8506_v35  ;;  %v2411_v32 = vrot.slane %v11579_v47, %v8497_v27  ;;  %v9635_v61 = vpop.xlane.xlu1 %491 }
 0x170   :  { %v2418_v36 = vrot.slane %v11579_v47, %v8500_v28  ;;  %v2425_v16 = vrot.slane %v11579_v47, %v8503_v30  ;;  %v2432_v13 = vrot.slane %v11579_v47, %v8506_v35  ;;  %v5111_v62 = vrot.slane %v9525_v53, %v8541_v22  ;;  %11580 = vst [vmem:[#allocation40_spill] sm:$0xff] %v9635_v61  ;;  %v9637_v0 = vpop.xlane.xlu0 %488  ;;  %v11593_v61 = vld [vmem:[#allocation4_spill] sm:$0xff] }
 0x171   :  { %v5118_v58 = vrot.slane %v9527_v24, %v8541_v22  ;;  %v9627_v33 = vcombine.low %v2285_v21, %v2292_v1  ;;  %v9629_v49 = vcombine.low %v2243_v3, %v2250_v4  ;;  %v9631_v11 = vcombine.low %v2257_v60, %v2264_v20  ;;  %11581 = vst [vmem:[#allocation41_spill] sm:$0xff] %v9637_v0 }
 0x172   :  { %v9633_v17 = vcombine.low %v2327_v38, %v2334_v26  ;;  %v9639_v44 = vcombine.low %v2341_v5, %v2348_v54  ;;  %v9641_v47 = vcombine.low %v2299_v51, %v2306_v50  ;;  %v9643_v53 = vcombine.low %v2313_v45, %v2320_v37  ;;  %v11591_v26 = vld [vmem:[#allocation48_spill] sm:$0xff] }
 0x173   :  { %v9645_v63 = vcombine.low %v2383_v10, %v2390_v31  ;;  %v9647_v24 = vcombine.low %v2397_v15, %v2404_v39  ;;  %v9649_v21 = vcombine.low %v2355_v40, %v2362_v48  ;;  %v9651_v1 = vcombine.low %v2369_v29, %v2376_v59  ;;  %v11592_v10 = vld [vmem:[#allocation47_spill] sm:$0xff] }
 0x174   :  { %11582 = vst [vmem:[#allocation42_spill] sm:$0xff] %v9639_v44  ;;  %v9653_v3 = vcombine.low %v2439_v52, %v2446_v42  ;;  %v9655_v4 = vcombine.low %v2453_v2, %v2460_v41  ;;  %v9657_v60 = vcombine.low %v2411_v32, %v2418_v36  ;;  %v9659_v20 = vcombine.low %v2425_v16, %v2432_v13  ;;  %v498_v2 = vpop.xlane.xlu1 %497  ;;  %v495_v41 = vpop.xlane.xlu0 %494 }
 0x175   :  { %11583 = vst [vmem:[#allocation43_spill] sm:$0xff] %v9645_v63  ;;  %11584 = vst [vmem:[#allocation80_spill] sm:$0xff] %v9647_v24  ;;  %v9661_v38 = vcombine.low %v5111_v62, %v5118_v58  ;;  %v2523_v5 = vrot.slane %v11591_v26, %v8497_v27  ;;  %v2530_v54 = vrot.slane %v11591_v26, %v8500_v28 }
 0x176   :  { %11585 = vst [vmem:[#allocation81_spill] sm:$0xff] %v9649_v21  ;;  %11586 = vst [vmem:[#allocation82_spill] sm:$0xff] %v9651_v1  ;;  %v2537_v29 = vrot.slane %v11591_v26, %v8503_v30  ;;  %v2544_v52 = vrot.slane %v11591_v26, %v8506_v35  ;;  %v3839_v59 = vrot.slane %v498_v2, %v8497_v27 }
 0x177   :  { %11587 = vst [vmem:[#allocation83_spill] sm:$0xff] %v9653_v3  ;;  %11588 = vst [vmem:[#allocation84_spill] sm:$0xff] %v9655_v4  ;;  %v3846_v13 = vrot.slane %v498_v2, %v8500_v28  ;;  %v3853_v62 = vrot.slane %v498_v2, %v8503_v30  ;;  %v3860_v58 = vrot.slane %v498_v2, %v8506_v35 }
 0x178   :  { %11589 = vst [vmem:[#allocation85_spill] sm:$0xff] %v9657_v60  ;;  %11590 = vst [vmem:[#allocation86_spill] sm:$0xff] %v9659_v20  ;;  %v3811_v36 = vrot.slane %v495_v41, %v8497_v27  ;;  %v3818_v32 = vrot.slane %v495_v41, %v8500_v28  ;;  %v3825_v40 = vrot.slane %v495_v41, %v8503_v30  ;;  %v9687_v16 = vpop.xlane.xlu1 %503  ;;  %v501_v26 = vpop.xlane.xlu0 %500 }
 0x179   :  { %v3832_v48 = vrot.slane %v495_v41, %v8506_v35  ;;  %v6174_v51 = vcombine.low %v3839_v59, %v3846_v13  ;;  %v6175_v50 = vcombine.low %v3853_v62, %v3860_v58  ;;  %v4839_v45 = vrot.slane %v9173_v55, %v8541_v22 }
 0x17a   :  { %v4846_v37 = vrot.slane %v9175_v6, %v8541_v22  ;;  %v2551_v31 = vrot.slane %v11592_v10, %v8497_v27  ;;  %v2558_v15 = vrot.slane %v11592_v10, %v8500_v28  ;;  %v6157_v39 = vcombine.low %v3811_v36, %v3818_v32 }
 0x17b   :  { %v6158_v42 = vcombine.low %v3825_v40, %v3832_v48  ;;  %v2565_v2 = vrot.slane %v11592_v10, %v8503_v30  ;;  %v2572_v55 = vrot.slane %v11592_v10, %v8506_v35  ;;  %v5375_v41 = vcombine.low %v2523_v5, %v2530_v54 }
 0x17c   :  { %v5376_v59 = vcombine.low %v2537_v29, %v2544_v52  ;;  %v2971_v6 = vrot.slane %v9227_v7, %v8497_v27  ;;  %v2978_v13 = vrot.slane %v9227_v7, %v8500_v28  ;;  %v2985_v62 = vrot.slane %v9227_v7, %v8503_v30  ;;  %v9705_v54 = vpop.xlane.xlu1 %509  ;;  %v9711_v4 = vpop.xlane.xlu0 %506 }
 0x17d   :  { %v2992_v58 = vrot.slane %v9227_v7, %v8506_v35  ;;  %v3867_v36 = vrot.slane %v501_v26, %v8497_v27  ;;  %v3874_v32 = vrot.slane %v501_v26, %v8500_v28  ;;  %v6182_v40 = vrot.slane %v6174_v51, %v8541_v22 }
 0x17e   :  { %v6189_v5 = vrot.slane %v6175_v50, %v8541_v22  ;;  %v3881_v29 = vrot.slane %v501_v26, %v8503_v30  ;;  %v3888_v52 = vrot.slane %v501_v26, %v8506_v35  ;;  %v6165_v48 = vrot.slane %v6157_v39, %v8541_v22 }
 0x17f   :  { %v6172_v10 = vrot.slane %v6158_v42, %v8541_v22  ;;  %v3419_v7 = vrot.slane %v9449_v43, %v8497_v27  ;;  %v3426_v51 = vrot.slane %v9449_v43, %v8500_v28  ;;  %v3433_v50 = vrot.slane %v9449_v43, %v8503_v30 }
 0x180   :  { %v3440_v3 = vrot.slane %v9449_v43, %v8506_v35  ;;  %v5647_v20 = vcombine.low %v2971_v6, %v2978_v13  ;;  %v5648_v26 = vcombine.low %v2985_v62, %v2992_v58  ;;  %v6190_v60 = vcombine.low %v6182_v40, %v6189_v5  ;;  %v9731_v43 = vpop.xlane.xlu1 %515  ;;  %v9733_v6 = vpop.xlane.xlu0 %512 }
 0x181   :  { %v6173_v39 = vcombine.low %v6165_v48, %v6172_v10  ;;  %v9721_v0 = vcombine.low %v2551_v31, %v2558_v15  ;;  %v9723_v42 = vcombine.low %v2565_v2, %v2572_v55  ;;  %v2607_v24 = vrot.slane %v11593_v61, %v8497_v27 }
 0x182   :  { %v2614_v63 = vrot.slane %v11593_v61, %v8500_v28  ;;  %v2621_v1 = vrot.slane %v11593_v61, %v8503_v30  ;;  %v6191_v21 = vcombine.low %v3867_v36, %v3874_v32  ;;  %v6192_v44 = vcombine.low %v3881_v29, %v3888_v52  ;;  %6769 = vperm.xlu0 %7917, %v6190_v60   ;;  %v11594_v60 = vld [vmem:[#allocation5_spill] sm:$0xff] }
 0x183   :  { %6766 = vperm.xlu1 %7918, %v6173_v39   ;;  %v2628_v31 = vrot.slane %v11593_v61, %v8506_v35  ;;  %v5919_v15 = vcombine.low %v3419_v7, %v3426_v51  ;;  %v5920_v2 = vcombine.low %v3433_v50, %v3440_v3  ;;  %v4847_v55 = vcombine.low %v4839_v45, %v4846_v37 }
 0x184   :  { %v5655_v13 = vrot.slane %v5647_v20, %v8541_v22  ;;  %v5662_v62 = vrot.slane %v5648_v26, %v8541_v22  ;;  %v5383_v58 = vrot.slane %v5375_v41, %v8541_v22  ;;  %v5390_v36 = vrot.slane %v5376_v59, %v8541_v22  ;;  %v9752_v45 = vpop.xlane.xlu1 %521  ;;  %v9754_v37 = vpop.xlane.xlu0 %518 }
 0x185   :  { %v2579_v32 = vrot.slane %v11594_v60, %v8497_v27  ;;  %v2999_v40 = vrot.slane %v9225_v57, %v8497_v27  ;;  %v3006_v61 = vrot.slane %v9225_v57, %v8500_v28  ;;  %v3013_v3 = vrot.slane %v9225_v57, %v8503_v30 }
 0x186   :  { %v3020_v20 = vrot.slane %v9225_v57, %v8506_v35  ;;  %6580 = vperm.xlu0 %7917, %v9661_v38   ;;  %v6199_v41 = vrot.slane %v6191_v21, %v8541_v22  ;;  %v6206_v59 = vrot.slane %v6192_v44, %v8541_v22  ;;  %v2586_v5 = vrot.slane %v11594_v60, %v8500_v28 }
 0x187   :  { %6532 = vperm.xlu1 %7918, %v4847_v55   ;;  %v2593_v29 = vrot.slane %v11594_v60, %v8503_v30  ;;  %v5927_v52 = vrot.slane %v5919_v15, %v8541_v22  ;;  %v5934_v57 = vrot.slane %v5920_v2, %v8541_v22  ;;  %v2600_v38 = vrot.slane %v11594_v60, %v8506_v35 }
 0x188   :  { %v5663_v48 = vcombine.low %v5655_v13, %v5662_v62  ;;  %v5391_v10 = vcombine.low %v5383_v58, %v5390_v36  ;;  %v4856_v21 = vrot.slane %v9169_v46, %v8541_v22  ;;  %v5664_v7 = vcombine.low %v2999_v40, %v3006_v61  ;;  %v9776_v15 = vpop.xlane.xlu1 %527  ;;  %v9778_v46 = vpop.xlane.xlu0 %524 }
 0x189   :  { %v4863_v44 = vrot.slane %v9171_v23, %v8541_v22  ;;  %v5128_v51 = vrot.slane %v9521_v19, %v8541_v22  ;;  %v5135_v50 = vrot.slane %v9523_v18, %v8541_v22  ;;  %v5665_v26 = vcombine.low %v3013_v3, %v3020_v20  ;;  %v11595_v3 = vld [vmem:[#allocation7_spill] sm:$0xff] }
 0x18a   :  { %v3447_v39 = vrot.slane %v9447_v34, %v8497_v27  ;;  %6676 = vperm.xlu0 %7917, %v5663_v48   ;;  %v6207_v2 = vcombine.low %v6199_v41, %v6206_v59  ;;  %v3454_v23 = vrot.slane %v9447_v34, %v8500_v28  ;;  %v3461_v19 = vrot.slane %v9447_v34, %v8503_v30 }
 0x18b   :  { %6628 = vperm.xlu1 %7918, %v5391_v10   ;;  %v3468_v18 = vrot.slane %v9447_v34, %v8506_v35  ;;  %v5935_v55 = vcombine.low %v5927_v52, %v5934_v57  ;;  %v3895_v13 = vrot.slane %v9687_v16, %v8497_v27  ;;  %v3902_v62 = vrot.slane %v9687_v16, %v8500_v28 }
 0x18c   :  { %v3909_v58 = vrot.slane %v9687_v16, %v8503_v30  ;;  %v3916_v36 = vrot.slane %v9687_v16, %v8506_v35  ;;  %v9794_v60 = vcombine.low %v2607_v24, %v2614_v63  ;;  %v9796_v40 = vcombine.low %v2621_v1, %v2628_v31  ;;  %v9804_v41 = vpop.xlane.xlu1 %533  ;;  %v9806_v59 = vpop.xlane.xlu0 %530 }
 0x18d   :  { %v9798_v61 = vcombine.low %v2579_v32, %v2586_v5  ;;  %v9800_v34 = vcombine.low %v2593_v29, %v2600_v38  ;;  %v2663_v20 = vrot.slane %v11595_v3, %v8497_v27  ;;  %v5400_v16 = vrot.slane %v9721_v0, %v8541_v22 }
 0x18e   :  { %6772 = vperm.xlu0 %7917, %v6207_v2   ;;  %v5407_v63 = vrot.slane %v9723_v42, %v8541_v22  ;;  %v4864_v24 = vcombine.low %v4856_v21, %v4863_v44  ;;  %v5136_v1 = vcombine.low %v5128_v51, %v5135_v50  ;;  %v5672_v31 = vrot.slane %v5664_v7, %v8541_v22  ;;  %v11596_v42 = vld [vmem:[#allocation51_spill] sm:$0xff] }
 0x18f   :  { %6724 = vperm.xlu1 %7918, %v5935_v55   ;;  %v5679_v32 = vrot.slane %v5665_v26, %v8541_v22  ;;  %v5936_v5 = vcombine.low %v3447_v39, %v3454_v23  ;;  %v5937_v29 = vcombine.low %v3461_v19, %v3468_v18  ;;  %v6208_v52 = vcombine.low %v3895_v13, %v3902_v62 }
 0x190   :  { %v6209_v57 = vcombine.low %v3909_v58, %v3916_v36  ;;  %v2670_v38 = vrot.slane %v11595_v3, %v8500_v28  ;;  %v2684_v0 = vrot.slane %v11595_v3, %v8506_v35  ;;  %v3027_v21 = vrot.slane %v9257_v8, %v8497_v27  ;;  %v9826_v44 = vpop.xlane.xlu1 %539  ;;  %v9834_v23 = vpop.xlane.xlu0 %536 }
 0x191   :  { %v3034_v7 = vrot.slane %v9257_v8, %v8500_v28  ;;  %v5408_v51 = vcombine.low %v5400_v16, %v5407_v63  ;;  %v3041_v50 = vrot.slane %v9257_v8, %v8503_v30  ;;  %v3048_v26 = vrot.slane %v9257_v8, %v8506_v35 }
 0x192   :  { %6583 = vperm.xlu0 %7917, %v5136_v1   ;;  %v3475_v39 = vrot.slane %v9473_v9, %v8497_v27  ;;  %v5680_v2 = vcombine.low %v5672_v31, %v5679_v32  ;;  %v5944_v19 = vrot.slane %v5936_v5, %v8541_v22  ;;  %v5951_v18 = vrot.slane %v5937_v29, %v8541_v22 }
 0x193   :  { %6535 = vperm.xlu1 %7918, %v4864_v24   ;;  %v6216_v55 = vrot.slane %v6208_v52, %v8541_v22  ;;  %v6223_v13 = vrot.slane %v6209_v57, %v8541_v22  ;;  %v3482_v62 = vrot.slane %v9473_v9, %v8500_v28  ;;  %v3489_v8 = vrot.slane %v9473_v9, %v8503_v30 }
 0x194   :  { %v3496_v58 = vrot.slane %v9473_v9, %v8506_v35  ;;  %v3923_v36 = vrot.slane %v9711_v4, %v8497_v27  ;;  %v3930_v16 = vrot.slane %v9711_v4, %v8500_v28  ;;  %v3937_v63 = vrot.slane %v9711_v4, %v8503_v30  ;;  %v9854_v1 = vpop.permute.xlu1 %6433 }
 0x195   :  { %v3944_v24 = vrot.slane %v9711_v4, %v8506_v35  ;;  %11597 = vst [vmem:[#allocation48_spill] sm:$0xff] %v9854_v1  ;;  %v4873_v31 = vrot.slane %v9189_v14, %v8541_v22  ;;  %v4880_v9 = vrot.slane %v9191_v56, %v8541_v22  ;;  %v5145_v32 = vrot.slane %v9541_v12, %v8541_v22 }
 0x196   :  { %6679 = vperm.xlu0 %7917, %v5680_v2   ;;  %v5152_v5 = vrot.slane %v9543_v25, %v8541_v22  ;;  %v5681_v29 = vcombine.low %v3027_v21, %v3034_v7  ;;  %v5682_v52 = vcombine.low %v3041_v50, %v3048_v26  ;;  %v5952_v57 = vcombine.low %v5944_v19, %v5951_v18  ;;  %v9872_v21 = vpop.permute.xlu0 %6430  ;;  %v11600_v7 = vld [vmem:[#allocation20_spill] sm:$0xff] }
 0x197   :  { %6631 = vperm.xlu1 %7918, %v5408_v51   ;;  %v6224_v4 = vcombine.low %v6216_v55, %v6223_v13  ;;  %v2642_v51 = vrot.slane %v11596_v42, %v8500_v28  ;;  %v5953_v56 = vcombine.low %v3475_v39, %v3482_v62  ;;  %v5954_v10 = vcombine.low %v3489_v8, %v3496_v58 }
 0x198   :  { %v6225_v48 = vcombine.low %v3923_v36, %v3930_v16  ;;  %v6226_v12 = vcombine.low %v3937_v63, %v3944_v24  ;;  %v9870_v25 = vpop.permute.xlu1 %6436  ;;  %11599 = vst [vmem:[#allocation4_spill] sm:$0xff] %v9872_v21  ;;  %v3055_v50 = vrot.slane %v11600_v7, %v8497_v27  ;;  %v3062_v26 = vrot.slane %v11600_v7, %v8500_v28 }
 0x199   :  { %11598 = vst [vmem:[#allocation47_spill] sm:$0xff] %v9870_v25  ;;  %v4881_v19 = vcombine.low %v4873_v31, %v4880_v9  ;;  %v5153_v18 = vcombine.low %v5145_v32, %v5152_v5  ;;  %v5417_v39 = vrot.slane %v9798_v61, %v8541_v22  ;;  %v5424_v55 = vrot.slane %v9800_v34, %v8541_v22  ;;  %v11605_v5 = vld [vmem:[#allocation9_spill] sm:$0xff] }
 0x19a   :  { %6775 = vperm.xlu0 %7917, %v6224_v4   ;;  %v5689_v13 = vrot.slane %v5681_v29, %v8541_v22  ;;  %v5696_v62 = vrot.slane %v5682_v52, %v8541_v22  ;;  %v9887_v8 = vcombine.low %v2663_v20, %v2670_v38  ;;  %v3069_v58 = vrot.slane %v11600_v7, %v8503_v30  ;;  %v9896_v16 = vpop.permute.xlu0 %6457 }
 0x19b   :  { %6727 = vperm.xlu1 %7918, %v5952_v57   ;;  %v3076_v36 = vrot.slane %v11600_v7, %v8506_v35  ;;  %v5961_v61 = vrot.slane %v5953_v56, %v8541_v22  ;;  %11602 = vst [vmem:[#allocation7_spill] sm:$0xff] %v9896_v16  ;;  %v5968_v63 = vrot.slane %v5954_v10, %v8541_v22 }
 0x19c   :  { %v9894_v34 = vpop.permute.xlu1 %6439  ;;  %v6233_v24 = vrot.slane %v6225_v48, %v8541_v22  ;;  %v6240_v20 = vrot.slane %v6226_v12, %v8541_v22  ;;  %v11603_v38 = vrot.slane %v11595_v3, %v8503_v30  ;;  %v11604_v9 = vrot.slane %v11596_v42, %v8497_v27 }
 0x19d   :  { %11601 = vst [vmem:[#allocation5_spill] sm:$0xff] %v9894_v34  ;;  %v2719_v10 = vrot.slane %v11605_v5, %v8497_v27  ;;  %v2726_v48 = vrot.slane %v11605_v5, %v8500_v28  ;;  %v2733_v29 = vrot.slane %v11605_v5, %v8503_v30  ;;  %v5698_v52 = vcombine.low %v3055_v50, %v3062_v26 }
 0x19e   :  { %6586 = vperm.xlu0 %7917, %v5153_v18   ;;  %v9907_v31 = vcombine.low %v11603_v38, %v2684_v0  ;;  %v9912_v32 = vcombine.low %v11604_v9, %v2642_v51  ;;  %v5425_v57 = vcombine.low %v5417_v39, %v5424_v55  ;;  %v5697_v4 = vcombine.low %v5689_v13, %v5696_v62  ;;  %v11606_v0 = vld [vmem:[#allocation30_spill] sm:$0xff]  ;;  %v9930_v50 = vpop.permute.xlu0 %6463  ;;  %v11609_v39 = vld [vmem:[#allocation16_spill] sm:$0xff] }
 0x19f   :  { %6538 = vperm.xlu1 %7918, %v4881_v19   ;;  %v5699_v3 = vcombine.low %v3069_v58, %v3076_v36  ;;  %v3503_v56 = vrot.slane %v11606_v0, %v8497_v27  ;;  %v3510_v51 = vrot.slane %v11606_v0, %v8500_v28  ;;  %v3517_v12 = vrot.slane %v11606_v0, %v8503_v30  ;;  %v11610_v13 = vld [vmem:[#allocation62_spill] sm:$0xff]  ;;  %v11611_v58 = vld [vmem:[#allocation35_spill] sm:$0xff] }
 0x1a0   :  { %v3524_v7 = vrot.slane %v11606_v0, %v8506_v35  ;;  %v9928_v19 = vpop.permute.xlu1 %6442  ;;  %11608 = vst [vmem:[#allocation20_spill] sm:$0xff] %v9930_v50  ;;  %v5969_v26 = vcombine.low %v5961_v61, %v5968_v63  ;;  %v6241_v18 = vcombine.low %v6233_v24, %v6240_v20  ;;  %v4890_v55 = vrot.slane %v11609_v39, %v8541_v22  ;;  %v11612_v38 = vld [vmem:[#allocation74_spill] sm:$0xff] }
 0x1a1   :  { %11607 = vst [vmem:[#allocation51_spill] sm:$0xff] %v9928_v19  ;;  %v4897_v62 = vrot.slane %v11610_v13, %v8541_v22  ;;  %v5162_v36 = vrot.slane %v11611_v58, %v8541_v22  ;;  %v5169_v9 = vrot.slane %v11612_v38, %v8541_v22  ;;  %v3965_v61 = vrot.slane %v9705_v54, %v8503_v30  ;;  %v11613_v20 = vld [vmem:[#allocation54_spill] sm:$0xff] }
 0x1a2   :  { %6682 = vperm.xlu0 %7917, %v5697_v4   ;;  %v3958_v4 = vrot.slane %v9705_v54, %v8500_v28  ;;  %v3972_v63 = vrot.slane %v9705_v54, %v8506_v35  ;;  %v2740_v24 = vrot.slane %v11605_v5, %v8506_v35  ;;  %v2691_v0 = vrot.slane %v11613_v20, %v8497_v27  ;;  %v11614_v13 = vld [vmem:[#allocation66_spill] sm:$0xff]  ;;  %v9960_v50 = vpop.permute.xlu0 %6469 }
 0x1a3   :  { %6634 = vperm.xlu1 %7918, %v5425_v57   ;;  %v3951_v57 = vrot.slane %v9705_v54, %v8497_v27  ;;  %v2698_v39 = vrot.slane %v11613_v20, %v8500_v28  ;;  %v3083_v58 = vrot.slane %v11614_v13, %v8497_v27  ;;  %v3090_v38 = vrot.slane %v11614_v13, %v8500_v28 }
 0x1a4   :  { %v5970_v2 = vcombine.low %v3503_v56, %v3510_v51  ;;  %v5971_v14 = vcombine.low %v3517_v12, %v3524_v7  ;;  %v9958_v54 = vpop.permute.xlu1 %6445  ;;  %11616 = vst [vmem:[#allocation30_spill] sm:$0xff] %v9960_v50  ;;  %v4898_v5 = vcombine.low %v4890_v55, %v4897_v62  ;;  %v5170_v16 = vcombine.low %v5162_v36, %v5169_v9 }
 0x1a5   :  { %11615 = vst [vmem:[#allocation9_spill] sm:$0xff] %v9958_v54  ;;  %v5434_v19 = vrot.slane %v9794_v60, %v8541_v22  ;;  %v5441_v34 = vrot.slane %v9796_v40, %v8541_v22  ;;  %v6242_v25 = vcombine.low %v3951_v57, %v3958_v4  ;;  %v6243_v1 = vcombine.low %v3965_v61, %v3972_v63 }
 0x1a6   :  { %6778 = vperm.xlu0 %7917, %v6241_v18   ;;  %v5706_v21 = vrot.slane %v5698_v52, %v8541_v22  ;;  %v5713_v56 = vrot.slane %v5699_v3, %v8541_v22  ;;  %v11617_v51 = vrot.slane %v11596_v42, %v8506_v35  ;;  %v11618_v12 = vrot.slane %v11596_v42, %v8503_v30  ;;  %v9990_v55 = vpop.permute.xlu0 %6475 }
 0x1a7   :  { %6730 = vperm.xlu1 %7918, %v5969_v26   ;;  %v2705_v60 = vrot.slane %v11613_v20, %v8503_v30  ;;  %v3097_v40 = vrot.slane %v11614_v13, %v8503_v30  ;;  %v3104_v26 = vrot.slane %v11614_v13, %v8506_v35  ;;  %v9982_v52 = vcombine.low %v2719_v10, %v2726_v48 }
 0x1a8   :  { %v9974_v7 = vcombine.low %v11618_v12, %v11617_v51  ;;  %v9984_v3 = vcombine.low %v2733_v29, %v2740_v24  ;;  %v2712_v18 = vrot.slane %v11613_v20, %v8506_v35  ;;  %v9988_v42 = vpop.permute.xlu1 %6448  ;;  %11620 = vst [vmem:[#allocation62_spill] sm:$0xff] %v9990_v55  ;;  %v9992_v62 = vcombine.low %v2691_v0, %v2698_v39  ;;  %v11624_v39 = vld [vmem:[#allocation28_spill] sm:$0xff]  ;;  %v11627_v12 = vld [vmem:[#allocation77_spill] sm:$0xff] }
 0x1a9   :  { %11619 = vst [vmem:[#allocation16_spill] sm:$0xff] %v9988_v42  ;;  %v5715_v36 = vcombine.low %v3083_v58, %v3090_v38  ;;  %v5978_v9 = vrot.slane %v5970_v2, %v8541_v22  ;;  %v5985_v57 = vrot.slane %v5971_v14, %v8541_v22  ;;  %v5442_v10 = vcombine.low %v5434_v19, %v5441_v34  ;;  %v11625_v38 = vld [vmem:[#allocation63_spill] sm:$0xff] }
 0x1aa   :  { %6589 = vperm.xlu0 %7917, %v5170_v16   ;;  %v5714_v48 = vcombine.low %v5706_v21, %v5713_v56  ;;  %v6250_v29 = vrot.slane %v6242_v25, %v8541_v22  ;;  %v6257_v4 = vrot.slane %v6243_v1, %v8541_v22  ;;  %v5716_v61 = vcombine.low %v3097_v40, %v3104_v26  ;;  %v11621_v16 = vld [vmem:[#allocation32_spill] sm:$0xff]  ;;  %v10012_v21 = vpop.permute.xlu0 %6481 }
 0x1ab   :  { %6541 = vperm.xlu1 %7918, %v4898_v5   ;;  %v3531_v63 = vrot.slane %v11621_v16, %v8497_v27  ;;  %v3538_v24 = vrot.slane %v11621_v16, %v8500_v28  ;;  %v3545_v20 = vrot.slane %v11621_v16, %v8503_v30  ;;  %v3552_v2 = vrot.slane %v11621_v16, %v8506_v35  ;;  %v11626_v56 = vld [vmem:[#allocation76_spill] sm:$0xff] }
 0x1ac   :  { %v3979_v14 = vrot.slane %v9733_v6, %v8497_v27  ;;  %v3986_v25 = vrot.slane %v9733_v6, %v8500_v28  ;;  %v10010_v1 = vpop.permute.xlu1 %6451  ;;  %11623 = vst [vmem:[#allocation74_spill] sm:$0xff] %v10012_v21  ;;  %v3993_v34 = vrot.slane %v9733_v6, %v8503_v30  ;;  %v4000_v19 = vrot.slane %v9733_v6, %v8506_v35 }
 0x1ad   :  { %11622 = vst [vmem:[#allocation35_spill] sm:$0xff] %v10010_v1  ;;  %v5986_v0 = vcombine.low %v5978_v9, %v5985_v57  ;;  %v4907_v13 = vrot.slane %v11624_v39, %v8541_v22  ;;  %v6258_v58 = vcombine.low %v6250_v29, %v6257_v4  ;;  %v4914_v5 = vrot.slane %v11625_v38, %v8541_v22  ;;  %v11629_v9 = vld [vmem:[#allocation65_spill] sm:$0xff] }
 0x1ae   :  { %6685 = vperm.xlu0 %7917, %v5714_v48   ;;  %v5179_v51 = vrot.slane %v11626_v56, %v8541_v22  ;;  %v5186_v40 = vrot.slane %v11627_v12, %v8541_v22  ;;  %v10026_v26 = vcombine.low %v2705_v60, %v2712_v18  ;;  %v3111_v57 = vrot.slane %v11629_v9, %v8497_v27  ;;  %v10042_v12 = vpop.permute.xlu0 %6487 }
 0x1af   :  { %6637 = vperm.xlu1 %7918, %v5442_v10   ;;  %v11628_v10 = vld [vmem:[#allocation11_spill] sm:$0xff]  ;;  %v3118_v29 = vrot.slane %v11629_v9, %v8500_v28  ;;  %v5987_v4 = vcombine.low %v3531_v63, %v3538_v24  ;;  %v5988_v16 = vcombine.low %v3545_v20, %v3552_v2  ;;  %v6259_v60 = vcombine.low %v3979_v14, %v3986_v25  ;;  %v11632_v2 = vld [vmem:[#allocation12_spill] sm:$0xff] }
 0x1b0   :  { %v2775_v48 = vrot.slane %v11628_v10, %v8497_v27  ;;  %v2782_v6 = vrot.slane %v11628_v10, %v8500_v28  ;;  %v10036_v39 = vpop.permute.xlu1 %6454  ;;  %v6260_v18 = vcombine.low %v3993_v34, %v4000_v19  ;;  %v5451_v38 = vrot.slane %v9912_v32, %v8541_v22  ;;  %11631 = vst [vmem:[#allocation66_spill] sm:$0xff] %v10042_v12 }
 0x1b1   :  { %11630 = vst [vmem:[#allocation54_spill] sm:$0xff] %v10036_v39  ;;  %v5458_v56 = vrot.slane %v9974_v7, %v8541_v22  ;;  %v4915_v55 = vcombine.low %v4907_v13, %v4914_v5  ;;  %v5187_v50 = vcombine.low %v5179_v51, %v5186_v40  ;;  %v5723_v1 = vrot.slane %v5715_v36, %v8541_v22 }
 0x1b2   :  { %6781 = vperm.xlu0 %7917, %v6258_v58   ;;  %v5730_v63 = vrot.slane %v5716_v61, %v8541_v22  ;;  %v2789_v24 = vrot.slane %v11628_v10, %v8503_v30  ;;  %v2796_v20 = vrot.slane %v11628_v10, %v8506_v35  ;;  %v3125_v32 = vrot.slane %v11629_v9, %v8503_v30 }
 0x1b3   :  { %6733 = vperm.xlu1 %7918, %v5986_v0   ;;  %v3132_v7 = vrot.slane %v11629_v9, %v8506_v35  ;;  %v2747_v14 = vrot.slane %v11632_v2, %v8497_v27  ;;  %v2754_v36 = vrot.slane %v11632_v2, %v8500_v28  ;;  %v2761_v61 = vrot.slane %v11632_v2, %v8503_v30 }
 0x1b4   :  { %v10060_v25 = vpop.permute.xlu1 %6460  ;;  %v2768_v34 = vrot.slane %v11632_v2, %v8506_v35  ;;  %v5732_v19 = vcombine.low %v3111_v57, %v3118_v29  ;;  %v5459_v0 = vcombine.low %v5451_v38, %v5458_v56  ;;  %v5995_v13 = vrot.slane %v5987_v4, %v8541_v22  ;;  %v11637_v56 = vld [vmem:[#allocation18_spill] sm:$0xff] }
 0x1b5   :  { %11633 = vst [vmem:[#allocation32_spill] sm:$0xff] %v10060_v25  ;;  %v5731_v58 = vcombine.low %v5723_v1, %v5730_v63  ;;  %v6002_v5 = vrot.slane %v5988_v16, %v8541_v22  ;;  %v6267_v51 = vrot.slane %v6259_v60, %v8541_v22  ;;  %v6274_v40 = vrot.slane %v6260_v18, %v8541_v22  ;;  %v10080_v16 = vpop.permute.xlu0 %6493 }
 0x1b6   :  { %6592 = vperm.xlu0 %7917, %v5187_v50   ;;  %v5733_v10 = vcombine.low %v3125_v32, %v3132_v7  ;;  %v4007_v1 = vrot.slane %v9731_v43, %v8497_v27  ;;  %v4014_v4 = vrot.slane %v9731_v43, %v8500_v28  ;;  %11635 = vst [vmem:[#allocation28_spill] sm:$0xff] %v10080_v16  ;;  %v11638_v32 = vld [vmem:[#allocation19_spill] sm:$0xff]  ;;  %v11639_v16 = vld [vmem:[#allocation36_spill] sm:$0xff] }
 0x1b7   :  { %6544 = vperm.xlu1 %7918, %v4915_v55   ;;  %v11634_v55 = vld [vmem:[#allocation31_spill] sm:$0xff]  ;;  %v4021_v18 = vrot.slane %v9731_v43, %v8503_v30  ;;  %v4028_v38 = vrot.slane %v9731_v43, %v8506_v35  ;;  %v4924_v63 = vrot.slane %v11637_v56, %v8541_v22  ;;  %v4931_v7 = vrot.slane %v11638_v32, %v8541_v22  ;;  %v11641_v43 = vld [vmem:[#allocation46_spill] sm:$0xff] }
 0x1b8   :  { %v3559_v50 = vrot.slane %v11634_v55, %v8497_v27  ;;  %v3566_v9 = vrot.slane %v11634_v55, %v8500_v28  ;;  %v3573_v57 = vrot.slane %v11634_v55, %v8503_v30  ;;  %v3580_v29 = vrot.slane %v11634_v55, %v8506_v35  ;;  %v10082_v60 = vpop.permute.xlu1 %6466 }
 0x1b9   :  { %11636 = vst [vmem:[#allocation63_spill] sm:$0xff] %v10082_v60  ;;  %v6003_v2 = vcombine.low %v5995_v13, %v6002_v5  ;;  %v6275_v55 = vcombine.low %v6267_v51, %v6274_v40  ;;  %v10096_v25 = vcombine.low %v2775_v48, %v2782_v6  ;;  %v10098_v12 = vcombine.low %v2789_v24, %v2796_v20  ;;  %v10110_v24 = vpop.permute.xlu0 %6499 }
 0x1ba   :  { %6688 = vperm.xlu0 %7917, %v5731_v58   ;;  %v11640_v58 = vld [vmem:[#allocation75_spill] sm:$0xff]  ;;  %v10100_v39 = vcombine.low %v2747_v14, %v2754_v36  ;;  %v3139_v56 = vrot.slane %v11641_v43, %v8497_v27  ;;  %v3146_v32 = vrot.slane %v11641_v43, %v8500_v28  ;;  %v6004_v13 = vcombine.low %v3559_v50, %v3566_v9 }
 0x1bb   :  { %6640 = vperm.xlu1 %7918, %v5459_v0   ;;  %v5196_v0 = vrot.slane %v11639_v16, %v8541_v22  ;;  %v5203_v60 = vrot.slane %v11640_v58, %v8541_v22  ;;  %v6005_v5 = vcombine.low %v3573_v57, %v3580_v29  ;;  %v6276_v40 = vcombine.low %v4007_v1, %v4014_v4  ;;  %v11644_v57 = vld [vmem:[#allocation13_spill] sm:$0xff]  ;;  %v11647_v58 = vld [vmem:[#allocation34_spill] sm:$0xff] }
 0x1bc   :  { %v10106_v51 = vpop.permute.xlu1 %6472  ;;  %v6277_v16 = vcombine.low %v4021_v18, %v4028_v38  ;;  %v4932_v48 = vcombine.low %v4924_v63, %v4931_v7  ;;  %v5468_v6 = vrot.slane %v9887_v8, %v8541_v22  ;;  %11643 = vst [vmem:[#allocation77_spill] sm:$0xff] %v10110_v24  ;;  %v5475_v14 = vrot.slane %v9907_v31, %v8541_v22 }
 0x1bd   :  { %11642 = vst [vmem:[#allocation76_spill] sm:$0xff] %v10106_v51  ;;  %v5204_v20 = vcombine.low %v5196_v0, %v5203_v60  ;;  %v5740_v36 = vrot.slane %v5732_v19, %v8541_v22  ;;  %v5747_v50 = vrot.slane %v5733_v10, %v8541_v22  ;;  %v10116_v9 = vcombine.low %v2761_v61, %v2768_v34  ;;  %v11646_v34 = vld [vmem:[#allocation61_spill] sm:$0xff] }
 0x1be   :  { %6784 = vperm.xlu0 %7917, %v6275_v55   ;;  %v2831_v29 = vrot.slane %v11644_v57, %v8497_v27  ;;  %v3153_v1 = vrot.slane %v11641_v43, %v8503_v30  ;;  %v3160_v8 = vrot.slane %v11641_v43, %v8506_v35  ;;  %v2838_v4 = vrot.slane %v11644_v57, %v8500_v28 }
 0x1bf   :  { %6736 = vperm.xlu1 %7918, %v6003_v2   ;;  %v2845_v31 = vrot.slane %v11644_v57, %v8503_v30  ;;  %v2852_v19 = vrot.slane %v11644_v57, %v8506_v35  ;;  %v2803_v10 = vrot.slane %v11646_v34, %v8497_v27  ;;  %v5749_v60 = vcombine.low %v3139_v56, %v3146_v32 }
 0x1c0   :  { %v10130_v61 = vpop.permute.xlu1 %6478  ;;  %v6012_v18 = vrot.slane %v6004_v13, %v8541_v22  ;;  %v6019_v38 = vrot.slane %v6005_v5, %v8541_v22  ;;  %v5476_v63 = vcombine.low %v5468_v6, %v5475_v14  ;;  %v5748_v7 = vcombine.low %v5740_v36, %v5747_v50  ;;  %v11650_v36 = vld [vmem:[#allocation22_spill] sm:$0xff] }
 0x1c1   :  { %11645 = vst [vmem:[#allocation11_spill] sm:$0xff] %v10130_v61  ;;  %v6284_v2 = vrot.slane %v6276_v40, %v8541_v22  ;;  %v6291_v55 = vrot.slane %v6277_v16, %v8541_v22  ;;  %v5750_v0 = vcombine.low %v3153_v1, %v3160_v8  ;;  %v3587_v43 = vrot.slane %v11647_v58, %v8497_v27  ;;  %v10150_v40 = vpop.permute.xlu0 %6505  ;;  %v11651_v1 = vld [vmem:[#allocation23_spill] sm:$0xff] }
 0x1c2   :  { %6595 = vperm.xlu0 %7917, %v5204_v20   ;;  %v3601_v56 = vrot.slane %v11647_v58, %v8503_v30  ;;  %v3608_v32 = vrot.slane %v11647_v58, %v8506_v35  ;;  %v4035_v13 = vrot.slane %v9754_v37, %v8497_v27  ;;  %v4042_v5 = vrot.slane %v9754_v37, %v8500_v28 }
 0x1c3   :  { %6547 = vperm.xlu1 %7918, %v4932_v48   ;;  %v3594_v48 = vrot.slane %v11647_v58, %v8500_v28  ;;  %11648 = vst [vmem:[#allocation65_spill] sm:$0xff] %v10150_v40  ;;  %v4049_v6 = vrot.slane %v9754_v37, %v8503_v30  ;;  %v4056_v20 = vrot.slane %v9754_v37, %v8506_v35 }
 0x1c4   :  { %v10152_v16 = vpop.permute.xlu1 %6484  ;;  %v6020_v14 = vcombine.low %v6012_v18, %v6019_v38  ;;  %v4941_v50 = vrot.slane %v11650_v36, %v8541_v22  ;;  %v6292_v57 = vcombine.low %v6284_v2, %v6291_v55  ;;  %v4948_v8 = vrot.slane %v11651_v1, %v8541_v22  ;;  %v11652_v38 = vld [vmem:[#allocation45_spill] sm:$0xff] }
 0x1c5   :  { %11649 = vst [vmem:[#allocation12_spill] sm:$0xff] %v10152_v16  ;;  %v2810_v58 = vrot.slane %v11646_v34, %v8500_v28  ;;  %v2817_v37 = vrot.slane %v11646_v34, %v8503_v30  ;;  %v2824_v18 = vrot.slane %v11646_v34, %v8506_v35  ;;  %v3167_v2 = vrot.slane %v11652_v38, %v8497_v27  ;;  %v10182_v24 = vpop.permute.xlu0 %6511 }
 0x1c6   :  { %6691 = vperm.xlu0 %7917, %v5748_v7   ;;  %v5220_v7 = vrot.slane %v9631_v11, %v8541_v22  ;;  %v3174_v55 = vrot.slane %v11652_v38, %v8500_v28  ;;  %v6021_v36 = vcombine.low %v3587_v43, %v3594_v48  ;;  %v6293_v1 = vcombine.low %v4035_v13, %v4042_v5 }
 0x1c7   :  { %6643 = vperm.xlu1 %7918, %v5476_v63   ;;  %v5213_v63 = vrot.slane %v9629_v49, %v8541_v22  ;;  %v6022_v49 = vcombine.low %v3601_v56, %v3608_v32  ;;  %v6294_v40 = vcombine.low %v4049_v6, %v4056_v20  ;;  %v5485_v51 = vrot.slane %v9992_v62, %v8541_v22 }
 0x1c8   :  { %v10176_v11 = vpop.permute.xlu1 %6490  ;;  %v5492_v34 = vrot.slane %v10026_v26, %v8541_v22  ;;  %11654 = vst [vmem:[#allocation18_spill] sm:$0xff] %v10182_v24  ;;  %v4949_v21 = vcombine.low %v4941_v50, %v4948_v8  ;;  %v5757_v16 = vrot.slane %v5749_v60, %v8541_v22  ;;  %v5764_v43 = vrot.slane %v5750_v0, %v8541_v22 }
 0x1c9   :  { %11653 = vst [vmem:[#allocation31_spill] sm:$0xff] %v10176_v11  ;;  %v5221_v42 = vcombine.low %v5213_v63, %v5220_v7  ;;  %v10186_v48 = vcombine.low %v2831_v29, %v2838_v4  ;;  %v3181_v56 = vrot.slane %v11652_v38, %v8503_v30  ;;  %v3188_v32 = vrot.slane %v11652_v38, %v8506_v35  ;;  %v11657_v4 = vld [vmem:[#allocation17_spill] sm:$0xff] }
 0x1ca   :  { %6787 = vperm.xlu0 %7917, %v6292_v57   ;;  %v11655_v62 = vlaneseq  ;;  %v10195_v26 = vcombine.low %v2845_v31, %v2852_v19  ;;  %v10197_v5 = vcombine.low %v2803_v10, %v2810_v58  ;;  %v10199_v6 = vcombine.low %v2817_v37, %v2824_v18  ;;  %v11660_v38 = vld [vmem:[#allocation21_spill] sm:$0xff] }
 0x1cb   :  { %6739 = vperm.xlu1 %7918, %v6020_v14   ;;  %v10203_v29 = vcombine.low %v3167_v2, %v3174_v55  ;;  %v5493_v20 = vcombine.low %v5485_v51, %v5492_v34  ;;  %v6029_v14 = vrot.slane %v6021_v36, %v8541_v22  ;;  %v5765_v50 = vcombine.low %v5757_v16, %v5764_v43  ;;  %v11661_v55 = vld [vmem:[#allocation64_spill] sm:$0xff]  ;;  %v11662_v34 = vld [vmem:[#allocation79_spill] sm:$0xff] }
 0x1cc   :  { %v10193_v13 = vand.u32 127, %v11655_v62  ;;  %v10201_v60 = vpop.permute.xlu1 %6496  ;;  %v6036_v31 = vrot.slane %v6022_v49, %v8541_v22  ;;  %v6301_v19 = vrot.slane %v6293_v1, %v8541_v22  ;;  %v6308_v10 = vrot.slane %v6294_v40, %v8541_v22  ;;  %v10225_v40 = vpop.permute.xlu0 %6529 }
 0x1cd   :  { %11656 = vst [vmem:[#allocation19_spill] sm:$0xff] %v10201_v60  ;;  %v4063_v16 = vrot.slane %v9752_v45, %v8497_v27  ;;  %v4070_v7 = vrot.slane %v9752_v45, %v8500_v28  ;;  %v4077_v37 = vrot.slane %v9752_v45, %v8503_v30  ;;  %v4084_v18 = vrot.slane %v9752_v45, %v8506_v35 }
 0x1ce   :  { %6598 = vperm.xlu0 %7917, %v5221_v42   ;;  %v10207_v0 = vsub.s32 %v10193_v13, %v11657_v4  ;;  %v11658_v42 = vld [vmem:[#allocation33_spill] sm:$0xff]  ;;  %v4958_v2 = vrot.slane %v11660_v38, %v8541_v22  ;;  %v4965_v36 = vrot.slane %v11661_v55, %v8541_v22  ;;  %v6037_v49 = vcombine.low %v6029_v14, %v6036_v31  ;;  %v11664_v14 = vld [vmem:[#allocation15_spill] sm:$0xff] }
 0x1cf   :  { %6550 = vperm.xlu1 %7918, %v4949_v21   ;;  %v5767_v21 = vcombine.low %v3181_v56, %v3188_v32  ;;  %v3615_v57 = vrot.slane %v11658_v42, %v8497_v27  ;;  %v3622_v8 = vrot.slane %v11658_v42, %v8500_v28  ;;  %v3629_v63 = vrot.slane %v11658_v42, %v8503_v30  ;;  %v11663_v32 = vld [vmem:[#allocation14_spill] sm:$0xff] }
 0x1d0   :  { %v3636_v51 = vrot.slane %v11658_v42, %v8506_v35  ;;  %v10227_v58 = vpop.permute.xlu1 %6502  ;;  %v6309_v1 = vcombine.low %v6301_v19, %v6308_v10  ;;  %v5230_v43 = vrot.slane %v11662_v34, %v8541_v22  ;;  %v5237_v56 = vrot.slane %v9627_v33, %v8541_v22  ;;  %v10255_v24 = vpop.permute.xlu0 %6577 }
 0x1d1   :  { %11659 = vst [vmem:[#allocation36_spill] sm:$0xff] %v10227_v58  ;;  %v2887_v62 = vrot.slane %v11663_v32, %v8497_v27  ;;  %v2894_v45 = vrot.slane %v11663_v32, %v8500_v28  ;;  %v6038_v19 = vcombine.low %v3615_v57, %v3622_v8  ;;  %v6310_v42 = vcombine.low %v4063_v16, %v4070_v7  ;;  %v11666_v7 = vld [vmem:[#allocation69_spill] sm:$0xff] }
 0x1d2   :  { %6694 = vperm.xlu0 %7917, %v5765_v50   ;;  %v6039_v10 = vcombine.low %v3629_v63, %v3636_v51  ;;  %v6311_v38 = vcombine.low %v4077_v37, %v4084_v18  ;;  %v4966_v55 = vcombine.low %v4958_v2, %v4965_v36  ;;  %v5502_v34 = vrot.slane %v9982_v52, %v8541_v22  ;;  %v11667_v36 = vld [vmem:[#allocation78_spill] sm:$0xff]  ;;  %v11668_v52 = vld [vmem:[#allocation29_spill] sm:$0xff] }
 0x1d3   :  { %6646 = vperm.xlu1 %7918, %v5493_v20   ;;  %v5238_v20 = vcombine.low %v5230_v43, %v5237_v56  ;;  %v5509_v50 = vrot.slane %v9984_v3, %v8541_v22  ;;  %v5774_v57 = vrot.slane %v10203_v29, %v8541_v22  ;;  %v5781_v8 = vrot.slane %v5767_v21, %v8541_v22 }
 0x1d4   :  { %v10251_v33 = vpop.permute.xlu1 %6508  ;;  %v10262_v63 = vcombine.low %v2887_v62, %v2894_v45  ;;  %v3195_v37 = vrot.slane %v11666_v7, %v8497_v27  ;;  %v3202_v3 = vrot.slane %v11666_v7, %v8500_v28  ;;  %v3209_v29 = vrot.slane %v11666_v7, %v8503_v30 }
 0x1d5   :  { %11665 = vst [vmem:[#allocation75_spill] sm:$0xff] %v10251_v33  ;;  %v6819_v21 = vadd.s32 4294967288, %v10193_v13  ;;  %v3216_v2 = vrot.slane %v11666_v7, %v8506_v35  ;;  %v6053_v43 = vrot.slane %v6039_v10, %v8541_v22  ;;  %v5510_v56 = vcombine.low %v5502_v34, %v5509_v50  ;;  %v11669_v33 = vld [vmem:[#allocation6_spill] sm:$0xff] }
 0x1d6   :  { %6790 = vperm.xlu0 %7917, %v6309_v1   ;;  %v6046_v1 = vrot.slane %v6038_v19, %v8541_v22  ;;  %v5782_v62 = vcombine.low %v5774_v57, %v5781_v8  ;;  %v6318_v45 = vrot.slane %v6310_v42, %v8541_v22  ;;  %v6325_v16 = vrot.slane %v6311_v38, %v8541_v22  ;;  %v6626_v38 = vpop.permute.xlu0 %6625 }
 0x1d7   :  { %6742 = vperm.xlu1 %7918, %v6037_v49   ;;  %v3643_v49 = vrot.slane %v11667_v36, %v8497_v27  ;;  %v3664_v7 = vrot.slane %v11667_v36, %v8506_v35  ;;  %v4091_v19 = vrot.slane %v9778_v46, %v8497_v27  ;;  %v4098_v50 = vrot.slane %v9778_v46, %v8500_v28 }
 0x1d8   :  { %v10277_v18 = vpop.permute.xlu1 %6526  ;;  %v4105_v10 = vrot.slane %v9778_v46, %v8503_v30  ;;  %v4112_v42 = vrot.slane %v9778_v46, %v8506_v35  ;;  %v5783_v57 = vcombine.low %v3195_v37, %v3202_v3  ;;  %v5784_v8 = vcombine.low %v3209_v29, %v3216_v2 }
 0x1d9   :  { %v4975_v31 = vrot.slane %v11668_v52, %v8541_v22  ;;  %v6326_v51 = vcombine.low %v6318_v45, %v6325_v16  ;;  %v4982_v58 = vrot.slane %v11669_v33, %v8541_v22  ;;  %v5247_v60 = vrot.slane %v9641_v47, %v8541_v22 }
 0x1da   :  { %6601 = vperm.xlu0 %7917, %v5238_v20   ;;  %v3650_v20 = vrot.slane %v11667_v36, %v8500_v28  ;;  %v5254_v46 = vrot.slane %v9643_v53, %v8541_v22  ;;  %v10316_v29 = vsub.s32 %v6819_v21, %v11657_v4  ;;  %v6327_v52 = vcombine.low %v4091_v19, %v4098_v50  ;;  %v11671_v19 = vld [vmem:[#allocation37_spill] sm:$0xff] }
 0x1db   :  { %6553 = vperm.xlu1 %7918, %v4966_v55   ;;  %v3657_v55 = vrot.slane %v11667_v36, %v8503_v30  ;;  %v6054_v36 = vcombine.low %v6046_v1, %v6053_v43  ;;  %v6328_v2 = vcombine.low %v4105_v10, %v4112_v42  ;;  %v5519_v1 = vrot.slane %v10100_v39, %v8541_v22  ;;  %v6674_v43 = vpop.permute.xlu0 %6673 }
 0x1dc   :  { %v10301_v34 = vpop.permute.xlu1 %6574  ;;  %v6055_v3 = vcombine.low %v3643_v49, %v3650_v20  ;;  %v7168_v33 = vrot.slane %v6626_v38, %v10316_v29  ;;  %v5526_v49 = vrot.slane %v10116_v9, %v8541_v22  ;;  %v4983_v21 = vcombine.low %v4975_v31, %v4982_v58 }
 0x1dd   :  { %v6056_v16 = vcombine.low %v3657_v55, %v3664_v7  ;;  %v5255_v45 = vcombine.low %v5247_v60, %v5254_v46  ;;  %v5791_v20 = vrot.slane %v5783_v57, %v8541_v22  ;;  %v5798_v55 = vrot.slane %v5784_v8, %v8541_v22 }
 0x1de   :  { %6697 = vperm.xlu0 %7917, %v5782_v62   ;;  %v3671_v50 = vrot.slane %v11671_v19, %v8497_v27  ;;  %v3678_v9 = vrot.slane %v11671_v19, %v8500_v28  ;;  %v3685_v60 = vrot.slane %v11671_v19, %v8503_v30  ;;  %v3692_v58 = vrot.slane %v11671_v19, %v8506_v35 }
 0x1df   :  { %6649 = vperm.xlu1 %7918, %v5510_v56   ;;  %v11670_v56 = vld [vmem:[#allocation68_spill] sm:$0xff]  ;;  %v6826_v31 = vadd.s32 4294967280, %v10193_v13  ;;  %v7247_v42 = vrot.slane %v6674_v43, %v10316_v29  ;;  %v5527_v57 = vcombine.low %v5519_v1, %v5526_v49  ;;  %v6063_v8 = vrot.slane %v6055_v3, %v8541_v22  ;;  %v11673_v49 = vld [vmem:[#allocation67_spill] sm:$0xff] }
 0x1e0   :  { %v3223_v62 = vrot.slane %v11670_v56, %v8497_v27  ;;  %v3230_v37 = vrot.slane %v11670_v56, %v8500_v28  ;;  %v6623_v47 = vpop.permute.xlu1 %6622  ;;  %v3244_v7 = vrot.slane %v11670_v56, %v8506_v35  ;;  %v5799_v46 = vcombine.low %v5791_v20, %v5798_v55 }
 0x1e1   :  { %v7164_v53 = vrot.slane %v6623_v47, %v10207_v0  ;;  %v6335_v47 = vrot.slane %v6327_v52, %v8541_v22  ;;  %v4133_v43 = vrot.slane %v9776_v15, %v8503_v30  ;;  %v4140_v3 = vrot.slane %v9776_v15, %v8506_v35  ;;  %v11672_v52 = vld [vmem:[#allocation49_spill] sm:$0xff] }
 0x1e2   :  { %6793 = vperm.xlu0 %7917, %v6326_v51   ;;  %v3237_v51 = vrot.slane %v11670_v56, %v8503_v30  ;;  %v6070_v56 = vrot.slane %v6056_v16, %v8541_v22  ;;  %v5264_v19 = vrot.slane %v9633_v17, %v8541_v22  ;;  %v11679_v17 = vrot.slane %v11664_v14, %v8497_v27 }
 0x1e3   :  { %6745 = vperm.xlu1 %7918, %v6054_v36   ;;  %v10333_v39 = vsel %vm6824_vm1, %v7168_v33, %v7164_v53  ;;  %v6722_v36 = vpop.permute.xlu0 %6721  ;;  %v6342_v33 = vrot.slane %v6328_v2, %v8541_v22  ;;  %v4119_v53 = vrot.slane %v9776_v15, %v8497_v27  ;;  %v4992_v2 = vrot.slane %v11672_v52, %v8541_v22 }
 0x1e4   :  { %v6671_v10 = vpop.permute.xlu1 %6670  ;;  %v7326_v20 = vrot.slane %v6722_v36, %v10316_v29  ;;  %v11675_v52 = vrot.slane %v11663_v32, %v8506_v35  ;;  %v11678_v36 = vrot.slane %v11664_v14, %v8500_v28 }
 0x1e5   :  { %v7243_v38 = vrot.slane %v6671_v10, %v10207_v0  ;;  %v11674_v10 = vld [vmem:[#allocation42_spill] sm:$0xff] }
 0x1e6   :  { %6604 = vperm.xlu0 %7917, %v5255_v45   ;;  %v4999_v45 = vrot.slane %v11673_v49, %v8541_v22  ;;  %v11676_v49 = vrot.slane %v11663_v32, %v8503_v30  ;;  %v6072_v32 = vcombine.low %v3671_v50, %v3678_v9 }
 0x1e7   :  { %6556 = vperm.xlu1 %7918, %v4983_v21   ;;  %v4126_v21 = vrot.slane %v9776_v15, %v8500_v28  ;;  %v10355_v1 = vsel %vm6824_vm1, %v7247_v42, %v7243_v38  ;;  %v5271_v42 = vrot.slane %v11674_v10, %v8541_v22  ;;  %v5800_v15 = vcombine.low %v3223_v62, %v3230_v37 }
 0x1e8   :  { %v6719_v16 = vpop.permute.xlu1 %6718  ;;  %v5801_v38 = vcombine.low %v3237_v51, %v3244_v7  ;;  %v10375_v11 = vcombine.low %v11676_v49, %v11675_v52  ;;  %v10386_v62 = vsub.s32 %v6826_v31, %v11657_v4  ;;  %v11680_v51 = vld [vmem:[#allocation50_spill] sm:$0xff]  ;;  %v5000_v10 = vcombine.low %v4992_v2, %v4999_v45 }
 0x1e9   :  { %v7322_v55 = vrot.slane %v6719_v16, %v10207_v0  ;;  %v10383_v16 = vcombine.low %v11679_v17, %v11678_v36  ;;  %v3279_v7 = vrot.slane %v11680_v51, %v8497_v27  ;;  %v5272_v52 = vcombine.low %v5264_v19, %v5271_v42 }
 0x1ea   :  { %6700 = vperm.xlu0 %7917, %v5799_v46   ;;  %v6343_v46 = vcombine.low %v6335_v47, %v6342_v33  ;;  %11677 = vst [vmem:[#allocation46_spill] sm:$0xff] %v10375_v11  ;;  %v6344_v47 = vcombine.low %v4119_v53, %v4126_v21  ;;  %v6345_v33 = vcombine.low %v4133_v43, %v4140_v3 }
 0x1eb   :  { %6652 = vperm.xlu1 %7918, %v5527_v57   ;;  %v6071_v57 = vcombine.low %v6063_v8, %v6070_v56  ;;  %v10389_v37 = vsel %vm6824_vm1, %v7326_v20, %v7322_v55  ;;  %v6073_v8 = vcombine.low %v3685_v60, %v3692_v58  ;;  %v6833_v56 = vadd.s32 4294967272, %v10193_v13  ;;  %v11681_v58 = vld [vmem:[#allocation24_spill] sm:$0xff] }
 0x1ec   :  { %v5536_v31 = vrot.slane %v10096_v25, %v8541_v22  ;;  %v5543_v20 = vrot.slane %v10098_v12, %v8541_v22  ;;  %v5808_v55 = vrot.slane %v5800_v15, %v8541_v22  ;;  %v5815_v49 = vrot.slane %v5801_v38, %v8541_v22 }
 0x1ed   :  { %v3286_v50 = vrot.slane %v11680_v51, %v8500_v28  ;;  %v3293_v9 = vrot.slane %v11680_v51, %v8503_v30  ;;  %v3300_v60 = vrot.slane %v11680_v51, %v8506_v35  ;;  %v3251_v53 = vrot.slane %v11681_v58, %v8497_v27  ;;  %v11684_v51 = vld [vmem:[#allocation39_spill] sm:$0xff] }
 0x1ee   :  { %6796 = vperm.xlu0 %7917, %v6343_v46   ;;  %v3258_v25 = vrot.slane %v11681_v58, %v8500_v28  ;;  %v3265_v12 = vrot.slane %v11681_v58, %v8503_v30  ;;  %v3272_v21 = vrot.slane %v11681_v58, %v8506_v35  ;;  %v6080_v43 = vrot.slane %v6072_v32, %v8541_v22  ;;  %v11689_v58 = vld [vmem:[#allocation27_spill] sm:$0xff] }
 0x1ef   :  { %6748 = vperm.xlu1 %7918, %v6071_v57   ;;  %v6087_v3 = vrot.slane %v6073_v8, %v8541_v22  ;;  %v6352_v2 = vrot.slane %v6344_v47, %v8541_v22  ;;  %v6359_v45 = vrot.slane %v6345_v33, %v8541_v22  ;;  %v11682_v19 = vrot.slane %v11664_v14, %v8506_v35 }
 0x1f0   :  { %v11683_v42 = vrot.slane %v11664_v14, %v8503_v30  ;;  %v10427_v38 = vsub.s32 %v6833_v56, %v11657_v4  ;;  %v5544_v57 = vcombine.low %v5536_v31, %v5543_v20  ;;  %v5816_v46 = vcombine.low %v5808_v55, %v5815_v49  ;;  %v11686_v20 = vld [vmem:[#allocation55_spill] sm:$0xff]  ;;  %v11687_v49 = vld [vmem:[#allocation56_spill] sm:$0xff] }
 0x1f1   :  { %v10429_v36 = vcombine.low %v3279_v7, %v3286_v50  ;;  %v10431_v17 = vcombine.low %v3293_v9, %v3300_v60  ;;  %v3699_v32 = vrot.slane %v11684_v51, %v8497_v27  ;;  %v3706_v8 = vrot.slane %v11684_v51, %v8500_v28  ;;  %v11685_v7 = vld [vmem:[#allocation44_spill] sm:$0xff]  ;;  %v11688_v9 = vld [vmem:[#allocation26_spill] sm:$0xff] }
 0x1f2   :  { %6607 = vperm.xlu0 %7917, %v5272_v52   ;;  %v10424_v15 = vcombine.low %v11683_v42, %v11682_v19  ;;  %v5817_v47 = vcombine.low %v3251_v53, %v3258_v25  ;;  %v3713_v14 = vrot.slane %v11684_v51, %v8503_v30  ;;  %v3720_v56 = vrot.slane %v11684_v51, %v8506_v35 }
 0x1f3   :  { %6559 = vperm.xlu1 %7918, %v5000_v10   ;;  %v5818_v33 = vcombine.low %v3265_v12, %v3272_v21  ;;  %v3335_v10 = vrot.slane %v11685_v7, %v8497_v27  ;;  %v6088_v52 = vcombine.low %v6080_v43, %v6087_v3  ;;  %v6360_v31 = vcombine.low %v6352_v2, %v6359_v45 }
 0x1f4   :  { %v4737_v55 = vrot.slane %v11686_v20, %v8541_v22  ;;  %v4744_v50 = vrot.slane %v11687_v49, %v8541_v22  ;;  %v5009_v60 = vrot.slane %v11688_v9, %v8541_v22  ;;  %v5016_v53 = vrot.slane %v11689_v58, %v8541_v22 }
 0x1f5   :  { %v3342_v25 = vrot.slane %v11685_v7, %v8500_v28  ;;  %v3349_v12 = vrot.slane %v11685_v7, %v8503_v30  ;;  %v3356_v21 = vrot.slane %v11685_v7, %v8506_v35  ;;  %v6089_v43 = vcombine.low %v3699_v32, %v3706_v8  ;;  %v11691_v32 = vld [vmem:[#allocation82_spill] sm:$0xff] }
 0x1f6   :  { %6703 = vperm.xlu0 %7917, %v5816_v46   ;;  %v6090_v3 = vcombine.low %v3713_v14, %v3720_v56  ;;  %v4147_v2 = vrot.slane %v9806_v59, %v8497_v27  ;;  %v4154_v45 = vrot.slane %v9806_v59, %v8500_v28  ;;  %v6840_v19 = vadd.s32 4294967264, %v10193_v13  ;;  %v11690_v46 = vld [vmem:[#allocation81_spill] sm:$0xff] }
 0x1f7   :  { %6655 = vperm.xlu1 %7918, %v5544_v57   ;;  %v4161_v42 = vrot.slane %v9806_v59, %v8503_v30  ;;  %v4168_v57 = vrot.slane %v9806_v59, %v8506_v35  ;;  %v5281_v51 = vrot.slane %v11690_v46, %v8541_v22  ;;  %v5288_v8 = vrot.slane %v11691_v32, %v8541_v22 }
 0x1f8   :  { %v4745_v14 = vcombine.low %v4737_v55, %v4744_v50  ;;  %v5017_v56 = vcombine.low %v5009_v60, %v5016_v53  ;;  %v5553_v7 = vrot.slane %v10197_v5, %v8541_v22  ;;  %v10482_v55 = vcombine.low %v3335_v10, %v3342_v25 }
 0x1f9   :  { %v10484_v50 = vcombine.low %v3349_v12, %v3356_v21  ;;  %v10487_v5 = vsub.s32 %v6840_v19, %v11657_v4  ;;  %v6362_v60 = vcombine.low %v4161_v42, %v4168_v57  ;;  %v5825_v58 = vrot.slane %v5817_v47, %v8541_v22  ;;  %v11695_v12 = vld [vmem:[#allocation38_spill] sm:$0xff] }
 0x1fa   :  { %6799 = vperm.xlu0 %7917, %v6360_v31   ;;  %v11692_v31 = vld [vmem:[#allocation52_spill] sm:$0xff]  ;;  %11693 = vst [vmem:[#allocation13_spill] sm:$0xff] %v10482_v55  ;;  %v5832_v53 = vrot.slane %v5818_v33, %v8541_v22  ;;  %v5289_v46 = vcombine.low %v5281_v51, %v5288_v8  ;;  %v6097_v54 = vrot.slane %v6089_v43, %v8541_v22 }
 0x1fb   :  { %6751 = vperm.xlu1 %7918, %v6088_v52   ;;  %v5560_v52 = vrot.slane %v10199_v6, %v8541_v22  ;;  %v3307_v20 = vrot.slane %v11692_v31, %v8497_v27  ;;  %v3314_v59 = vrot.slane %v11692_v31, %v8500_v28  ;;  %v3321_v49 = vrot.slane %v11692_v31, %v8503_v30 }
 0x1fc   :  { %v3328_v9 = vrot.slane %v11692_v31, %v8506_v35  ;;  %11694 = vst [vmem:[#allocation61_spill] sm:$0xff] %v10484_v50  ;;  %v6361_v6 = vcombine.low %v4147_v2, %v4154_v45  ;;  %v6104_v10 = vrot.slane %v6090_v3, %v8541_v22  ;;  %v3727_v21 = vrot.slane %v11695_v12, %v8497_v27  ;;  %v11697_v31 = vld [vmem:[#allocation10_spill] sm:$0xff] }
 0x1fd   :  { %v5561_v32 = vcombine.low %v5553_v7, %v5560_v52  ;;  %v10493_v25 = vcombine.low %v3307_v20, %v3314_v59  ;;  %v3734_v19 = vrot.slane %v11695_v12, %v8500_v28  ;;  %v3741_v2 = vrot.slane %v11695_v12, %v8503_v30  ;;  %v11696_v7 = vld [vmem:[#allocation8_spill] sm:$0xff] }
 0x1fe   :  { %6562 = vperm.xlu0 %7917, %v5017_v56   ;;  %v3748_v33 = vrot.slane %v11695_v12, %v8506_v35  ;;  %v7085_v42 = vrot.slane %v10301_v34, %v10207_v0  ;;  %v5833_v57 = vcombine.low %v5825_v58, %v5832_v53  ;;  %v6369_v51 = vrot.slane %v6361_v6, %v8541_v22 }
 0x1ff   :  { %6514 = vperm.xlu1 %7918, %v4745_v14   ;;  %v6376_v8 = vrot.slane %v6362_v60, %v8541_v22  ;;  %v6105_v56 = vcombine.low %v6097_v54, %v6104_v10  ;;  %v4754_v52 = vrot.slane %v11696_v7, %v8541_v22  ;;  %v4761_v20 = vrot.slane %v11697_v31, %v8541_v22 }
 0x200   :  { %v4175_v59 = vrot.slane %v9804_v41, %v8497_v27  ;;  %v4182_v34 = vrot.slane %v9804_v41, %v8500_v28  ;;  %v4189_v6 = vrot.slane %v9804_v41, %v8503_v30  ;;  %v7089_v60 = vrot.slane %v10255_v24, %v10316_v29  ;;  %v11700_v24 = vld [vmem:[#allocation43_spill] sm:$0xff] }
 0x201   :  { %v6770_v45 = vpop.permute.xlu0 %6769  ;;  %v4196_v53 = vrot.slane %v9804_v41, %v8506_v35  ;;  %v10536_v41 = vcombine.low %v3321_v49, %v3328_v9  ;;  %v6107_v61 = vcombine.low %v3741_v2, %v3748_v33  ;;  %v5849_v33 = vrot.slane %v10431_v17, %v8541_v22 }
 0x202   :  { %v6767_v47 = vpop.permute.xlu1 %6766  ;;  %v7405_v3 = vrot.slane %v6770_v45, %v10316_v29  ;;  %6658 = vperm.xlu0 %7917, %v5561_v32   ;;  %v11698_v32 = vld [vmem:[#allocation25_spill] sm:$0xff]  ;;  %v7090_v12 = vsel %vm6824_vm1, %v7089_v60, %v7085_v42  ;;  %v6378_v60 = vcombine.low %v4175_v59, %v4182_v34 }
 0x203   :  { %v7401_v43 = vrot.slane %v6767_v47, %v10207_v0  ;;  %6610 = vperm.xlu1 %7918, %v5289_v46   ;;  %v5026_v10 = vrot.slane %v11698_v32, %v8541_v22  ;;  %v11699_v47 = vld [vmem:[#allocation53_spill] sm:$0xff]  ;;  %v11702_v32 = vld [vmem:[#allocation40_spill] sm:$0xff]  ;;  %v6379_v55 = vcombine.low %v4189_v6, %v4196_v53  ;;  %v6121_v34 = vrot.slane %v6107_v61, %v8541_v22 }
 0x204   :  { %v5033_v45 = vrot.slane %v11699_v47, %v8541_v22  ;;  %v3783_v42 = vrot.slane %v11702_v32, %v8497_v27 }
 0x205   :  { %v7406_v14 = vsel %vm6824_vm1, %v7405_v3, %v7401_v43  ;;  %v6581_v54 = vpop.permute.xlu0 %6580  ;;  %v5298_v43 = vrot.slane %v11700_v24, %v8541_v22  ;;  %v11701_v3 = vld [vmem:[#allocation80_spill] sm:$0xff]  ;;  %v6393_v6 = vrot.slane %v6379_v55, %v8541_v22 }
 0x206   :  { %v10522_v58 = vpop.permute.xlu1 %6532  ;;  %v7094_v46 = vrot.slane %v6581_v54, %v10386_v62  ;;  %6754 = vperm.xlu0 %7917, %v6105_v56   ;;  %v5305_v7 = vrot.slane %v11701_v3, %v8541_v22  ;;  %v4762_v56 = vcombine.low %v4754_v52, %v4761_v20  ;;  %v6106_v54 = vcombine.low %v3727_v21, %v3734_v19  ;;  %v11704_v3 = vld [vmem:[#allocation59_spill] sm:$0xff] }
 0x207   :  { %6706 = vperm.xlu1 %7918, %v5833_v57   ;;  %v6377_v57 = vcombine.low %v6369_v51, %v6376_v8  ;;  %v5034_v49 = vcombine.low %v5026_v10, %v5033_v45  ;;  %v5570_v51 = vrot.slane %v10186_v48, %v8541_v22  ;;  %v5577_v21 = vrot.slane %v10195_v26, %v8541_v22  ;;  %v11703_v8 = vld [vmem:[#allocation41_spill] sm:$0xff] }
 0x208   :  { %v7095_v31 = vsel %vm6831_vm2, %v7094_v46, %v7090_v12  ;;  %v5306_v9 = vcombine.low %v5298_v43, %v5305_v7  ;;  %v3755_v52 = vrot.slane %v11703_v8, %v8497_v27  ;;  %v3762_v48 = vrot.slane %v11703_v8, %v8500_v28 }
 0x209   :  { %v6677_v47 = vpop.permute.xlu0 %6676  ;;  %v7010_v26 = vrot.slane %v10225_v40, %v10316_v29  ;;  %v6114_v59 = vrot.slane %v6106_v54, %v8541_v22  ;;  %v7015_v17 = vrot.slane %v10522_v58, %v10386_v62  ;;  %v6386_v40 = vrot.slane %v6378_v60, %v8541_v22  ;;  %v11705_v60 = vld [vmem:[#allocation60_spill] sm:$0xff] }
 0x20a   :  { %v6629_v50 = vpop.permute.xlu1 %6628  ;;  %v7252_v11 = vrot.slane %v6677_v47, %v10386_v62  ;;  %6517 = vperm.xlu0 %7917, %v4762_v56   ;;  %v5578_v46 = vcombine.low %v5570_v51, %v5577_v21  ;;  %v3769_v12 = vrot.slane %v11703_v8, %v8503_v30  ;;  %v3776_v45 = vrot.slane %v11703_v8, %v8506_v35  ;;  %v11707_v21 = vld [vmem:[#allocation73_spill] sm:$0xff] }
 0x20b   :  { %v7173_v24 = vrot.slane %v6629_v50, %v10386_v62  ;;  %6802 = vperm.xlu1 %7918, %v6377_v57   ;;  %v5842_v50 = vrot.slane %v10429_v36, %v8541_v22  ;;  %v10578_v58 = vcombine.low %v3755_v52, %v3762_v48  ;;  %v4771_v55 = vrot.slane %v11704_v3, %v8541_v22 }
 0x20c   :  { %v7253_v2 = vsel %vm6831_vm2, %v7252_v11, %v10355_v1  ;;  %v7006_v11 = vrot.slane %v10277_v18, %v10207_v0  ;;  %v6122_v56 = vcombine.low %v6114_v59, %v6121_v34  ;;  %v6394_v54 = vcombine.low %v6386_v40, %v6393_v6 }
 0x20d   :  { %v7174_v19 = vsel %vm6831_vm2, %v7173_v24, %v10333_v39  ;;  %v6773_v39 = vpop.permute.xlu0 %6772  ;;  %v5850_v10 = vcombine.low %v5842_v50, %v5849_v33  ;;  %v4778_v47 = vrot.slane %v11705_v60, %v8541_v22  ;;  %v5050_v50 = vrot.slane %v11707_v21, %v8541_v22 }
 0x20e   :  { %v6725_v20 = vpop.permute.xlu1 %6724  ;;  %v7410_v36 = vrot.slane %v6773_v39, %v10386_v62  ;;  %6613 = vperm.xlu0 %7917, %v5306_v9   ;;  %v11706_v9 = vld [vmem:[#allocation72_spill] sm:$0xff]  ;;  %v4203_v33 = vrot.slane %v9834_v23, %v8497_v27  ;;  %v4210_v8 = vrot.slane %v9834_v23, %v8500_v28  ;;  %v4217_v52 = vrot.slane %v9834_v23, %v8503_v30 }
 0x20f   :  { %v7331_v1 = vrot.slane %v6725_v20, %v10386_v62  ;;  %6565 = vperm.xlu1 %7918, %v5034_v49   ;;  %v5043_v51 = vrot.slane %v11706_v9, %v8541_v22  ;;  %v4224_v48 = vrot.slane %v9834_v23, %v8506_v35  ;;  %v6124_v20 = vcombine.low %v3769_v12, %v3776_v45 }
 0x210   :  { %v7411_v18 = vsel %vm6831_vm2, %v7410_v36, %v7406_v14  ;;  %v11709_v36 = vld [vmem:[#allocation86_spill] sm:$0xff]  ;;  %v5587_v34 = vrot.slane %v10383_v16, %v8541_v22  ;;  %v5594_v23 = vrot.slane %v10424_v15, %v8541_v22  ;;  %v3790_v12 = vrot.slane %v11702_v32, %v8500_v28 }
 0x211   :  { %v7332_v53 = vsel %vm6831_vm2, %v7331_v1, %v10389_v37  ;;  %v6584_v43 = vpop.permute.xlu0 %6583  ;;  %v7011_v37 = vsel %vm6824_vm1, %v7010_v26, %v7006_v11  ;;  %v11708_v11 = vld [vmem:[#allocation85_spill] sm:$0xff]  ;;  %v3797_v45 = vrot.slane %v11702_v32, %v8503_v30  ;;  %v3804_v15 = vrot.slane %v11702_v32, %v8506_v35 }
 0x212   :  { %v6536_v61 = vpop.permute.xlu1 %6535  ;;  %v7099_v7 = vrot.slane %v6584_v43, %v10427_v38  ;;  %6709 = vperm.xlu0 %7917, %v5850_v10   ;;  %v7016_v57 = vsel %vm6831_vm2, %v7015_v17, %v7011_v37  ;;  %v5315_v1 = vrot.slane %v11708_v11, %v8541_v22  ;;  %v5322_v17 = vrot.slane %v11709_v36, %v8541_v22 }
 0x213   :  { %v7020_v14 = vrot.slane %v6536_v61, %v10427_v38  ;;  %6661 = vperm.xlu1 %7918, %v5578_v46   ;;  %v4779_v46 = vcombine.low %v4771_v55, %v4778_v47  ;;  %v5051_v10 = vcombine.low %v5043_v51, %v5050_v50  ;;  %v6395_v61 = vcombine.low %v4203_v33, %v4210_v8  ;;  %v11710_v8 = vld [vmem:[#allocation57_spill] sm:$0xff] }
 0x214   :  { %v7100_v49 = vsel %vm6838_vm3, %v7099_v7, %v7095_v31  ;;  %v6396_v43 = vcombine.low %v4217_v52, %v4224_v48  ;;  %v5323_v37 = vcombine.low %v5315_v1, %v5322_v17  ;;  %v5859_v7 = vrot.slane %v10493_v25, %v8541_v22  ;;  %v11711_v48 = vld [vmem:[#allocation58_spill] sm:$0xff] }
 0x215   :  { %v7021_v24 = vsel %vm6838_vm3, %v7020_v14, %v7016_v57  ;;  %v6680_v31 = vpop.permute.xlu0 %6679  ;;  %v5595_v14 = vcombine.low %v5587_v34, %v5594_v23  ;;  %v5866_v57 = vrot.slane %v10536_v41, %v8541_v22  ;;  %v6131_v60 = vrot.slane %v10578_v58, %v8541_v22  ;;  %v7555_v34 = vld [vmem:[%s11330_s1 + $0x188] sm:$0xff] }
 0x216   :  { %v6632_v26 = vpop.permute.xlu1 %6631  ;;  %v7257_v59 = vrot.slane %v6680_v31, %v10427_v38  ;;  %6805 = vperm.xlu0 %7917, %v6394_v54   ;;  %v6138_v47 = vrot.slane %v6124_v20, %v8541_v22  ;;  %v4231_v9 = vrot.slane %v9826_v44, %v8497_v27  ;;  %v4238_v25 = vrot.slane %v9826_v44, %v8500_v28 }
 0x217   :  { %v7178_v39 = vrot.slane %v6632_v26, %v10427_v38  ;;  %6757 = vperm.xlu1 %7918, %v6122_v56   ;;  %v6403_v41 = vrot.slane %v6395_v61, %v8541_v22  ;;  %v10654_v28 = vcombine.low %v3783_v42, %v3790_v12  ;;  %v10656_v33 = vcombine.low %v3797_v45, %v3804_v15  ;;  %v11713_v12 = vld [vmem:[#allocation71_spill] sm:$0xff] }
 0x218   :  { %v10616_v6 = vsel %vm6838_vm3, %v7257_v59, %v7253_v2  ;;  %v4788_v52 = vrot.slane %v11710_v8, %v8541_v22  ;;  %v4795_v26 = vrot.slane %v11711_v48, %v8541_v22  ;;  %v6139_v59 = vcombine.low %v6131_v60, %v6138_v47  ;;  %v11716_v60 = vld [vmem:[#allocation46_spill] sm:$0xff]  ;;  %v11717_v8 = vld [vmem:[#allocation13_spill] sm:$0xff] }
 0x219   :  { %v10613_v40 = vsel %vm6838_vm3, %v7178_v39, %v7174_v19  ;;  %v6776_v3 = vpop.permute.xlu0 %6775  ;;  %v6847_v19 = vadd.s32 4294967256, %v10193_v13  ;;  %v5867_v39 = vcombine.low %v5859_v7, %v5866_v57  ;;  %v4245_v27 = vrot.slane %v9826_v44, %v8503_v30  ;;  %v7554_v30 = vld [vmem:[%s11330_s1 + $0x180] sm:$0xff]  ;;  %v11718_v48 = vld [vmem:[#allocation61_spill] sm:$0xff] }
 0x21a   :  { %v6728_v16 = vpop.permute.xlu1 %6727  ;;  %v7415_v55 = vrot.slane %v6776_v3, %v10427_v38  ;;  %6568 = vperm.xlu0 %7917, %v5051_v10   ;;  %v4252_v32 = vrot.slane %v9826_v44, %v8506_v35  ;;  %v10672_v42 = vcombine.low %v4231_v9, %v4238_v25  ;;  %v4796_v23 = vcombine.low %v4788_v52, %v4795_v26  ;;  %v11714_v3 = vld [vmem:[#allocation83_spill] sm:$0xff]  ;;  %v7539_v25 = vld [vmem:[%s11330_s1 + $0x108] sm:$0xff] }
 0x21b   :  { %v7336_v2 = vrot.slane %v6728_v16, %v10427_v38  ;;  %6520 = vperm.xlu1 %7918, %v4779_v46   ;;  %v11712_v46 = vld [vmem:[#allocation70_spill] sm:$0xff]  ;;  %v5067_v45 = vrot.slane %v11713_v12, %v8541_v22  ;;  %v7879_v61 = vpack.c.bf16 %v7555_v34, %v7554_v30  ;;  %v5332_v15 = vrot.slane %v11714_v3, %v8541_v22  ;;  %v7526_v34 = vld [vmem:[%s11330_s1 + $0xa0] sm:$0xff] }
 0x21c   :  { %v10635_v54 = vsel %vm6838_vm3, %v7415_v55, %v7411_v18  ;;  %v10647_v18 = vsub.s32 %v6847_v19, %v11657_v4  ;;  %v5060_v10 = vrot.slane %v11712_v46, %v8541_v22  ;;  %v11715_v19 = vld [vmem:[#allocation84_spill] sm:$0xff]  ;;  %v5604_v57 = vrot.slane %v10262_v63, %v8541_v22 }
 0x21d   :  { %v10632_v56 = vsel %vm6838_vm3, %v7336_v2, %v7332_v53  ;;  %v6587_v21 = vpop.permute.xlu0 %6586  ;;  %v6410_v53 = vrot.slane %v6396_v43, %v8541_v22  ;;  %v5339_v2 = vrot.slane %v11715_v19, %v8541_v22  ;;  %v7506_v55 = vld [vmem:[%s11330_s1] sm:$0xff]  ;;  %v5611_v47 = vrot.slane %v11716_v60, %v8541_v22  ;;  %7880 = vmatprep.subr.bf16.mxu1 %v7879_v61  ;;  %v7529_v60 = vld [vmem:[%s11330_s1 + $0xb8] sm:$0xff] }
 0x21e   :  { %v6539_v51 = vpop.permute.xlu1 %6538  ;;  %v7104_v50 = vrot.slane %v6587_v21, %v10487_v5  ;;  %6664 = vperm.xlu0 %7917, %v5595_v14   ;;  %v7525_v21 = vld [vmem:[%s11330_s1 + $0x98] sm:$0xff]  ;;  %v5876_v52 = vrot.slane %v11717_v8, %v8541_v22  ;;  %v5883_v26 = vrot.slane %v11718_v48, %v8541_v22  ;;  %v7558_v12 = vld [vmem:[%s11330_s1 + $0x1a0] sm:$0xff]  ;;  %v6155_v3 = vrot.slane %v10656_v33, %v8541_v22 }
 0x21f   :  { %v7025_v58 = vrot.slane %v6539_v51, %v10487_v5  ;;  %6616 = vperm.xlu1 %7918, %v5323_v37   ;;  %v6411_v36 = vcombine.low %v6403_v41, %v6410_v53  ;;  %v10713_v37 = vcombine.low %v4245_v27, %v4252_v32  ;;  %v7524_v51 = vld [vmem:[%s11330_s1 + $0x90] sm:$0xff]  ;;  %v7510_v33 = vld [vmem:[%s11330_s1 + $0x20] sm:$0xff] }
 0x220   :  { %v10666_v20 = vsel %vm6845_vm4, %v7104_v50, %v7100_v49  ;;  %v7523_v49 = vld [vmem:[%s11330_s1 + $0x88] sm:$0xff]  ;;  %v7557_v50 = vld [vmem:[%s11330_s1 + $0x198] sm:$0xff]  ;;  %v5884_v61 = vcombine.low %v5876_v52, %v5883_v26 }
 0x221   :  { %v10663_v31 = vsel %vm6845_vm4, %v7025_v58, %v7021_v24  ;;  %v6683_v1 = vpop.permute.xlu0 %6682  ;;  %v7522_v24 = vld [vmem:[%s11330_s1 + $0x80] sm:$0xff]  ;;  %v7556_v58 = vld [vmem:[%s11330_s1 + $0x190] sm:$0xff] }
 0x222   :  { %v6635_v11 = vpop.permute.xlu1 %6634  ;;  %v7262_v35 = vrot.slane %v6683_v1, %v10487_v5  ;;  %6760 = vperm.xlu0 %7917, %v6139_v59   ;;  %v7847_v44 = vpack.c.bf16 %v7523_v49, %v7522_v24  ;;  %v7883_v59 = vpack.c.bf16 %v7557_v50, %v7556_v58  ;;  %v5340_v1 = vcombine.low %v5332_v15, %v5339_v2  ;;  %v7509_v24 = vld [vmem:[%s11330_s1 + $0x18] sm:$0xff] }
 0x223   :  { %v7183_v17 = vrot.slane %v6635_v11, %v10487_v5  ;;  %6712 = vperm.xlu1 %7918, %v5867_v39   ;;  %v7851_v39 = vpack.c.bf16 %v7525_v21, %v7524_v51  ;;  %v5068_v11 = vcombine.low %v5060_v10, %v5067_v45  ;;  %v7559_v45 = vld [vmem:[%s11330_s1 + $0x1a8] sm:$0xff]  ;;  %v7560_v51 = vld [vmem:[%s11330_s1 + $0x1b0] sm:$0xff]  ;;  %v7561_v21 = vld [vmem:[%s11330_s1 + $0x1b8] sm:$0xff] }
 0x224   :  { %v10698_v16 = vsel %vm6845_vm4, %v7262_v35, %v10616_v6  ;;  %7848 = vmatprep.subr.bf16.mxu0 %v7847_v44  ;;  %v7538_v6 = vld [vmem:[%s11330_s1 + $0x100] sm:$0xff]  ;;  %v7541_v44 = vld [vmem:[%s11330_s1 + $0x118] sm:$0xff]  ;;  %v7887_v19 = vpack.c.bf16 %v7559_v45, %v7558_v12  ;;  %v7515_v12 = vld [vmem:[%s11330_s1 + $0x48] sm:$0xff] }
 0x225   :  { %v10694_v43 = vsel %vm6845_vm4, %v7183_v17, %v10613_v40  ;;  %v7507_v40 = vld [vmem:[%s11330_s1 + $0x8] sm:$0xff]  ;;  %v6779_v7 = vpop.permute.xlu0 %6778  ;;  %v7881_v53 = vpack.c.bf16 %v7539_v25, %v7538_v6  ;;  %v5612_v17 = vcombine.low %v5604_v57, %v5611_v47  ;;  %v6427_v6 = vrot.slane %v10713_v37, %v8541_v22  ;;  %v7528_v57 = vld [vmem:[%s11330_s1 + $0xb0] sm:$0xff] }
 0x226   :  { %v6731_v14 = vpop.permute.xlu1 %6730  ;;  %v7849_v9 = vpack.c.bf16 %v7507_v40, %v7506_v55  ;;  %v7420_v63 = vrot.slane %v6779_v7, %v10487_v5  ;;  %6523 = vperm.xlu0 %7917, %v4796_v23   ;;  %v7527_v23 = vld [vmem:[%s11330_s1 + $0xa8] sm:$0xff]  ;;  %v6420_v40 = vrot.slane %v10672_v42, %v8541_v22 }
 0x227   :  { %v7341_v41 = vrot.slane %v6731_v14, %v10487_v5  ;;  %6808 = vperm.xlu1 %7918, %v6411_v36   ;;  %7882 = vmatpush3.bf16.msra.mxu1 %v7881_v53  ;;  %v7508_v36 = vld [vmem:[%s11330_s1 + $0x10] sm:$0xff]  ;;  %v7855_v15 = vpack.c.bf16 %v7527_v23, %v7526_v34  ;;  %v7543_v37 = vld [vmem:[%s11330_s1 + $0x128] sm:$0xff]  ;;  %v7891_v53 = vpack.c.bf16 %v7561_v21, %v7560_v51  ;;  %v7566_v21 = vld [vmem:[%s11330_s1 + $0x1e0] sm:$0xff] }
 0x228   :  { %7850 = vmatpush3.bf16.msra.mxu0 %v7849_v9  ;;  %v10746_v32 = vsel %vm6845_vm4, %v7420_v63, %v10635_v54  ;;  %v6148_v54 = vrot.slane %v10654_v28, %v8541_v22  ;;  %7884 = vmatprep.subr.bf16.mxu1 %v7883_v59  ;;  %v7853_v35 = vpack.c.bf16 %v7509_v24, %v7508_v36  ;;  %v7545_v36 = vld [vmem:[%s11330_s1 + $0x138] sm:$0xff]  ;;  %v7530_v24 = vld [vmem:[%s11330_s1 + $0xc0] sm:$0xff]  ;;  %v7535_v51 = vld [vmem:[%s11330_s1 + $0xe8] sm:$0xff] }
 0x229   :  { %v10742_v27 = vsel %vm6845_vm4, %v7341_v41, %v10632_v56  ;;  %v7540_v56 = vld [vmem:[%s11330_s1 + $0x110] sm:$0xff]  ;;  %v6590_v30 = vpop.permute.xlu0 %6589  ;;  %7852 = vmatprep.subr.bf16.mxu0 %v7851_v39  ;;  %v6854_v41 = vadd.s32 4294967248, %v10193_v13  ;;  %v7859_v63 = vpack.c.bf16 %v7529_v60, %v7528_v57  ;;  %v6428_v52 = vcombine.low %v6420_v40, %v6427_v6  ;;  %v7549_v60 = vld [vmem:[%s11330_s1 + $0x158] sm:$0xff] }
 0x22a   :  { %v6542_v49 = vpop.permute.xlu1 %6541  ;;  %v7109_v28 = vrot.slane %v6590_v30, %v10647_v18  ;;  %6619 = vperm.xlu0 %7917, %v5340_v1   ;;  %v7885_v10 = vpack.c.bf16 %v7541_v44, %v7540_v56  ;;  %v6156_v8 = vcombine.low %v6148_v54, %v6155_v3  ;;  %v7512_v39 = vld [vmem:[%s11330_s1 + $0x30] sm:$0xff]  ;;  %v7531_v56 = vld [vmem:[%s11330_s1 + $0xc8] sm:$0xff] }
 0x22b   :  { %v7030_v46 = vrot.slane %v6542_v49, %v10647_v18  ;;  %6571 = vperm.xlu1 %7918, %v5068_v11   ;;  %v7863_v30 = vpack.c.bf16 %v7531_v56, %v7530_v24  ;;  %v7563_v54 = vld [vmem:[%s11330_s1 + $0x1c8] sm:$0xff]  ;;  %v7548_v57 = vld [vmem:[%s11330_s1 + $0x150] sm:$0xff]  ;;  %v7537_v24 = vld [vmem:[%s11330_s1 + $0xf8] sm:$0xff] }
 0x22c   :  { %7854 = vmatpush3.bf16.msra.mxu0 %v7853_v35  ;;  %v10784_v55 = vsel %vm6852_vm5, %v7109_v28, %v10666_v20  ;;  %7886 = vmatpush3.bf16.msra.mxu1 %v7885_v10  ;;  %v7542_v20 = vld [vmem:[%s11330_s1 + $0x120] sm:$0xff]  ;;  %v10852_v35 = vsub.s32 %v6854_v41, %v11657_v4  ;;  %v7547_v3 = vld [vmem:[%s11330_s1 + $0x148] sm:$0xff]  ;;  %v7568_v56 = vld [vmem:[%s11330_s1 + $0x1f0] sm:$0xff] }
 0x22d   :  { %v10780_v2 = vsel %vm6852_vm5, %v7030_v46, %v10663_v31  ;;  %v7511_v31 = vld [vmem:[%s11330_s1 + $0x28] sm:$0xff]  ;;  %v6686_v7 = vpop.permute.xlu0 %6685  ;;  %7856 = vmatprep.subr.bf16.mxu0 %v7855_v15  ;;  %7888 = vmatprep.subr.bf16.mxu1 %v7887_v19  ;;  %v7889_v25 = vpack.c.bf16 %v7543_v37, %v7542_v20  ;;  %v7514_v10 = vld [vmem:[%s11330_s1 + $0x40] sm:$0xff]  ;;  %v7532_v15 = vld [vmem:[%s11330_s1 + $0xd0] sm:$0xff] }
 0x22e   :  { %v6638_v14 = vpop.permute.xlu1 %6637  ;;  %v7857_v42 = vpack.c.bf16 %v7511_v31, %v7510_v33  ;;  %v7267_v9 = vrot.slane %v6686_v7, %v10647_v18  ;;  %6715 = vperm.xlu0 %7917, %v5884_v61   ;;  %v7865_v61 = vpack.c.bf16 %v7515_v12, %v7514_v10  ;;  %v7533_v19 = vld [vmem:[%s11330_s1 + $0xd8] sm:$0xff]  ;;  %v7564_v33 = vld [vmem:[%s11330_s1 + $0x1d0] sm:$0xff] }
 0x22f   :  { %v7188_v47 = vrot.slane %v6638_v14, %v10647_v18  ;;  %6667 = vperm.xlu1 %7918, %v5612_v17   ;;  %v7562_v17 = vld [vmem:[%s11330_s1 + $0x1c0] sm:$0xff]  ;;  %v7867_v6 = vpack.c.bf16 %v7533_v19, %v7532_v15  ;;  %v7565_v31 = vld [vmem:[%s11330_s1 + $0x1d8] sm:$0xff]  ;;  %v7516_v20 = vld [vmem:[%s11330_s1 + $0x50] sm:$0xff] }
 0x230   :  { %7858 = vmatpush3.bf16.msra.mxu0 %v7857_v42  ;;  %v10823_v50 = vsel %vm6852_vm5, %v7267_v9, %v10698_v16  ;;  %7890 = vmatpush3.bf16.msra.mxu1 %v7889_v25  ;;  %v7544_v16 = vld [vmem:[%s11330_s1 + $0x130] sm:$0xff]  ;;  %v7895_v23 = vpack.c.bf16 %v7563_v54, %v7562_v17  ;;  %v7899_v42 = vpack.c.bf16 %v7565_v31, %v7564_v33  ;;  %v7517_v37 = vld [vmem:[%s11330_s1 + $0x58] sm:$0xff]  ;;  %v7534_v25 = vld [vmem:[%s11330_s1 + $0xe0] sm:$0xff] }
 0x231   :  { %v10819_v58 = vsel %vm6852_vm5, %v7188_v47, %v10694_v43  ;;  %v6782_v26 = vpop.permute.xlu0 %6781  ;;  %7860 = vmatprep.subr.bf16.mxu0 %v7859_v63  ;;  %7892 = vmatprep.subr.bf16.mxu1 %v7891_v53  ;;  %v7513_v43 = vld [vmem:[%s11330_s1 + $0x38] sm:$0xff]  ;;  %v7893_v49 = vpack.c.bf16 %v7545_v36, %v7544_v16  ;;  %v7901_v9 = vpack.c.bf16 %v7549_v60, %v7548_v57  ;;  %v7536_v16 = vld [vmem:[%s11330_s1 + $0xf0] sm:$0xff]  ;;  %v6868_v57 = vadd.s32 4294967232, %v10193_v13 }
 0x232   :  { %v6734_v48 = vpop.permute.xlu1 %6733  ;;  %v7425_v11 = vrot.slane %v6782_v26, %v10647_v18  ;;  %6811 = vperm.xlu0 %7917, %v6428_v52   ;;  %v7861_v1 = vpack.c.bf16 %v7513_v43, %v7512_v39  ;;  %v7871_v53 = vpack.c.bf16 %v7535_v51, %v7534_v25  ;;  %v7518_v52 = vld [vmem:[%s11330_s1 + $0x60] sm:$0xff]  ;;  %v7551_v43 = vld [vmem:[%s11330_s1 + $0x168] sm:$0xff]  ;;  %v7520_v54 = vld [vmem:[%s11330_s1 + $0x70] sm:$0xff] }
 0x233   :  { %v7346_v59 = vrot.slane %v6734_v48, %v10647_v18  ;;  %6763 = vperm.xlu1 %7918, %v6156_v8   ;;  %v7567_v8 = vld [vmem:[%s11330_s1 + $0x1e8] sm:$0xff]  ;;  %v7550_v39 = vld [vmem:[%s11330_s1 + $0x160] sm:$0xff]  ;;  %v7552_v12 = vld [vmem:[%s11330_s1 + $0x170] sm:$0xff] }
 0x234   :  { %v10860_v34 = vsel %vm6852_vm5, %v7425_v11, %v10746_v32  ;;  %7862 = vmatpush3.bf16.msra.mxu0 %v7861_v1  ;;  %7894 = vmatpush3.bf16.msra.mxu1 %v7893_v49  ;;  %v7519_v48 = vld [vmem:[%s11330_s1 + $0x68] sm:$0xff]  ;;  %v7903_v26 = vpack.c.bf16 %v7567_v8, %v7566_v21  ;;  %v7569_v49 = vld [vmem:[%s11330_s1 + $0x1f8] sm:$0xff] }
 0x235   :  { %v10856_v44 = vsel %vm6852_vm5, %v7346_v59, %v10742_v27  ;;  %v6593_v28 = vpop.permute.xlu0 %6592  ;;  %7864 = vmatprep.subr.bf16.mxu0 %v7863_v30  ;;  %v7546_v27 = vld [vmem:[%s11330_s1 + $0x140] sm:$0xff]  ;;  %7896 = vmatprep.subr.bf16.mxu1 %v7895_v23  ;;  %v6861_v59 = vadd.s32 4294967240, %v10193_v13  ;;  %v7873_v36 = vpack.c.bf16 %v7519_v48, %v7518_v52  ;;  %v7521_v23 = vld [vmem:[%s11330_s1 + $0x78] sm:$0xff]  ;;  %v7907_v10 = vpack.c.bf16 %v7569_v49, %v7568_v56 }
 0x236   :  { %v6545_v46 = vpop.permute.xlu1 %6544  ;;  %v7114_v45 = vrot.slane %v6593_v28, %v10852_v35  ;;  %v7897_v40 = vpack.c.bf16 %v7547_v3, %v7546_v27  ;;  %v7553_v27 = vld [vmem:[%s11330_s1 + $0x178] sm:$0xff]  ;;  %v7877_v3 = vpack.c.bf16 %v7521_v23, %v7520_v54 }
 0x237   :  { %v7035_v32 = vrot.slane %v6545_v46, %v10852_v35 }
 0x238   :  { %v10897_v7 = vsel %vm6859_vm6, %v7114_v45, %v10784_v55  ;;  %7866 = vmatpush3.bf16.msra.mxu0 %v7865_v61  ;;  %7898 = vmatpush3.bf16.msra.mxu1 %v7897_v40  ;;  %v7869_v55 = vpack.c.bf16 %v7517_v37, %v7516_v20  ;;  %v7909_v40 = vpack.c.bf16 %v7553_v27, %v7552_v12 }
 0x239   :  { %v10893_v14 = vsel %vm6859_vm6, %v7035_v32, %v10780_v2  ;;  %v6689_v47 = vpop.permute.xlu0 %6688  ;;  %7868 = vmatprep.subr.bf16.mxu0 %v7867_v6  ;;  %7900 = vmatprep.subr.bf16.mxu1 %v7899_v42  ;;  %v10966_v32 = vsub.s32 %v6861_v59, %v11657_v4 }
 0x23a   :  { %v6641_v2 = vpop.permute.xlu1 %6640  ;;  %v7272_v63 = vrot.slane %v6689_v47, %v10852_v35 }
 0x23b   :  { %v7193_v41 = vrot.slane %v6641_v2, %v10852_v35 }
 0x23c   :  { %v7273_v1 = vsel %vm6859_vm6, %v7272_v63, %v10823_v50  ;;  %7870 = vmatpush3.bf16.msra.mxu0 %v7869_v55  ;;  %7902 = vmatpush3.bf16.msra.mxu1 %v7901_v9  ;;  %v7875_v50 = vpack.c.bf16 %v7537_v24, %v7536_v16  ;;  %v10986_v9 = vsub.s32 %v6868_v57, %v11657_v4  ;;  %v6875_v16 = vadd.s32 4294967224, %v10193_v13 }
 0x23d   :  { %v7194_v11 = vsel %vm6859_vm6, %v7193_v41, %v10819_v58  ;;  %v6785_v17 = vpop.permute.xlu0 %6784  ;;  %7872 = vmatprep.subr.bf16.mxu0 %v7871_v53  ;;  %v7905_v58 = vpack.c.bf16 %v7551_v43, %v7550_v39  ;;  %7904 = vmatprep.subr.bf16.mxu1 %v7903_v26 }
 0x23e   :  { %v6737_v30 = vpop.permute.xlu1 %6736  ;;  %v7430_v28 = vrot.slane %v6785_v17, %v10852_v35  ;;  %v11002_v49 = vsub.s32 %v6875_v16, %v11657_v4 }
 0x23f   :  { %v7351_v46 = vrot.slane %v6737_v30, %v10852_v35 }
 0x240   :  { %v7431_v61 = vsel %vm6859_vm6, %v7430_v28, %v10860_v34  ;;  %7874 = vmatpush3.bf16.msra.mxu0 %v7873_v36  ;;  %7906 = vmatpush3.bf16.msra.mxu1 %v7905_v58 }
 0x241   :  { %v7352_v45 = vsel %vm6859_vm6, %v7351_v46, %v10856_v44  ;;  %v6596_v19 = vpop.permute.xlu0 %6595  ;;  %7876 = vmatprep.subr.bf16.mxu0 %v7875_v50  ;;  %7908 = vmatprep.subr.bf16.mxu1 %v7907_v10 }
 0x242   :  { %v6548_v15 = vpop.permute.xlu1 %6547  ;;  %v7119_v33 = vrot.slane %v6596_v19, %v10966_v32 }
 0x243   :  { %v7040_v6 = vrot.slane %v6548_v15, %v10966_v32 }
 0x244   :  { %v7120_v44 = vsel %vm6866_vm7, %v7119_v33, %v10897_v7  ;;  %7878 = vmatpush3.bf16.msra.mxu0 %v7877_v3  ;;  %7910 = vmatpush3.bf16.msra.mxu1 %v7909_v40 }
 0x245   :  { %v7041_v31 = vsel %vm6866_vm7, %v7040_v6, %v10893_v14  ;;  %v6692_v20 = vpop.permute.xlu0 %6691 }
 0x246   :  { %v6644_v34 = vpop.permute.xlu1 %6643  ;;  %v7277_v37 = vrot.slane %v6692_v20, %v10966_v32 }
 0x247   :  { %v7198_v42 = vrot.slane %v6644_v34, %v10966_v32 }
 0x248   :  { %v7278_v2 = vsel %vm6866_vm7, %v7277_v37, %v7273_v1 }
 0x249   :  { %v7199_v60 = vsel %vm6866_vm7, %v7198_v42, %v7194_v11  ;;  %v6788_v55 = vpop.permute.xlu0 %6787 }
 0x24a   :  { %v6740_v47 = vpop.permute.xlu1 %6739  ;;  %v7435_v7 = vrot.slane %v6788_v55, %v10966_v32 }
 0x24b   :  { %v7356_v14 = vrot.slane %v6740_v47, %v10966_v32 }
 0x24c   :  { %v7436_v51 = vsel %vm6866_vm7, %v7435_v7, %v7431_v61  ;;  %v6882_v61 = vadd.s32 4294967216, %v10193_v13 }
 0x24d   :  { %v7357_v25 = vsel %vm6866_vm7, %v7356_v14, %v7352_v45  ;;  %v6599_v41 = vpop.permute.xlu0 %6598 }
 0x24e   :  { %v6551_v21 = vpop.permute.xlu1 %6550  ;;  %v7124_v53 = vrot.slane %v6599_v41, %v10986_v9 }
 0x24f   :  { %v7045_v63 = vrot.slane %v6551_v21, %v10986_v9 }
 0x250   :  { %v7125_v52 = vsel %vm6873_vm8, %v7124_v53, %v7120_v44 }
 0x251   :  { %v7046_v8 = vsel %vm6873_vm8, %v7045_v63, %v7041_v31  ;;  %v6695_v26 = vpop.permute.xlu0 %6694  ;;  %v11018_v31 = vsub.s32 %v6882_v61, %v11657_v4  ;;  %v11725_v61 = vld [vmem:[#allocation9_spill] sm:$0xff] }
 0x252   :  { %v6647_v48 = vpop.permute.xlu1 %6646  ;;  %v7282_v43 = vrot.slane %v6695_v26, %v10986_v9 }
 0x253   :  { %v7203_v39 = vrot.slane %v6647_v48, %v10986_v9 }
 0x254   :  { %v7283_v11 = vsel %vm6873_vm8, %v7282_v43, %v7278_v2 }
 0x255   :  { %v7204_v59 = vsel %vm6873_vm8, %v7203_v39, %v7199_v60  ;;  %v6791_v36 = vpop.permute.xlu0 %6790 }
 0x256   :  { %v6743_v1 = vpop.permute.xlu1 %6742  ;;  %v7440_v56 = vrot.slane %v6791_v36, %v10986_v9  ;;  %v11719_v36 = vld [vmem:[#allocation4_spill] sm:$0xff] }
 0x257   :  { %v7361_v24 = vrot.slane %v6743_v1, %v10986_v9 }
 0x258   :  { %v7441_v17 = vsel %vm6873_vm8, %v7440_v56, %v7436_v51  ;;  %v11720_v56 = vld [vmem:[#allocation48_spill] sm:$0xff] }
 0x259   :  { %v7362_v30 = vsel %vm6873_vm8, %v7361_v24, %v7357_v25  ;;  %v6602_v50 = vpop.permute.xlu0 %6601  ;;  %v6818_v24 = vrot.slane %v11719_v36, %v10207_v0 }
 0x25a   :  { %v6554_v58 = vpop.permute.xlu1 %6553  ;;  %v7129_v23 = vrot.slane %v6602_v50, %v11002_v49 }
 0x25b   :  { %v7050_v54 = vrot.slane %v6554_v58, %v11002_v49 }
 0x25c   :  { %v7130_v28 = vsel %vm6880_vm9, %v7129_v23, %v7125_v52 }
 0x25d   :  { %v7051_v46 = vsel %vm6880_vm9, %v7050_v54, %v7046_v8  ;;  %v6698_v12 = vpop.permute.xlu0 %6697 }
 0x25e   :  { %v6650_v10 = vpop.permute.xlu1 %6649  ;;  %v7287_v45 = vrot.slane %v6698_v12, %v11002_v49 }
 0x25f   :  { %v7208_v27 = vrot.slane %v6650_v10, %v11002_v49  ;;  %v11723_v10 = vld [vmem:[#allocation51_spill] sm:$0xff] }
 0x260   :  { %v7288_v15 = vsel %vm6880_vm9, %v7287_v45, %v7283_v11  ;;  %v6844_v12 = vrot.slane %v11723_v10, %v10487_v5 }
 0x261   :  { %v7209_v3 = vsel %vm6880_vm9, %v7208_v27, %v7204_v59  ;;  %v6794_v40 = vpop.permute.xlu0 %6793  ;;  %v11724_v27 = vld [vmem:[#allocation11_spill] sm:$0xff] }
 0x262   :  { %v6746_v19 = vpop.permute.xlu1 %6745  ;;  %v7445_v33 = vrot.slane %v6794_v40, %v11002_v49  ;;  %v6927_v45 = vrot.slane %v11724_v27, %v10207_v0  ;;  %v6903_v27 = vadd.s32 4294967192, %v10193_v13 }
 0x263   :  { %v7366_v6 = vrot.slane %v6746_v19, %v11002_v49 }
 0x264   :  { %v11024_v34 = vsel %vm6880_vm9, %v7445_v33, %v7441_v17  ;;  %v11721_v17 = vld [vmem:[#allocation47_spill] sm:$0xff] }
 0x265   :  { %v11021_v44 = vsel %vm6880_vm9, %v7366_v6, %v7362_v30  ;;  %v6605_v42 = vpop.permute.xlu0 %6604  ;;  %v6823_v30 = vrot.slane %v11720_v56, %v10316_v29  ;;  %v6830_v58 = vrot.slane %v11721_v17, %v10386_v62  ;;  %v11727_v6 = vld [vmem:[#allocation16_spill] sm:$0xff]  ;;  %v11731_v17 = vld [vmem:[#allocation31_spill] sm:$0xff] }
 0x266   :  { %v6557_v20 = vpop.permute.xlu1 %6556  ;;  %v7134_v57 = vrot.slane %v6605_v42, %v11018_v31  ;;  %v6858_v33 = vrot.slane %v11727_v6, %v10852_v35 }
 0x267   :  { %v7055_v37 = vrot.slane %v6557_v20, %v11018_v31  ;;  %v6825_v23 = vsel %vm6824_vm1, %v6823_v30, %v6818_v24  ;;  %v11728_v20 = vld [vmem:[#allocation74_spill] sm:$0xff] }
 0x268   :  { %v11032_v2 = vsel %vm6887_vm10, %v7134_v57, %v7130_v28  ;;  %v6832_v40 = vsel %vm6831_vm2, %v6830_v58, %v6825_v23  ;;  %v6931_v42 = vrot.slane %v11728_v20, %v10316_v29  ;;  %v6889_v29 = vadd.s32 4294967208, %v10193_v13 }
 0x269   :  { %v11029_v60 = vsel %vm6887_vm10, %v7055_v37, %v7051_v46  ;;  %v6701_v55 = vpop.permute.xlu0 %6700  ;;  %v11722_v46 = vld [vmem:[#allocation5_spill] sm:$0xff]  ;;  %v6946_v58 = vrot.slane %v11731_v17, %v10487_v5  ;;  %v11733_v5 = vld [vmem:[#allocation32_spill] sm:$0xff] }
 0x26a   :  { %v6653_v47 = vpop.permute.xlu1 %6652  ;;  %v7292_v7 = vrot.slane %v6701_v55, %v11018_v31  ;;  %v6837_v28 = vrot.slane %v11722_v46, %v10427_v38  ;;  %v6932_v24 = vsel %vm6824_vm1, %v6931_v42, %v6927_v45  ;;  %v11732_v46 = vld [vmem:[#allocation66_spill] sm:$0xff]  ;;  %v11735_v42 = vld [vmem:[#allocation19_spill] sm:$0xff]  ;;  %vm7748_vm1 = vcmask 254976  }
 0x26b   :  { %v7213_v14 = vrot.slane %v6653_v47, %v11018_v31  ;;  %v11729_v47 = vld [vmem:[#allocation35_spill] sm:$0xff] }
 0x26c   :  { %v11040_v51 = vsel %vm6887_vm10, %v7292_v7, %v7288_v15  ;;  %v11726_v15 = vld [vmem:[#allocation12_spill] sm:$0xff]  ;;  %v6839_v0 = vsel %vm6838_vm3, %v6837_v28, %v6832_v40  ;;  %v6865_v55 = vrot.slane %v11729_v47, %v10966_v32  ;;  %v11730_v7 = vld [vmem:[#allocation54_spill] sm:$0xff]  ;;  %v6941_v28 = vrot.slane %v11732_v46, %v10427_v38  ;;  %v11734_v40 = vld [vmem:[#allocation7_spill] sm:$0xff] }
 0x26d   :  { %v11037_v25 = vsel %vm6887_vm10, %v7213_v14, %v7209_v3  ;;  %v11044_v41 = vpop.permute.xlu0 %6796  ;;  %v6851_v3 = vrot.slane %v11725_v61, %v10647_v18  ;;  %v6936_v19 = vrot.slane %v11726_v15, %v10386_v62  ;;  %v6896_v14 = vadd.s32 4294967200, %v10193_v13  ;;  %v11736_v47 = vld [vmem:[#allocation28_spill] sm:$0xff] }
 0x26e   :  { %v11042_v21 = vpop.permute.xlu1 %6748  ;;  %v6846_v62 = vsel %vm6845_vm4, %v6844_v12, %v6839_v0  ;;  %v6872_v36 = vrot.slane %v11730_v7, %v10986_v9  ;;  %v6886_v15 = vrot.slane %v11733_v5, %v11018_v31  ;;  %v6879_v6 = vrot.slane %v11734_v40, %v11002_v49 }
 0x26f   :  { %v6853_v56 = vsel %vm6852_vm5, %v6851_v3, %v6846_v62  ;;  %v6937_v30 = vsel %vm6831_vm2, %v6936_v19, %v6932_v24  ;;  %v11123_v61 = vsub.s32 %v6896_v14, %v11657_v4  ;;  %v6910_v19 = vadd.s32 4294967184, %v10193_v13 }
 0x270   :  { %v6860_v23 = vsel %vm6859_vm6, %v6858_v33, %v6853_v56  ;;  %v6942_v38 = vsel %vm6838_vm3, %v6941_v28, %v6937_v30  ;;  %v11133_v33 = vsub.s32 %v6889_v29, %v11657_v4  ;;  %v6956_v0 = vrot.slane %v11735_v42, %v10852_v35  ;;  %v11737_v29 = vld [vmem:[#allocation63_spill] sm:$0xff]  ;;  %v11738_v30 = vld [vmem:[#allocation20_spill] sm:$0xff] }
 0x271   :  { %v11048_v53 = vpop.permute.xlu0 %6607  ;;  %v6867_v45 = vsel %vm6866_vm7, %v6865_v55, %v6860_v23  ;;  %v6947_v20 = vsel %vm6845_vm4, %v6946_v58, %v6942_v38  ;;  %v6951_v55 = vrot.slane %v11736_v47, %v10647_v18  ;;  %v11145_v7 = vsub.s32 %v6903_v27, %v11657_v4  ;;  %v11739_v23 = vld [vmem:[#allocation36_spill] sm:$0xff]  ;;  %v11740_v27 = vld [vmem:[#allocation77_spill] sm:$0xff] }
 0x272   :  { %v11046_v63 = vpop.permute.xlu1 %6559  ;;  %v6874_v3 = vsel %vm6873_vm8, %v6872_v36, %v6867_v45  ;;  %v6900_v56 = vrot.slane %v11737_v29, %v11123_v61  ;;  %v11152_v35 = vsub.s32 %v6910_v19, %v11657_v4  ;;  %v6893_v17 = vrot.slane %v11738_v30, %v11133_v33  ;;  %v11741_v38 = vld [vmem:[#allocation76_spill] sm:$0xff]  ;;  %v11744_v47 = vld [vmem:[#allocation65_spill] sm:$0xff] }
 0x273   :  { %v6881_v36 = vsel %vm6880_vm9, %v6879_v6, %v6874_v3  ;;  %v6952_v18 = vsel %vm6852_vm5, %v6951_v55, %v6947_v20  ;;  %v6966_v46 = vrot.slane %v11739_v23, %v10986_v9  ;;  %v6917_v28 = vadd.s32 4294967176, %v10193_v13  ;;  %v11742_v9 = vld [vmem:[#allocation30_spill] sm:$0xff]  ;;  %v11743_v20 = vld [vmem:[#allocation75_spill] sm:$0xff] }
 0x274   :  { %v6888_v24 = vsel %vm6887_vm10, %v6886_v15, %v6881_v36  ;;  %v6957_v58 = vsel %vm6859_vm6, %v6956_v0, %v6952_v18  ;;  %v6961_v45 = vrot.slane %v11740_v27, %v10966_v32  ;;  %v6914_v40 = vrot.slane %v11741_v38, %v11152_v35 }
 0x275   :  { %v11052_v52 = vpop.permute.xlu0 %6703  ;;  %v6895_v15 = vsel %vm6894_vm11, %v6893_v17, %v6888_v24  ;;  %v6907_v13 = vrot.slane %v11742_v9, %v11145_v7  ;;  %v6976_v42 = vrot.slane %v11743_v20, %v11018_v31  ;;  %v11178_v0 = vsub.s32 %v6917_v28, %v11657_v4 }
 0x276   :  { %v11050_v8 = vpop.permute.xlu1 %6655  ;;  %v6902_v19 = vsel %vm6901_vm12, %v6900_v56, %v6895_v15  ;;  %v6962_v6 = vsel %vm6866_vm7, %v6961_v45, %v6957_v58  ;;  %v6971_v55 = vrot.slane %v11744_v47, %v11002_v49  ;;  %v7371_v4 = vrot.slane %v11042_v21, %v11018_v31  ;;  %v11745_v58 = vld [vmem:[#allocation62_spill] sm:$0xff] }
 0x277   :  { %v6967_v32 = vsel %vm6873_vm8, %v6966_v46, %v6962_v6  ;;  %v6909_v29 = vsel %vm6908_vm13, %v6907_v13, %v6902_v19  ;;  %v7450_v17 = vrot.slane %v11044_v41, %v11018_v31  ;;  %v7060_v49 = vrot.slane %v11046_v63, %v11133_v33  ;;  %v11746_v46 = vld [vmem:[#allocation18_spill] sm:$0xff] }
 0x278   :  { %v6916_v56 = vsel %vm6915_vm14, %v6914_v40, %v6909_v29  ;;  %v6972_v18 = vsel %vm6880_vm9, %v6971_v55, %v6967_v32  ;;  %v6921_v23 = vrot.slane %v11745_v58, %v11178_v0  ;;  %v6981_v28 = vrot.slane %v11746_v46, %v11133_v33 }
 0x279   :  { %v11056_v26 = vpop.permute.xlu0 %6799  ;;  %v6977_v30 = vsel %vm6887_vm10, %v6976_v42, %v6972_v18  ;;  %v7139_v27 = vrot.slane %v11048_v53, %v11133_v33  ;;  %v7218_v21 = vrot.slane %v11050_v8, %v11133_v33  ;;  %v7297_v41 = vrot.slane %v11052_v52, %v11133_v33 }
 0x27a   :  { %v11054_v48 = vpop.permute.xlu1 %6751  ;;  %v11207_v31 = vsel %vm6922_vm15, %v6921_v23, %v6916_v56  ;;  %v6982_v19 = vsel %vm6894_vm11, %v6981_v28, %v6977_v30  ;;  %v7372_v53 = vsel %vm6887_vm10, %v7371_v4, %v11021_v44  ;;  %v7451_v38 = vsel %vm6887_vm10, %v7450_v17, %v11024_v34 }
 0x27b   :  { %v7376_v63 = vrot.slane %v11054_v48, %v11133_v33  ;;  %v7061_v8 = vsel %vm6894_vm11, %v7060_v49, %v11029_v60  ;;  %v7455_v40 = vrot.slane %v11056_v26, %v11133_v33  ;;  %v7140_v52 = vsel %vm6894_vm11, %v7139_v27, %v11032_v2 }
 0x27c   :  { %v7219_v60 = vsel %vm6894_vm11, %v7218_v21, %v11037_v25  ;;  %vm7766_vm2 = vcmask 1024  }
 0x27d   :  { %v11060_v43 = vpop.permute.xlu0 %6562 }
 0x27e   :  { %v11058_v39 = vpop.permute.xlu1 %6514  ;;  %v7065_v6 = vrot.slane %v11060_v43, %v11123_v61  ;;  %v7298_v43 = vsel %vm6894_vm11, %v7297_v41, %v11040_v51 }
 0x27f   :  { %v6986_v48 = vrot.slane %v11058_v39, %v11123_v61 }
 0x280   :  { %v7066_v32 = vsel %vm6901_vm12, %v7065_v6, %v7061_v8 }
 0x281   :  { %v11064_v59 = vpop.permute.xlu0 %6658  ;;  %v6987_v51 = vsel %vm6901_vm12, %v6986_v48, %v6982_v19 }
 0x282   :  { %v11062_v16 = vpop.permute.xlu1 %6610  ;;  %v7223_v26 = vrot.slane %v11064_v59, %v11123_v61  ;;  %v7456_v59 = vsel %vm6894_vm11, %v7455_v40, %v7451_v38 }
 0x283   :  { %v7144_v44 = vrot.slane %v11062_v16, %v11123_v61  ;;  %v7377_v16 = vsel %vm6894_vm11, %v7376_v63, %v7372_v53 }
 0x284   :  { %v7224_v42 = vsel %vm6901_vm12, %v7223_v26, %v7219_v60 }
 0x285   :  { %v11068_v1 = vpop.permute.xlu0 %6754 }
 0x286   :  { %v11066_v11 = vpop.permute.xlu1 %6706  ;;  %v7381_v39 = vrot.slane %v11068_v1, %v11123_v61 }
 0x287   :  { %v7302_v2 = vrot.slane %v11066_v11, %v11123_v61 }
 0x289   :  { %v11078_v54 = vpop.permute.xlu0 %6517 }
 0x28a   :  { %v11076_v50 = vpop.permute.xlu1 %6802  ;;  %v6991_v25 = vrot.slane %v11078_v54, %v11145_v7 }
 0x28b   :  { %v7460_v33 = vrot.slane %v11076_v50, %v11123_v61  ;;  %v7145_v50 = vsel %vm6901_vm12, %v7144_v44, %v7140_v52 }
 0x28c   :  { %v6992_v55 = vsel %vm6908_vm13, %v6991_v25, %v6987_v51 }
 0x28d   :  { %v11098_v57 = vpop.permute.xlu0 %6613  ;;  %v7461_v47 = vsel %vm6901_vm12, %v7460_v33, %v7456_v59 }
 0x28e   :  { %v11096_v37 = vpop.permute.xlu1 %6565  ;;  %v7149_v18 = vrot.slane %v11098_v57, %v11145_v7 }
 0x28f   :  { %v7070_v11 = vrot.slane %v11096_v37, %v11145_v7  ;;  %v7303_v37 = vsel %vm6901_vm12, %v7302_v2, %v7298_v43 }
 0x290   :  { %v7150_v19 = vsel %vm6908_vm13, %v7149_v18, %v7145_v50  ;;  %v10_v50 = vstv %s11331_s4 }
 0x291   :  { %v11118_v12 = vpop.permute.xlu0 %6709  ;;  %11 = vst [vmem:[#allocation3] sm:$0x1] %v10_v50 }
 0x292   :  { %v11116_v10 = vpop.permute.xlu1 %6661  ;;  %v7307_v13 = vrot.slane %v11118_v12, %v11145_v7 }
 0x293   :  { %v7228_v1 = vrot.slane %v11116_v10, %v11145_v7  ;;  %v7382_v10 = vsel %vm6901_vm12, %v7381_v39, %v7377_v16 }
 0x294   :  { %v7308_v4 = vsel %vm6908_vm13, %v7307_v13, %v7303_v37 }
 0x295   :  { %v11142_v62 = vpop.permute.xlu0 %6805  ;;  %v7229_v30 = vsel %vm6908_vm13, %v7228_v1, %v7224_v42 }
 0x296   :  { %v11140_v14 = vpop.permute.xlu1 %6757  ;;  %v7465_v17 = vrot.slane %v11142_v62, %v11145_v7 }
 0x298   :  { %v7466_v40 = vsel %vm6908_vm13, %v7465_v17, %v7461_v47  ;;  %v7774_v18 = vld [vmem:[#allocation3] ss:$0 sm:$0xff] }
 0x299   :  { %v11165_v5 = vpop.permute.xlu0 %6568 }
 0x29a   :  { %v11163_v3 = vpop.permute.xlu1 %6520  ;;  %v7075_v58 = vrot.slane %v11165_v5, %v11152_v35 }
 0x29b   :  { %v6996_v54 = vrot.slane %v11163_v3, %v11152_v35  ;;  %v7071_v3 = vsel %vm6908_vm13, %v7070_v11, %v7066_v32 }
 0x29c   :  { %v7076_v44 = vsel %vm6915_vm14, %v7075_v58, %v7071_v3 }
 0x29d   :  { %v11184_v24 = vpop.permute.xlu0 %6664  ;;  %v6997_v49 = vsel %vm6915_vm14, %v6996_v54, %v6992_v55  ;;  %v7773_v55 = vld [vmem:[%s11333_s3] ss:$0 sm:$0xff] }
 0x29e   :  { %v11182_v36 = vpop.permute.xlu1 %6616  ;;  %v7233_v12 = vrot.slane %v11184_v24, %v11152_v35  ;;  %v7386_v24 = vrot.slane %v11140_v14, %v11145_v7 }
 0x29f   :  { %v7154_v57 = vrot.slane %v11182_v36, %v11152_v35 }
 0x2a0   :  { %v7234_v28 = vsel %vm6915_vm14, %v7233_v12, %v7229_v30  ;;  %v7387_v53 = vsel %vm6908_vm13, %v7386_v24, %v7382_v10 }
 0x2a1   :  { %v11202_v15 = vpop.permute.xlu0 %6760 }
 0x2a2   :  { %v6713_v45 = vpop.permute.xlu1 %6712  ;;  %v7391_v62 = vrot.slane %v11202_v15, %v11152_v35 }
 0x2a3   :  { %v7312_v29 = vrot.slane %v6713_v45, %v11152_v35 }
 0x2a5   :  { %v6524_v34 = vpop.permute.xlu0 %6523  ;;  %v7313_v14 = vsel %vm6915_vm14, %v7312_v29, %v7308_v4 }
 0x2a6   :  { %v11230_v9 = vpop.permute.xlu1 %6808  ;;  %v7001_v56 = vrot.slane %v6524_v34, %v11178_v0  ;;  %v7392_v34 = vsel %vm6915_vm14, %v7391_v62, %v7387_v53 }
 0x2a7   :  { %v7470_v7 = vrot.slane %v11230_v9, %v11152_v35  ;;  %v7155_v9 = vsel %vm6915_vm14, %v7154_v57, %v7150_v19 }
 0x2a8   :  { %v7002_v5 = vsel %vm6922_vm15, %v7001_v56, %v6997_v49 }
 0x2a9   :  { %v6620_v20 = vpop.permute.xlu0 %6619  ;;  %v7471_v60 = vsel %vm6915_vm14, %v7470_v7, %v7466_v40 }
 0x2aa   :  { %v6572_v61 = vpop.permute.xlu1 %6571  ;;  %v7159_v36 = vrot.slane %v6620_v20, %v11178_v0  ;;  %v7772_v20 = vld [vmem:[%s11332_s2] ss:$0 sm:$0xff] }
 0x2ab   :  { %v7080_v21 = vrot.slane %v6572_v61, %v11178_v0 }
 0x2ac   :  { %v7160_v26 = vsel %vm6922_vm15, %v7159_v36, %v7155_v9 }
 0x2ad   :  { %v6716_v46 = vpop.permute.xlu0 %6715 }
 0x2ae   :  { %v6668_v23 = vpop.permute.xlu1 %6667  ;;  %v7317_v45 = vrot.slane %v6716_v46, %v11178_v0 }
 0x2af   :  { %v7238_v27 = vrot.slane %v6668_v23, %v11178_v0 }
 0x2b0   :  { %v7318_v63 = vsel %vm6922_vm15, %v7317_v45, %v7313_v14 }
 0x2b1   :  { %v7239_v41 = vsel %vm6922_vm15, %v7238_v27, %v7234_v28  ;;  %v7479_v38 = vsel %vm7477_vm0, %v7318_v63, %v7002_v5  ;;  %v6812_v8 = vpop.permute.xlu0 %6811 }
 0x2b2   :  { %v7478_v15 = vsel %vm7477_vm0, %v7239_v41, %v11207_v31  ;;  %v6764_v35 = vpop.permute.xlu1 %6763  ;;  %v7475_v48 = vrot.slane %v6812_v8, %v11178_v0  ;;  %v7081_v31 = vsel %vm6922_vm15, %v7080_v21, %v7076_v44 }
 0x2b3   :  { %v7396_v52 = vrot.slane %v6764_v35, %v11178_v0  ;;  %v7482_v6 = vcombine.low %v7478_v15, %v7479_v38 }
 0x2b4   :  { %v7476_v39 = vsel %vm6922_vm15, %v7475_v48, %v7471_v60 }
 0x2b5   :  { %v7397_v2 = vsel %vm6922_vm15, %v7396_v52, %v7392_v34  ;;  %v7481_v0 = vsel %vm7477_vm0, %v7476_v39, %v7160_v26  ;;  %v7490_v33 = vrot.slane %v7482_v6, %v8541_v22 }
 0x2b6   :  { %v7480_v43 = vsel %vm7477_vm0, %v7397_v2, %v7081_v31 }
 0x2b7   :  { %v7483_v16 = vcombine.low %v7480_v43, %v7481_v0 }
 0x2b9   :  { %v7497_v25 = vrot.slane %v7483_v16, %v8541_v22 }
 0x2bb   :  { %v7498_v59 = vcombine.low %v7490_v33, %v7497_v25  ;;  %v7776_v11 = vcombine.low %v7497_v25, %v7497_v25 }
 0x2bd   :  { %v7585_v1 = vrot.slane %v7498_v59, %v8541_v22  ;;  %v7592_v13 = vrot.slane %v7776_v11, %v8541_v22 }
 0x2bf   :  { %v7593_v51 = vcombine.high %v7585_v1, %v7585_v1  ;;  %v7594_v32 = vcombine.high %v7592_v13, %v7592_v13 }
 0x2c1   :  { %7663 = vmatprep.mubr.f32.mxu0 %v7593_v51  ;;  %7733 = vmatprep.mubr.f32.mxu1 %v7594_v32 }
 0x2c2   :  { %7664 = vmatmul.mubr.f32.vlgmr.msra.gmra.mrb[0].mxu0 %v7585_v1  ;;  %7734 = vmatmul.mubr.f32.vlgmr.msra.gmra.mrb[0].mxu1 %v7592_v13 }
 0x395   :  { %v7809_v54 = vpop.f32.mrb[0].mxu0  ;;  %v7844_v61 = vpop.f32.mrb[0].mxu1 }
 0x396   :  { %v7810_v42 = vpop.f32.mrb[1].mxu0  ;;  %v7845_v37 = vpop.f32.mrb[1].mxu1 }
 0x397   :  { %v7811_v22 = vadd.f32 %v7810_v42, %v7809_v54  ;;  %v7846_v10 = vadd.f32 %v7845_v37, %v7844_v61 }
 0x399   :  { %v7666_v12 = vadd.f32 %v7811_v22, %v7772_v20 }
 0x39b   :  { %v7736_v47 = vadd.f32 %v7846_v10, %v7666_v12 }
 0x39d   :  { %v7739_v29 = vmax.f32 %v7736_v47, 0.0 }
 0x39f   :  { %v7747_v56 = vmul.f32 %v7773_v55, %v7739_v29 }
 0x3a1   :  { %v7749_v3 = vsel %vm7748_vm1, %v7747_v56, 0.0 }
 0x3a2   :  { %7750 = vadd.xlane.f32.xlu1 %v7749_v3 }
 0x42f   :  { %v7751_v30 = vpop.xlane.xlu1 %7750 }
 0x430   :  { %v7759_v4 = vadd.f32 %v7774_v18, %v7751_v30 }
 0x432   :  { %v7775_v24 = vmul.f32 -1.442695, %v7759_v4 }
 0x434   :  { %7919 = vpow2.f32 %v7775_v24 }
 0x43e   :  { %v7920_v17 = vpop.eup %7919 }
 0x43f   :  { %v7763_v49 = vadd.f32 1.0, %v7920_v17 }
 0x441   :  { %7921 = vrcp.f32 %v7763_v49 }
 0x44b   :  { %v7922_v58 = vpop.eup %7921 }
 0x44c   :  { %7767 = vst.msk [vmem:[%s11334_s5] sm:$0x3] %vm7766_vm2, %v7922_v58 }

</bundles_post_ra>
